<compile_context>
chip_gen: v7x
topology: tpu7x:2x2x1
jax: 0.10.0
libtpu: 0.0.40
codegen_flags: <defaults>
</compile_context>

<pallas_src>
import functools

import jax
import jax.numpy as jnp
from jax.experimental import pallas as pl
from jax.experimental.pallas import tpu as pltpu

_TAPS = tuple((dh, dw) for dh in range(3) for dw in range(3))
_LPAD = 16  # interior column offset inside padded VMEM scratches (aligned)


def _bottleneck2_kernel(x_ref, xtop_ref, xbot_ref,
                        w1_ref, b1_ref, w2_ref, b2_ref, w3_ref, b3_ref,
                        out_ref,
                        xpad_ref, p1_ref, acc1_ref, acc2_ref):
    # x_ref    : (1, BH, W, Cin)   this row block (also the residual)
    # xtop_ref : (1, 2,  W, Cin)   rows r0-2, r0-1 (clamped; ignored at r==0)
    # xbot_ref : (1, 2,  W, Cin)   rows r0+BH, r0+BH+1 (clamped; ignored at end)
    # w1_ref   : (9, Cin, P)       conv1 3x3, tap-major, BN1 scale folded in
    # w2_ref   : (9, P,   P)       conv2 3x3, BN2 scale folded in
    # w3_ref   : (P, Cout)         conv3 1x1, BN3 scale folded in
    # b*_ref   : (1, C)            folded BN biases (f32)
    # out_ref  : (1, BH, W, Cout)
    # xpad_ref : (BH+4, WPAD, Cin) padded x window      (VMEM scratch)
    # p1_ref   : (BH+2, WPAD, P)   padded conv1 output  (VMEM scratch)
    # acc1/2   : f32 accumulators  (VMEM scratch)
    _, BH, W, Cout = out_ref.shape
    Cin = x_ref.shape[3]
    P = w1_ref.shape[2]
    WPAD = xpad_ref.shape[1]
    L = _LPAD
    R1 = BH + 2                        # conv1 rows computed (block + halo)

    r = pl.program_id(1)
    nr = pl.num_programs(1)
    cdt = xpad_ref.dtype               # compute dtype (bf16 or f32)

    # ---- stage x window (BH+4 rows) into padded VMEM scratch --------------
    xpad_ref[2:BH + 2, L:L + W, :] = x_ref[0]

    @pl.when(r > 0)
    def _():
        xpad_ref[0:2, L:L + W, :] = xtop_ref[0]

    @pl.when(r == 0)                   # top of image: zero halo rows
    def _():
        xpad_ref[0:2, :, :] = jnp.zeros((2, WPAD, Cin), cdt)

    @pl.when(r < nr - 1)
    def _():
        xpad_ref[BH + 2:BH + 4, L:L + W, :] = xbot_ref[0]

    @pl.when(r == nr - 1)              # bottom of image: zero halo rows
    def _():
        xpad_ref[BH + 2:BH + 4, :, :] = jnp.zeros((2, WPAD, Cin), cdt)

    # zero-pad columns bordering the interior (aligned 8-wide slabs only)
    xpad_ref[:, L - 8:L, :] = jnp.zeros((BH + 4, 8, Cin), cdt)
    xpad_ref[:, L + W:L + W + 8, :] = jnp.zeros((BH + 4, 8, Cin), cdt)

    # ---- conv1 3x3 (BN1 folded) + bias + ReLU over BH+2 rows --------------
    for t, (dh, dw) in enumerate(_TAPS):
        patch = xpad_ref[dh:dh + R1, L - 1 + dw:L - 1 + dw + W, :]
        contrib = jnp.dot(patch.reshape(R1 * W, Cin), w1_ref[t],
                          preferred_element_type=jnp.float32)
        if t == 0:
            acc1_ref[...] = contrib
        else:
            acc1_ref[...] += contrib
    out1 = jnp.maximum(acc1_ref[...] + b1_ref[...], 0.0)

    # stage conv1 output (with its own zero pad) for conv2
    p1_ref[:, L:L + W, :] = out1.reshape(R1, W, P).astype(cdt)
    p1_ref[:, L - 8:L, :] = jnp.zeros((R1, 8, P), cdt)
    p1_ref[:, L + W:L + W + 8, :] = jnp.zeros((R1, 8, P), cdt)

    @pl.when(r == 0)                   # conv2's zero pad above the image
    def _():
        p1_ref[0:1, :, :] = jnp.zeros((1, WPAD, P), cdt)

    @pl.when(r == nr - 1)              # conv2's zero pad below the image
    def _():
        p1_ref[R1 - 1:R1, :, :] = jnp.zeros((1, WPAD, P), cdt)

    # ---- conv2 3x3 (BN2 folded) + bias + ReLU ------------------------------
    for t, (dh, dw) in enumerate(_TAPS):
        patch = p1_ref[dh:dh + BH, L - 1 + dw:L - 1 + dw + W, :]
        contrib = jnp.dot(patch.reshape(BH * W, P), w2_ref[t],
                          preferred_element_type=jnp.float32)
        if t == 0:
            acc2_ref[...] = contrib
        else:
            acc2_ref[...] += contrib
    out2 = jnp.maximum(acc2_ref[...] + b2_ref[...], 0.0).astype(cdt)

    # ---- conv3 1x1 (BN3 folded) + bias + residual + ReLU -------------------
    out3 = jnp.dot(out2, w3_ref[...], preferred_element_type=jnp.float32)
    out3 = out3 + b3_ref[...]
    res = x_ref[0].astype(jnp.float32).reshape(BH * W, Cout)
    y = jnp.maximum(out3 + res, 0.0)
    out_ref[...] = y.reshape(1, BH, W, Cout).astype(out_ref.dtype)


def _fold_bn(gamma, beta, mean, var, eps=1e-5):
    scale = gamma / jnp.sqrt(var + eps)
    bias = beta - mean * scale
    return scale, bias


def _pick_block_rows(H):
    if H % 16 == 0 and H >= 32:
        return 16
    if H % 8 == 0 and H >= 16:
        return 8
    for bh in (8, 6, 4, 2):
        if H % bh == 0:
            return bh
    raise NotImplementedError("odd spatial height not supported")  # TODO(synk)


@functools.partial(jax.jit, static_argnames=("compute_dtype",))
def bottleneck2_pallas(x_nchw, params, *, compute_dtype=jnp.bfloat16):
    """x_nchw: (N, Cin, H, W) float32; Cin must equal planes*4."""
    w1, g1, be1, m1, v1, w2, g2, be2, m2, v2, w3, g3, be3, m3, v3 = params
    N, Cin, H, W = x_nchw.shape
    P = w1.shape[0]
    Cout = w3.shape[0]
    assert Cout == Cin, "identity shortcut requires inplanes == planes*4"

    BH = _pick_block_rows(H)
    R = H // BH
    half = BH // 2
    nhalf = H // 2
    WPAD = W + 2 * _LPAD

    # NHWC + compute dtype in one fused transpose/cast pass (no padding here).
    x = jnp.transpose(x_nchw, (0, 2, 3, 1)).astype(compute_dtype)

    s1, b1 = _fold_bn(g1, be1, m1, v1)
    s2, b2 = _fold_bn(g2, be2, m2, v2)
    s3, b3 = _fold_bn(g3, be3, m3, v3)

    # torch conv weights (Cout, Cin, kh, kw) -> tap-major, BN scale folded in.
    w1_t = (jnp.transpose(w1, (2, 3, 1, 0)).reshape(9, Cin, P) * s1)
    w2_t = (jnp.transpose(w2, (2, 3, 1, 0)).reshape(9, P, P) * s2)
    w3_t = (jnp.transpose(w3[:, :, 0, 0], (1, 0)) * s3)
    w1_t = w1_t.astype(compute_dtype)
    w2_t = w2_t.astype(compute_dtype)
    w3_t = w3_t.astype(compute_dtype)
    b1 = b1.reshape(1, P).astype(jnp.float32)
    b2 = b2.reshape(1, P).astype(jnp.float32)
    b3 = b3.reshape(1, Cout).astype(jnp.float32)

    grid_spec = pltpu.PrefetchScalarGridSpec(
        num_scalar_prefetch=0,
        grid=(N, R),
        in_specs=[
            # this row block (also serves as the residual)
            pl.BlockSpec((1, BH, W, Cin), lambda n, r: (n, r, 0, 0)),
            # 2-row halo above (clamped at the top; kernel zeros it at r==0)
            pl.BlockSpec((1, 2, W, Cin),
                         lambda n, r: (n, jnp.maximum(r * half - 1, 0), 0, 0)),
            # 2-row halo below (clamped at the bottom; zeroed at r==R-1)
            pl.BlockSpec((1, 2, W, Cin),
                         lambda n, r: (n, jnp.minimum((r + 1) * half,
                                                      nhalf - 1), 0, 0)),
            pl.BlockSpec((9, Cin, P), lambda n, r: (0, 0, 0)),
            pl.BlockSpec((1, P), lambda n, r: (0, 0)),
            pl.BlockSpec((9, P, P), lambda n, r: (0, 0, 0)),
            pl.BlockSpec((1, P), lambda n, r: (0, 0)),
            pl.BlockSpec((P, Cout), lambda n, r: (0, 0)),
            pl.BlockSpec((1, Cout), lambda n, r: (0, 0)),
        ],
        out_specs=pl.BlockSpec((1, BH, W, Cout), lambda n, r: (n, r, 0, 0)),
        scratch_shapes=[
            pltpu.VMEM((BH + 4, WPAD, Cin), compute_dtype),   # padded x window
            pltpu.VMEM((BH + 2, WPAD, P), compute_dtype),     # padded conv1 out
            pltpu.VMEM(((BH + 2) * W, P), jnp.float32),       # conv1 accumulator
            pltpu.VMEM((BH * W, P), jnp.float32),             # conv2 accumulator
        ],
    )

    out = pl.pallas_call(
        _bottleneck2_kernel,
        out_shape=jax.ShapeDtypeStruct((N, H, W, Cout), jnp.float32),
        grid_spec=grid_spec,
        compiler_params=pltpu.CompilerParams(
            dimension_semantics=("parallel", "parallel")),
    )(x, x, x, w1_t, b1, w2_t, b2, w3_t, b3)

    # TODO(synk): callers that can work in NHWC should skip these transposes.
    return jnp.transpose(out, (0, 3, 1, 2))


# ----------------------------- reference -----------------------------------
def _conv_ref(x_nhwc, w_torch):
    w = jnp.transpose(w_torch, (2, 3, 1, 0))                    # HWIO
    return jax.lax.conv_general_dilated(
        x_nhwc, w, (1, 1), 'SAME',
        dimension_numbers=('NHWC', 'HWIO', 'NHWC'))


def bottleneck2_ref(x_nchw, params):
    w1, g1, be1, m1, v1, w2, g2, be2, m2, v2, w3, g3, be3, m3, v3 = params
    x = jnp.transpose(x_nchw, (0, 2, 3, 1))

    def bn(h, g, b, m, v):
        s, bi = _fold_bn(g, b, m, v)
        return h * s.reshape(1, 1, 1, -1) + bi.reshape(1, 1, 1, -1)

    h = jax.nn.relu(bn(_conv_ref(x, w1), g1, be1, m1, v1))
    h = jax.nn.relu(bn(_conv_ref(h, w2), g2, be2, m2, v2))
    h = bn(_conv_ref(h, w3), g3, be3, m3, v3)
    h = jax.nn.relu(h + x)
    return jnp.transpose(h, (0, 3, 1, 2))


if __name__ == "__main__":
    # small shapes: planes=4, inplanes=planes*4=16, batch=2, spatial=16
    N, planes, H, W = 2, 4, 16, 16
    inplanes = planes * 4
    Cout = planes * 4

    key = jax.random.PRNGKey(0)
    ks = jax.random.split(key, 8)
    x = jax.random.normal(ks[0], (N, inplanes, H, W), jnp.float32)

    def bn_params(k, c):
        k1, k2, k3, k4 = jax.random.split(k, 4)
        gamma = 1.0 + 0.1 * jax.random.normal(k1, (c,), jnp.float32)
        beta = 0.1 * jax.random.normal(k2, (c,), jnp.float32)
        mean = 0.1 * jax.random.normal(k3, (c,), jnp.float32)
        var = jnp.abs(jax.random.normal(k4, (c,), jnp.float32)) + 0.5
        return gamma, beta, mean, var

    w1 = 0.1 * jax.random.normal(ks[1], (planes, inplanes, 3, 3), jnp.float32)
    w2 = 0.1 * jax.random.normal(ks[2], (planes, planes, 3, 3), jnp.float32)
    w3 = 0.1 * jax.random.normal(ks[3], (Cout, planes, 1, 1), jnp.float32)
    g1, be1, m1, v1 = bn_params(ks[4], planes)
    g2, be2, m2, v2 = bn_params(ks[5], planes)
    g3, be3, m3, v3 = bn_params(ks[6], Cout)

    params = (w1, g1, be1, m1, v1, w2, g2, be2, m2, v2, w3, g3, be3, m3, v3)

    ref = jax.block_until_ready(bottleneck2_ref(x, params))

    # Strict structural/correctness check in f32.
    out_f32 = jax.block_until_ready(
        bottleneck2_pallas(x, params, compute_dtype=jnp.float32))
    assert out_f32.shape == (N, Cout, H, W)
    err32 = float(jnp.max(jnp.abs(out_f32 - ref)))
    assert jnp.allclose(out_f32, ref, atol=3e-4, rtol=3e-4), err32

    # Fast bf16 path (f32 accumulation): loose sanity check.
    out_bf16 = jax.block_until_ready(
        bottleneck2_pallas(x, params, compute_dtype=jnp.bfloat16))
    errbf = float(jnp.max(jnp.abs(out_bf16 - ref)))
    assert jnp.allclose(out_bf16, ref, atol=2e-1, rtol=1e-1), errbf

    print("KERNEL_OK")
</pallas_src>

<mosaic_0001>
module attributes {stable_mosaic.version = 11 : i64} {
  func.func @_bottleneck2_kernel(%arg0: i32, %arg1: i32, %arg2: memref<1x8x16x16xf32, #tpu.memory_space<vmem>>, %arg3: memref<1x2x16x16xf32, #tpu.memory_space<vmem>>, %arg4: memref<1x2x16x16xf32, #tpu.memory_space<vmem>>, %arg5: memref<9x16x4xf32, #tpu.memory_space<vmem>>, %arg6: memref<1x4xf32, #tpu.memory_space<vmem>>, %arg7: memref<9x4x4xf32, #tpu.memory_space<vmem>>, %arg8: memref<1x4xf32, #tpu.memory_space<vmem>>, %arg9: memref<4x16xf32, #tpu.memory_space<vmem>>, %arg10: memref<1x16xf32, #tpu.memory_space<vmem>>, %arg11: memref<1x8x16x16xf32, #tpu.memory_space<vmem>>, %arg12: memref<12x48x16xf32, #tpu.memory_space<vmem>>, %arg13: memref<10x48x4xf32, #tpu.memory_space<vmem>>, %arg14: memref<160x4xf32, #tpu.memory_space<vmem>>, %arg15: memref<128x4xf32, #tpu.memory_space<vmem>>) attributes {dimension_semantics = [#tpu.dimension_semantics<parallel>, #tpu.dimension_semantics<parallel>], iteration_bounds = array<i64: 2, 2>, scalar_prefetch = 0 : i64, scratch_operands = 4 : i64, tpu.core_type = #tpu.core_type<tc>, window_params = [{transform_indices = @transform_0, window_bounds = array<i64: 1, 8, 16, 16>}, {transform_indices = @transform_1, window_bounds = array<i64: 1, 2, 16, 16>}, {transform_indices = @transform_2, window_bounds = array<i64: 1, 2, 16, 16>}, {pipeline_mode = #tpu.pipeline_mode<synchronous>, transform_indices = @transform_3, window_bounds = array<i64: 9, 16, 4>}, {pipeline_mode = #tpu.pipeline_mode<synchronous>, transform_indices = @transform_4, window_bounds = array<i64: 1, 4>}, {pipeline_mode = #tpu.pipeline_mode<synchronous>, transform_indices = @transform_5, window_bounds = array<i64: 9, 4, 4>}, {pipeline_mode = #tpu.pipeline_mode<synchronous>, transform_indices = @transform_6, window_bounds = array<i64: 1, 4>}, {pipeline_mode = #tpu.pipeline_mode<synchronous>, transform_indices = @transform_7, window_bounds = array<i64: 4, 16>}, {pipeline_mode = #tpu.pipeline_mode<synchronous>, transform_indices = @transform_8, window_bounds = array<i64: 1, 16>}, {transform_indices = @transform_9, window_bounds = array<i64: 1, 8, 16, 16>}]} {
    %c0 = arith.constant 0 : index
    %c0_0 = arith.constant 0 : index
    %c0_1 = arith.constant 0 : index
    %c0_2 = arith.constant 0 : index
    %0 = vector.load %arg2[%c0, %c0_0, %c0_1, %c0_2] : memref<1x8x16x16xf32, #tpu.memory_space<vmem>>, vector<1x8x16x16xf32>
    %1 = vector.shape_cast %0 : vector<1x8x16x16xf32> to vector<8x16x16xf32>
    %c2 = arith.constant 2 : index
    %c16 = arith.constant 16 : index
    %c0_3 = arith.constant 0 : index
    %2 = vector.load %arg12[%c2, %c16, %c0_3] : memref<12x48x16xf32, #tpu.memory_space<vmem>>, vector<8x16x16xf32>
    tpu.vector_store %arg12[%c2, %c16, %c0_3], %1 {strides = array<i32>} : memref<12x48x16xf32, #tpu.memory_space<vmem>>, vector<8x16x16xf32>,
    %c0_i32 = arith.constant 0 : i32
    %3 = arith.cmpi sgt, %arg1, %c0_i32 : i32
    %4 = arith.extui %3 : i1 to i32
    %c0_i32_4 = arith.constant 0 : i32
    %5 = arith.cmpi ne, %4, %c0_i32_4 : i32
    scf.if %5 {
      %c0_240 = arith.constant 0 : index
      %c0_241 = arith.constant 0 : index
      %c0_242 = arith.constant 0 : index
      %c0_243 = arith.constant 0 : index
      %196 = vector.load %arg3[%c0_240, %c0_241, %c0_242, %c0_243] : memref<1x2x16x16xf32, #tpu.memory_space<vmem>>, vector<1x2x16x16xf32>
      %197 = vector.shape_cast %196 : vector<1x2x16x16xf32> to vector<2x16x16xf32>
      %c0_244 = arith.constant 0 : index
      %c16_245 = arith.constant 16 : index
      %c0_246 = arith.constant 0 : index
      %198 = vector.load %arg12[%c0_244, %c16_245, %c0_246] : memref<12x48x16xf32, #tpu.memory_space<vmem>>, vector<2x16x16xf32>
      tpu.vector_store %arg12[%c0_244, %c16_245, %c0_246], %197 {strides = array<i32>} : memref<12x48x16xf32, #tpu.memory_space<vmem>>, vector<2x16x16xf32>,
    } else {
    }
    %c0_i32_5 = arith.constant 0 : i32
    %6 = arith.cmpi eq, %arg1, %c0_i32_5 : i32
    %7 = arith.extui %6 : i1 to i32
    %c0_i32_6 = arith.constant 0 : i32
    %8 = arith.cmpi ne, %7, %c0_i32_6 : i32
    scf.if %8 {
      %cst_240 = arith.constant 0.000000e+00 : f32
      %196 = vector.broadcast %cst_240 : f32 to vector<2x48x16xf32>
      %c0_241 = arith.constant 0 : index
      %c0_242 = arith.constant 0 : index
      %c0_243 = arith.constant 0 : index
      %197 = vector.load %arg12[%c0_241, %c0_242, %c0_243] : memref<12x48x16xf32, #tpu.memory_space<vmem>>, vector<2x48x16xf32>
      tpu.vector_store %arg12[%c0_241, %c0_242, %c0_243], %196 {strides = array<i32>} : memref<12x48x16xf32, #tpu.memory_space<vmem>>, vector<2x48x16xf32>,
    } else {
    }
    %c1_i32 = arith.constant 1 : i32
    %9 = arith.cmpi slt, %arg1, %c1_i32 : i32
    %10 = arith.extui %9 : i1 to i32
    %c0_i32_7 = arith.constant 0 : i32
    %11 = arith.cmpi ne, %10, %c0_i32_7 : i32
    scf.if %11 {
      %c0_240 = arith.constant 0 : index
      %c0_241 = arith.constant 0 : index
      %c0_242 = arith.constant 0 : index
      %c0_243 = arith.constant 0 : index
      %196 = vector.load %arg4[%c0_240, %c0_241, %c0_242, %c0_243] : memref<1x2x16x16xf32, #tpu.memory_space<vmem>>, vector<1x2x16x16xf32>
      %197 = vector.shape_cast %196 : vector<1x2x16x16xf32> to vector<2x16x16xf32>
      %c10 = arith.constant 10 : index
      %c16_244 = arith.constant 16 : index
      %c0_245 = arith.constant 0 : index
      %198 = vector.load %arg12[%c10, %c16_244, %c0_245] : memref<12x48x16xf32, #tpu.memory_space<vmem>>, vector<2x16x16xf32>
      tpu.vector_store %arg12[%c10, %c16_244, %c0_245], %197 {strides = array<i32>} : memref<12x48x16xf32, #tpu.memory_space<vmem>>, vector<2x16x16xf32>,
    } else {
    }
    %c1_i32_8 = arith.constant 1 : i32
    %12 = arith.cmpi eq, %arg1, %c1_i32_8 : i32
    %13 = arith.extui %12 : i1 to i32
    %c0_i32_9 = arith.constant 0 : i32
    %14 = arith.cmpi ne, %13, %c0_i32_9 : i32
    scf.if %14 {
      %cst_240 = arith.constant 0.000000e+00 : f32
      %196 = vector.broadcast %cst_240 : f32 to vector<2x48x16xf32>
      %c10 = arith.constant 10 : index
      %c0_241 = arith.constant 0 : index
      %c0_242 = arith.constant 0 : index
      %197 = vector.load %arg12[%c10, %c0_241, %c0_242] : memref<12x48x16xf32, #tpu.memory_space<vmem>>, vector<2x48x16xf32>
      tpu.vector_store %arg12[%c10, %c0_241, %c0_242], %196 {strides = array<i32>} : memref<12x48x16xf32, #tpu.memory_space<vmem>>, vector<2x48x16xf32>,
    } else {
    }
    %cst = arith.constant 0.000000e+00 : f32
    %15 = vector.broadcast %cst : f32 to vector<12x8x16xf32>
    %c0_10 = arith.constant 0 : index
    %c8 = arith.constant 8 : index
    %c0_11 = arith.constant 0 : index
    %16 = vector.load %arg12[%c0_10, %c8, %c0_11] : memref<12x48x16xf32, #tpu.memory_space<vmem>>, vector<12x8x16xf32>
    tpu.vector_store %arg12[%c0_10, %c8, %c0_11], %15 {strides = array<i32>} : memref<12x48x16xf32, #tpu.memory_space<vmem>>, vector<12x8x16xf32>,
    %cst_12 = arith.constant 0.000000e+00 : f32
    %17 = vector.broadcast %cst_12 : f32 to vector<12x8x16xf32>
    %c0_13 = arith.constant 0 : index
    %c32 = arith.constant 32 : index
    %c0_14 = arith.constant 0 : index
    %18 = vector.load %arg12[%c0_13, %c32, %c0_14] : memref<12x48x16xf32, #tpu.memory_space<vmem>>, vector<12x8x16xf32>
    tpu.vector_store %arg12[%c0_13, %c32, %c0_14], %17 {strides = array<i32>} : memref<12x48x16xf32, #tpu.memory_space<vmem>>, vector<12x8x16xf32>,
    %c0_15 = arith.constant 0 : index
    %c15 = arith.constant 15 : index
    %c0_16 = arith.constant 0 : index
    %19 = vector.load %arg12[%c0_15, %c15, %c0_16] : memref<12x48x16xf32, #tpu.memory_space<vmem>>, vector<10x16x16xf32>
    %20 = vector.shape_cast %19 : vector<10x16x16xf32> to vector<160x16xf32>
    %c0_17 = arith.constant 0 : index
    %c0_18 = arith.constant 0 : index
    %c0_19 = arith.constant 0 : index
    %21 = vector.load %arg5[%c0_17, %c0_18, %c0_19] : memref<9x16x4xf32, #tpu.memory_space<vmem>>, vector<1x16x4xf32>
    %22 = vector.shape_cast %21 : vector<1x16x4xf32> to vector<16x4xf32>
    %cst_20 = arith.constant dense<0.000000e+00> : vector<160x4xf32>
    %23 = tpu.matmul %20, %22, %cst_20 {dimension_numbers = #tpu.dot_dimension_numbers<[1], [0], [0], [1], [0, 0, 1, 1], [], []>} : vector<160x16xf32>, vector<16x4xf32>, vector<160x4xf32> -> vector<160x4xf32>
    %c0_21 = arith.constant 0 : index
    %c0_22 = arith.constant 0 : index
    %24 = vector.load %arg14[%c0_21, %c0_22] : memref<160x4xf32, #tpu.memory_space<vmem>>, vector<160x4xf32>
    tpu.vector_store %arg14[%c0_21, %c0_22], %23 {strides = array<i32>} : memref<160x4xf32, #tpu.memory_space<vmem>>, vector<160x4xf32>,
    %c0_23 = arith.constant 0 : index
    %c16_24 = arith.constant 16 : index
    %c0_25 = arith.constant 0 : index
    %25 = vector.load %arg12[%c0_23, %c16_24, %c0_25] : memref<12x48x16xf32, #tpu.memory_space<vmem>>, vector<10x16x16xf32>
    %26 = vector.shape_cast %25 : vector<10x16x16xf32> to vector<160x16xf32>
    %c1 = arith.constant 1 : index
    %c0_26 = arith.constant 0 : index
    %c0_27 = arith.constant 0 : index
    %27 = vector.load %arg5[%c1, %c0_26, %c0_27] : memref<9x16x4xf32, #tpu.memory_space<vmem>>, vector<1x16x4xf32>
    %28 = vector.shape_cast %27 : vector<1x16x4xf32> to vector<16x4xf32>
    %cst_28 = arith.constant dense<0.000000e+00> : vector<160x4xf32>
    %29 = tpu.matmul %26, %28, %cst_28 {dimension_numbers = #tpu.dot_dimension_numbers<[1], [0], [0], [1], [0, 0, 1, 1], [], []>} : vector<160x16xf32>, vector<16x4xf32>, vector<160x4xf32> -> vector<160x4xf32>
    %c0_29 = arith.constant 0 : index
    %c0_30 = arith.constant 0 : index
    %30 = vector.load %arg14[%c0_29, %c0_30] : memref<160x4xf32, #tpu.memory_space<vmem>>, vector<160x4xf32>
    %31 = arith.addf %30, %29 : vector<160x4xf32>
    %c0_31 = arith.constant 0 : index
    %c0_32 = arith.constant 0 : index
    %32 = vector.load %arg14[%c0_31, %c0_32] : memref<160x4xf32, #tpu.memory_space<vmem>>, vector<160x4xf32>
    tpu.vector_store %arg14[%c0_31, %c0_32], %31 {strides = array<i32>} : memref<160x4xf32, #tpu.memory_space<vmem>>, vector<160x4xf32>,
    %c0_33 = arith.constant 0 : index
    %c17 = arith.constant 17 : index
    %c0_34 = arith.constant 0 : index
    %33 = vector.load %arg12[%c0_33, %c17, %c0_34] : memref<12x48x16xf32, #tpu.memory_space<vmem>>, vector<10x16x16xf32>
    %34 = vector.shape_cast %33 : vector<10x16x16xf32> to vector<160x16xf32>
    %c2_35 = arith.constant 2 : index
    %c0_36 = arith.constant 0 : index
    %c0_37 = arith.constant 0 : index
    %35 = vector.load %arg5[%c2_35, %c0_36, %c0_37] : memref<9x16x4xf32, #tpu.memory_space<vmem>>, vector<1x16x4xf32>
    %36 = vector.shape_cast %35 : vector<1x16x4xf32> to vector<16x4xf32>
    %cst_38 = arith.constant dense<0.000000e+00> : vector<160x4xf32>
    %37 = tpu.matmul %34, %36, %cst_38 {dimension_numbers = #tpu.dot_dimension_numbers<[1], [0], [0], [1], [0, 0, 1, 1], [], []>} : vector<160x16xf32>, vector<16x4xf32>, vector<160x4xf32> -> vector<160x4xf32>
    %c0_39 = arith.constant 0 : index
    %c0_40 = arith.constant 0 : index
    %38 = vector.load %arg14[%c0_39, %c0_40] : memref<160x4xf32, #tpu.memory_space<vmem>>, vector<160x4xf32>
    %39 = arith.addf %38, %37 : vector<160x4xf32>
    %c0_41 = arith.constant 0 : index
    %c0_42 = arith.constant 0 : index
    %40 = vector.load %arg14[%c0_41, %c0_42] : memref<160x4xf32, #tpu.memory_space<vmem>>, vector<160x4xf32>
    tpu.vector_store %arg14[%c0_41, %c0_42], %39 {strides = array<i32>} : memref<160x4xf32, #tpu.memory_space<vmem>>, vector<160x4xf32>,
    %c1_43 = arith.constant 1 : index
    %c15_44 = arith.constant 15 : index
    %c0_45 = arith.constant 0 : index
    %41 = vector.load %arg12[%c1_43, %c15_44, %c0_45] : memref<12x48x16xf32, #tpu.memory_space<vmem>>, vector<10x16x16xf32>
    %42 = vector.shape_cast %41 : vector<10x16x16xf32> to vector<160x16xf32>
    %c3 = arith.constant 3 : index
    %c0_46 = arith.constant 0 : index
    %c0_47 = arith.constant 0 : index
    %43 = vector.load %arg5[%c3, %c0_46, %c0_47] : memref<9x16x4xf32, #tpu.memory_space<vmem>>, vector<1x16x4xf32>
    %44 = vector.shape_cast %43 : vector<1x16x4xf32> to vector<16x4xf32>
    %cst_48 = arith.constant dense<0.000000e+00> : vector<160x4xf32>
    %45 = tpu.matmul %42, %44, %cst_48 {dimension_numbers = #tpu.dot_dimension_numbers<[1], [0], [0], [1], [0, 0, 1, 1], [], []>} : vector<160x16xf32>, vector<16x4xf32>, vector<160x4xf32> -> vector<160x4xf32>
    %c0_49 = arith.constant 0 : index
    %c0_50 = arith.constant 0 : index
    %46 = vector.load %arg14[%c0_49, %c0_50] : memref<160x4xf32, #tpu.memory_space<vmem>>, vector<160x4xf32>
    %47 = arith.addf %46, %45 : vector<160x4xf32>
    %c0_51 = arith.constant 0 : index
    %c0_52 = arith.constant 0 : index
    %48 = vector.load %arg14[%c0_51, %c0_52] : memref<160x4xf32, #tpu.memory_space<vmem>>, vector<160x4xf32>
    tpu.vector_store %arg14[%c0_51, %c0_52], %47 {strides = array<i32>} : memref<160x4xf32, #tpu.memory_space<vmem>>, vector<160x4xf32>,
    %c1_53 = arith.constant 1 : index
    %c16_54 = arith.constant 16 : index
    %c0_55 = arith.constant 0 : index
    %49 = vector.load %arg12[%c1_53, %c16_54, %c0_55] : memref<12x48x16xf32, #tpu.memory_space<vmem>>, vector<10x16x16xf32>
    %50 = vector.shape_cast %49 : vector<10x16x16xf32> to vector<160x16xf32>
    %c4 = arith.constant 4 : index
    %c0_56 = arith.constant 0 : index
    %c0_57 = arith.constant 0 : index
    %51 = vector.load %arg5[%c4, %c0_56, %c0_57] : memref<9x16x4xf32, #tpu.memory_space<vmem>>, vector<1x16x4xf32>
    %52 = vector.shape_cast %51 : vector<1x16x4xf32> to vector<16x4xf32>
    %cst_58 = arith.constant dense<0.000000e+00> : vector<160x4xf32>
    %53 = tpu.matmul %50, %52, %cst_58 {dimension_numbers = #tpu.dot_dimension_numbers<[1], [0], [0], [1], [0, 0, 1, 1], [], []>} : vector<160x16xf32>, vector<16x4xf32>, vector<160x4xf32> -> vector<160x4xf32>
    %c0_59 = arith.constant 0 : index
    %c0_60 = arith.constant 0 : index
    %54 = vector.load %arg14[%c0_59, %c0_60] : memref<160x4xf32, #tpu.memory_space<vmem>>, vector<160x4xf32>
    %55 = arith.addf %54, %53 : vector<160x4xf32>
    %c0_61 = arith.constant 0 : index
    %c0_62 = arith.constant 0 : index
    %56 = vector.load %arg14[%c0_61, %c0_62] : memref<160x4xf32, #tpu.memory_space<vmem>>, vector<160x4xf32>
    tpu.vector_store %arg14[%c0_61, %c0_62], %55 {strides = array<i32>} : memref<160x4xf32, #tpu.memory_space<vmem>>, vector<160x4xf32>,
    %c1_63 = arith.constant 1 : index
    %c17_64 = arith.constant 17 : index
    %c0_65 = arith.constant 0 : index
    %57 = vector.load %arg12[%c1_63, %c17_64, %c0_65] : memref<12x48x16xf32, #tpu.memory_space<vmem>>, vector<10x16x16xf32>
    %58 = vector.shape_cast %57 : vector<10x16x16xf32> to vector<160x16xf32>
    %c5 = arith.constant 5 : index
    %c0_66 = arith.constant 0 : index
    %c0_67 = arith.constant 0 : index
    %59 = vector.load %arg5[%c5, %c0_66, %c0_67] : memref<9x16x4xf32, #tpu.memory_space<vmem>>, vector<1x16x4xf32>
    %60 = vector.shape_cast %59 : vector<1x16x4xf32> to vector<16x4xf32>
    %cst_68 = arith.constant dense<0.000000e+00> : vector<160x4xf32>
    %61 = tpu.matmul %58, %60, %cst_68 {dimension_numbers = #tpu.dot_dimension_numbers<[1], [0], [0], [1], [0, 0, 1, 1], [], []>} : vector<160x16xf32>, vector<16x4xf32>, vector<160x4xf32> -> vector<160x4xf32>
    %c0_69 = arith.constant 0 : index
    %c0_70 = arith.constant 0 : index
    %62 = vector.load %arg14[%c0_69, %c0_70] : memref<160x4xf32, #tpu.memory_space<vmem>>, vector<160x4xf32>
    %63 = arith.addf %62, %61 : vector<160x4xf32>
    %c0_71 = arith.constant 0 : index
    %c0_72 = arith.constant 0 : index
    %64 = vector.load %arg14[%c0_71, %c0_72] : memref<160x4xf32, #tpu.memory_space<vmem>>, vector<160x4xf32>
    tpu.vector_store %arg14[%c0_71, %c0_72], %63 {strides = array<i32>} : memref<160x4xf32, #tpu.memory_space<vmem>>, vector<160x4xf32>,
    %c2_73 = arith.constant 2 : index
    %c15_74 = arith.constant 15 : index
    %c0_75 = arith.constant 0 : index
    %65 = vector.load %arg12[%c2_73, %c15_74, %c0_75] : memref<12x48x16xf32, #tpu.memory_space<vmem>>, vector<10x16x16xf32>
    %66 = vector.shape_cast %65 : vector<10x16x16xf32> to vector<160x16xf32>
    %c6 = arith.constant 6 : index
    %c0_76 = arith.constant 0 : index
    %c0_77 = arith.constant 0 : index
    %67 = vector.load %arg5[%c6, %c0_76, %c0_77] : memref<9x16x4xf32, #tpu.memory_space<vmem>>, vector<1x16x4xf32>
    %68 = vector.shape_cast %67 : vector<1x16x4xf32> to vector<16x4xf32>
    %cst_78 = arith.constant dense<0.000000e+00> : vector<160x4xf32>
    %69 = tpu.matmul %66, %68, %cst_78 {dimension_numbers = #tpu.dot_dimension_numbers<[1], [0], [0], [1], [0, 0, 1, 1], [], []>} : vector<160x16xf32>, vector<16x4xf32>, vector<160x4xf32> -> vector<160x4xf32>
    %c0_79 = arith.constant 0 : index
    %c0_80 = arith.constant 0 : index
    %70 = vector.load %arg14[%c0_79, %c0_80] : memref<160x4xf32, #tpu.memory_space<vmem>>, vector<160x4xf32>
    %71 = arith.addf %70, %69 : vector<160x4xf32>
    %c0_81 = arith.constant 0 : index
    %c0_82 = arith.constant 0 : index
    %72 = vector.load %arg14[%c0_81, %c0_82] : memref<160x4xf32, #tpu.memory_space<vmem>>, vector<160x4xf32>
    tpu.vector_store %arg14[%c0_81, %c0_82], %71 {strides = array<i32>} : memref<160x4xf32, #tpu.memory_space<vmem>>, vector<160x4xf32>,
    %c2_83 = arith.constant 2 : index
    %c16_84 = arith.constant 16 : index
    %c0_85 = arith.constant 0 : index
    %73 = vector.load %arg12[%c2_83, %c16_84, %c0_85] : memref<12x48x16xf32, #tpu.memory_space<vmem>>, vector<10x16x16xf32>
    %74 = vector.shape_cast %73 : vector<10x16x16xf32> to vector<160x16xf32>
    %c7 = arith.constant 7 : index
    %c0_86 = arith.constant 0 : index
    %c0_87 = arith.constant 0 : index
    %75 = vector.load %arg5[%c7, %c0_86, %c0_87] : memref<9x16x4xf32, #tpu.memory_space<vmem>>, vector<1x16x4xf32>
    %76 = vector.shape_cast %75 : vector<1x16x4xf32> to vector<16x4xf32>
    %cst_88 = arith.constant dense<0.000000e+00> : vector<160x4xf32>
    %77 = tpu.matmul %74, %76, %cst_88 {dimension_numbers = #tpu.dot_dimension_numbers<[1], [0], [0], [1], [0, 0, 1, 1], [], []>} : vector<160x16xf32>, vector<16x4xf32>, vector<160x4xf32> -> vector<160x4xf32>
    %c0_89 = arith.constant 0 : index
    %c0_90 = arith.constant 0 : index
    %78 = vector.load %arg14[%c0_89, %c0_90] : memref<160x4xf32, #tpu.memory_space<vmem>>, vector<160x4xf32>
    %79 = arith.addf %78, %77 : vector<160x4xf32>
    %c0_91 = arith.constant 0 : index
    %c0_92 = arith.constant 0 : index
    %80 = vector.load %arg14[%c0_91, %c0_92] : memref<160x4xf32, #tpu.memory_space<vmem>>, vector<160x4xf32>
    tpu.vector_store %arg14[%c0_91, %c0_92], %79 {strides = array<i32>} : memref<160x4xf32, #tpu.memory_space<vmem>>, vector<160x4xf32>,
    %c2_93 = arith.constant 2 : index
    %c17_94 = arith.constant 17 : index
    %c0_95 = arith.constant 0 : index
    %81 = vector.load %arg12[%c2_93, %c17_94, %c0_95] : memref<12x48x16xf32, #tpu.memory_space<vmem>>, vector<10x16x16xf32>
    %82 = vector.shape_cast %81 : vector<10x16x16xf32> to vector<160x16xf32>
    %c8_96 = arith.constant 8 : index
    %c0_97 = arith.constant 0 : index
    %c0_98 = arith.constant 0 : index
    %83 = vector.load %arg5[%c8_96, %c0_97, %c0_98] : memref<9x16x4xf32, #tpu.memory_space<vmem>>, vector<1x16x4xf32>
    %84 = vector.shape_cast %83 : vector<1x16x4xf32> to vector<16x4xf32>
    %cst_99 = arith.constant dense<0.000000e+00> : vector<160x4xf32>
    %85 = tpu.matmul %82, %84, %cst_99 {dimension_numbers = #tpu.dot_dimension_numbers<[1], [0], [0], [1], [0, 0, 1, 1], [], []>} : vector<160x16xf32>, vector<16x4xf32>, vector<160x4xf32> -> vector<160x4xf32>
    %c0_100 = arith.constant 0 : index
    %c0_101 = arith.constant 0 : index
    %86 = vector.load %arg14[%c0_100, %c0_101] : memref<160x4xf32, #tpu.memory_space<vmem>>, vector<160x4xf32>
    %87 = arith.addf %86, %85 : vector<160x4xf32>
    %c0_102 = arith.constant 0 : index
    %c0_103 = arith.constant 0 : index
    %88 = vector.load %arg14[%c0_102, %c0_103] : memref<160x4xf32, #tpu.memory_space<vmem>>, vector<160x4xf32>
    tpu.vector_store %arg14[%c0_102, %c0_103], %87 {strides = array<i32>} : memref<160x4xf32, #tpu.memory_space<vmem>>, vector<160x4xf32>,
    %c0_104 = arith.constant 0 : index
    %c0_105 = arith.constant 0 : index
    %89 = vector.load %arg14[%c0_104, %c0_105] : memref<160x4xf32, #tpu.memory_space<vmem>>, vector<160x4xf32>
    %c0_106 = arith.constant 0 : index
    %c0_107 = arith.constant 0 : index
    %90 = vector.load %arg6[%c0_106, %c0_107] : memref<1x4xf32, #tpu.memory_space<vmem>>, vector<1x4xf32>
    %91 = vector.broadcast %90 : vector<1x4xf32> to vector<160x4xf32>
    %92 = arith.addf %89, %91 : vector<160x4xf32>
    %cst_108 = arith.constant 0.000000e+00 : f32
    %93 = vector.broadcast %cst_108 : f32 to vector<160x4xf32>
    %94 = arith.maximumf %92, %93 : vector<160x4xf32>
    %95 = vector.shape_cast %94 : vector<160x4xf32> to vector<10x16x4xf32>
    %c0_109 = arith.constant 0 : index
    %c16_110 = arith.constant 16 : index
    %c0_111 = arith.constant 0 : index
    %96 = vector.load %arg13[%c0_109, %c16_110, %c0_111] : memref<10x48x4xf32, #tpu.memory_space<vmem>>, vector<10x16x4xf32>
    tpu.vector_store %arg13[%c0_109, %c16_110, %c0_111], %95 {strides = array<i32>} : memref<10x48x4xf32, #tpu.memory_space<vmem>>, vector<10x16x4xf32>,
    %cst_112 = arith.constant 0.000000e+00 : f32
    %97 = vector.broadcast %cst_112 : f32 to vector<10x8x4xf32>
    %c0_113 = arith.constant 0 : index
    %c8_114 = arith.constant 8 : index
    %c0_115 = arith.constant 0 : index
    %98 = vector.load %arg13[%c0_113, %c8_114, %c0_115] : memref<10x48x4xf32, #tpu.memory_space<vmem>>, vector<10x8x4xf32>
    tpu.vector_store %arg13[%c0_113, %c8_114, %c0_115], %97 {strides = array<i32>} : memref<10x48x4xf32, #tpu.memory_space<vmem>>, vector<10x8x4xf32>,
    %cst_116 = arith.constant 0.000000e+00 : f32
    %99 = vector.broadcast %cst_116 : f32 to vector<10x8x4xf32>
    %c0_117 = arith.constant 0 : index
    %c32_118 = arith.constant 32 : index
    %c0_119 = arith.constant 0 : index
    %100 = vector.load %arg13[%c0_117, %c32_118, %c0_119] : memref<10x48x4xf32, #tpu.memory_space<vmem>>, vector<10x8x4xf32>
    tpu.vector_store %arg13[%c0_117, %c32_118, %c0_119], %99 {strides = array<i32>} : memref<10x48x4xf32, #tpu.memory_space<vmem>>, vector<10x8x4xf32>,
    %c0_i32_120 = arith.constant 0 : i32
    %101 = arith.cmpi eq, %arg1, %c0_i32_120 : i32
    %102 = arith.extui %101 : i1 to i32
    %c0_i32_121 = arith.constant 0 : i32
    %103 = arith.cmpi ne, %102, %c0_i32_121 : i32
    scf.if %103 {
      %cst_240 = arith.constant 0.000000e+00 : f32
      %196 = vector.broadcast %cst_240 : f32 to vector<1x48x4xf32>
      %c0_241 = arith.constant 0 : index
      %c0_242 = arith.constant 0 : index
      %c0_243 = arith.constant 0 : index
      %197 = vector.load %arg13[%c0_241, %c0_242, %c0_243] : memref<10x48x4xf32, #tpu.memory_space<vmem>>, vector<1x48x4xf32>
      tpu.vector_store %arg13[%c0_241, %c0_242, %c0_243], %196 {strides = array<i32>} : memref<10x48x4xf32, #tpu.memory_space<vmem>>, vector<1x48x4xf32>,
    } else {
    }
    %c1_i32_122 = arith.constant 1 : i32
    %104 = arith.cmpi eq, %arg1, %c1_i32_122 : i32
    %105 = arith.extui %104 : i1 to i32
    %c0_i32_123 = arith.constant 0 : i32
    %106 = arith.cmpi ne, %105, %c0_i32_123 : i32
    scf.if %106 {
      %cst_240 = arith.constant 0.000000e+00 : f32
      %196 = vector.broadcast %cst_240 : f32 to vector<1x48x4xf32>
      %c9 = arith.constant 9 : index
      %c0_241 = arith.constant 0 : index
      %c0_242 = arith.constant 0 : index
      %197 = vector.load %arg13[%c9, %c0_241, %c0_242] : memref<10x48x4xf32, #tpu.memory_space<vmem>>, vector<1x48x4xf32>
      tpu.vector_store %arg13[%c9, %c0_241, %c0_242], %196 {strides = array<i32>} : memref<10x48x4xf32, #tpu.memory_space<vmem>>, vector<1x48x4xf32>,
    } else {
    }
    %c0_124 = arith.constant 0 : index
    %c15_125 = arith.constant 15 : index
    %c0_126 = arith.constant 0 : index
    %107 = vector.load %arg13[%c0_124, %c15_125, %c0_126] : memref<10x48x4xf32, #tpu.memory_space<vmem>>, vector<8x16x4xf32>
    %108 = vector.shape_cast %107 : vector<8x16x4xf32> to vector<128x4xf32>
    %c0_127 = arith.constant 0 : index
    %c0_128 = arith.constant 0 : index
    %c0_129 = arith.constant 0 : index
    %109 = vector.load %arg7[%c0_127, %c0_128, %c0_129] : memref<9x4x4xf32, #tpu.memory_space<vmem>>, vector<1x4x4xf32>
    %110 = vector.shape_cast %109 : vector<1x4x4xf32> to vector<4x4xf32>
    %cst_130 = arith.constant dense<0.000000e+00> : vector<128x4xf32>
    %111 = tpu.matmul %108, %110, %cst_130 {dimension_numbers = #tpu.dot_dimension_numbers<[1], [0], [0], [1], [0, 0, 1, 1], [], []>} : vector<128x4xf32>, vector<4x4xf32>, vector<128x4xf32> -> vector<128x4xf32>
    %c0_131 = arith.constant 0 : index
    %c0_132 = arith.constant 0 : index
    %112 = vector.load %arg15[%c0_131, %c0_132] : memref<128x4xf32, #tpu.memory_space<vmem>>, vector<128x4xf32>
    tpu.vector_store %arg15[%c0_131, %c0_132], %111 {strides = array<i32>} : memref<128x4xf32, #tpu.memory_space<vmem>>, vector<128x4xf32>,
    %c0_133 = arith.constant 0 : index
    %c16_134 = arith.constant 16 : index
    %c0_135 = arith.constant 0 : index
    %113 = vector.load %arg13[%c0_133, %c16_134, %c0_135] : memref<10x48x4xf32, #tpu.memory_space<vmem>>, vector<8x16x4xf32>
    %114 = vector.shape_cast %113 : vector<8x16x4xf32> to vector<128x4xf32>
    %c1_136 = arith.constant 1 : index
    %c0_137 = arith.constant 0 : index
    %c0_138 = arith.constant 0 : index
    %115 = vector.load %arg7[%c1_136, %c0_137, %c0_138] : memref<9x4x4xf32, #tpu.memory_space<vmem>>, vector<1x4x4xf32>
    %116 = vector.shape_cast %115 : vector<1x4x4xf32> to vector<4x4xf32>
    %cst_139 = arith.constant dense<0.000000e+00> : vector<128x4xf32>
    %117 = tpu.matmul %114, %116, %cst_139 {dimension_numbers = #tpu.dot_dimension_numbers<[1], [0], [0], [1], [0, 0, 1, 1], [], []>} : vector<128x4xf32>, vector<4x4xf32>, vector<128x4xf32> -> vector<128x4xf32>
    %c0_140 = arith.constant 0 : index
    %c0_141 = arith.constant 0 : index
    %118 = vector.load %arg15[%c0_140, %c0_141] : memref<128x4xf32, #tpu.memory_space<vmem>>, vector<128x4xf32>
    %119 = arith.addf %118, %117 : vector<128x4xf32>
    %c0_142 = arith.constant 0 : index
    %c0_143 = arith.constant 0 : index
    %120 = vector.load %arg15[%c0_142, %c0_143] : memref<128x4xf32, #tpu.memory_space<vmem>>, vector<128x4xf32>
    tpu.vector_store %arg15[%c0_142, %c0_143], %119 {strides = array<i32>} : memref<128x4xf32, #tpu.memory_space<vmem>>, vector<128x4xf32>,
    %c0_144 = arith.constant 0 : index
    %c17_145 = arith.constant 17 : index
    %c0_146 = arith.constant 0 : index
    %121 = vector.load %arg13[%c0_144, %c17_145, %c0_146] : memref<10x48x4xf32, #tpu.memory_space<vmem>>, vector<8x16x4xf32>
    %122 = vector.shape_cast %121 : vector<8x16x4xf32> to vector<128x4xf32>
    %c2_147 = arith.constant 2 : index
    %c0_148 = arith.constant 0 : index
    %c0_149 = arith.constant 0 : index
    %123 = vector.load %arg7[%c2_147, %c0_148, %c0_149] : memref<9x4x4xf32, #tpu.memory_space<vmem>>, vector<1x4x4xf32>
    %124 = vector.shape_cast %123 : vector<1x4x4xf32> to vector<4x4xf32>
    %cst_150 = arith.constant dense<0.000000e+00> : vector<128x4xf32>
    %125 = tpu.matmul %122, %124, %cst_150 {dimension_numbers = #tpu.dot_dimension_numbers<[1], [0], [0], [1], [0, 0, 1, 1], [], []>} : vector<128x4xf32>, vector<4x4xf32>, vector<128x4xf32> -> vector<128x4xf32>
    %c0_151 = arith.constant 0 : index
    %c0_152 = arith.constant 0 : index
    %126 = vector.load %arg15[%c0_151, %c0_152] : memref<128x4xf32, #tpu.memory_space<vmem>>, vector<128x4xf32>
    %127 = arith.addf %126, %125 : vector<128x4xf32>
    %c0_153 = arith.constant 0 : index
    %c0_154 = arith.constant 0 : index
    %128 = vector.load %arg15[%c0_153, %c0_154] : memref<128x4xf32, #tpu.memory_space<vmem>>, vector<128x4xf32>
    tpu.vector_store %arg15[%c0_153, %c0_154], %127 {strides = array<i32>} : memref<128x4xf32, #tpu.memory_space<vmem>>, vector<128x4xf32>,
    %c1_155 = arith.constant 1 : index
    %c15_156 = arith.constant 15 : index
    %c0_157 = arith.constant 0 : index
    %129 = vector.load %arg13[%c1_155, %c15_156, %c0_157] : memref<10x48x4xf32, #tpu.memory_space<vmem>>, vector<8x16x4xf32>
    %130 = vector.shape_cast %129 : vector<8x16x4xf32> to vector<128x4xf32>
    %c3_158 = arith.constant 3 : index
    %c0_159 = arith.constant 0 : index
    %c0_160 = arith.constant 0 : index
    %131 = vector.load %arg7[%c3_158, %c0_159, %c0_160] : memref<9x4x4xf32, #tpu.memory_space<vmem>>, vector<1x4x4xf32>
    %132 = vector.shape_cast %131 : vector<1x4x4xf32> to vector<4x4xf32>
    %cst_161 = arith.constant dense<0.000000e+00> : vector<128x4xf32>
    %133 = tpu.matmul %130, %132, %cst_161 {dimension_numbers = #tpu.dot_dimension_numbers<[1], [0], [0], [1], [0, 0, 1, 1], [], []>} : vector<128x4xf32>, vector<4x4xf32>, vector<128x4xf32> -> vector<128x4xf32>
    %c0_162 = arith.constant 0 : index
    %c0_163 = arith.constant 0 : index
    %134 = vector.load %arg15[%c0_162, %c0_163] : memref<128x4xf32, #tpu.memory_space<vmem>>, vector<128x4xf32>
    %135 = arith.addf %134, %133 : vector<128x4xf32>
    %c0_164 = arith.constant 0 : index
    %c0_165 = arith.constant 0 : index
    %136 = vector.load %arg15[%c0_164, %c0_165] : memref<128x4xf32, #tpu.memory_space<vmem>>, vector<128x4xf32>
    tpu.vector_store %arg15[%c0_164, %c0_165], %135 {strides = array<i32>} : memref<128x4xf32, #tpu.memory_space<vmem>>, vector<128x4xf32>,
    %c1_166 = arith.constant 1 : index
    %c16_167 = arith.constant 16 : index
    %c0_168 = arith.constant 0 : index
    %137 = vector.load %arg13[%c1_166, %c16_167, %c0_168] : memref<10x48x4xf32, #tpu.memory_space<vmem>>, vector<8x16x4xf32>
    %138 = vector.shape_cast %137 : vector<8x16x4xf32> to vector<128x4xf32>
    %c4_169 = arith.constant 4 : index
    %c0_170 = arith.constant 0 : index
    %c0_171 = arith.constant 0 : index
    %139 = vector.load %arg7[%c4_169, %c0_170, %c0_171] : memref<9x4x4xf32, #tpu.memory_space<vmem>>, vector<1x4x4xf32>
    %140 = vector.shape_cast %139 : vector<1x4x4xf32> to vector<4x4xf32>
    %cst_172 = arith.constant dense<0.000000e+00> : vector<128x4xf32>
    %141 = tpu.matmul %138, %140, %cst_172 {dimension_numbers = #tpu.dot_dimension_numbers<[1], [0], [0], [1], [0, 0, 1, 1], [], []>} : vector<128x4xf32>, vector<4x4xf32>, vector<128x4xf32> -> vector<128x4xf32>
    %c0_173 = arith.constant 0 : index
    %c0_174 = arith.constant 0 : index
    %142 = vector.load %arg15[%c0_173, %c0_174] : memref<128x4xf32, #tpu.memory_space<vmem>>, vector<128x4xf32>
    %143 = arith.addf %142, %141 : vector<128x4xf32>
    %c0_175 = arith.constant 0 : index
    %c0_176 = arith.constant 0 : index
    %144 = vector.load %arg15[%c0_175, %c0_176] : memref<128x4xf32, #tpu.memory_space<vmem>>, vector<128x4xf32>
    tpu.vector_store %arg15[%c0_175, %c0_176], %143 {strides = array<i32>} : memref<128x4xf32, #tpu.memory_space<vmem>>, vector<128x4xf32>,
    %c1_177 = arith.constant 1 : index
    %c17_178 = arith.constant 17 : index
    %c0_179 = arith.constant 0 : index
    %145 = vector.load %arg13[%c1_177, %c17_178, %c0_179] : memref<10x48x4xf32, #tpu.memory_space<vmem>>, vector<8x16x4xf32>
    %146 = vector.shape_cast %145 : vector<8x16x4xf32> to vector<128x4xf32>
    %c5_180 = arith.constant 5 : index
    %c0_181 = arith.constant 0 : index
    %c0_182 = arith.constant 0 : index
    %147 = vector.load %arg7[%c5_180, %c0_181, %c0_182] : memref<9x4x4xf32, #tpu.memory_space<vmem>>, vector<1x4x4xf32>
    %148 = vector.shape_cast %147 : vector<1x4x4xf32> to vector<4x4xf32>
    %cst_183 = arith.constant dense<0.000000e+00> : vector<128x4xf32>
    %149 = tpu.matmul %146, %148, %cst_183 {dimension_numbers = #tpu.dot_dimension_numbers<[1], [0], [0], [1], [0, 0, 1, 1], [], []>} : vector<128x4xf32>, vector<4x4xf32>, vector<128x4xf32> -> vector<128x4xf32>
    %c0_184 = arith.constant 0 : index
    %c0_185 = arith.constant 0 : index
    %150 = vector.load %arg15[%c0_184, %c0_185] : memref<128x4xf32, #tpu.memory_space<vmem>>, vector<128x4xf32>
    %151 = arith.addf %150, %149 : vector<128x4xf32>
    %c0_186 = arith.constant 0 : index
    %c0_187 = arith.constant 0 : index
    %152 = vector.load %arg15[%c0_186, %c0_187] : memref<128x4xf32, #tpu.memory_space<vmem>>, vector<128x4xf32>
    tpu.vector_store %arg15[%c0_186, %c0_187], %151 {strides = array<i32>} : memref<128x4xf32, #tpu.memory_space<vmem>>, vector<128x4xf32>,
    %c2_188 = arith.constant 2 : index
    %c15_189 = arith.constant 15 : index
    %c0_190 = arith.constant 0 : index
    %153 = vector.load %arg13[%c2_188, %c15_189, %c0_190] : memref<10x48x4xf32, #tpu.memory_space<vmem>>, vector<8x16x4xf32>
    %154 = vector.shape_cast %153 : vector<8x16x4xf32> to vector<128x4xf32>
    %c6_191 = arith.constant 6 : index
    %c0_192 = arith.constant 0 : index
    %c0_193 = arith.constant 0 : index
    %155 = vector.load %arg7[%c6_191, %c0_192, %c0_193] : memref<9x4x4xf32, #tpu.memory_space<vmem>>, vector<1x4x4xf32>
    %156 = vector.shape_cast %155 : vector<1x4x4xf32> to vector<4x4xf32>
    %cst_194 = arith.constant dense<0.000000e+00> : vector<128x4xf32>
    %157 = tpu.matmul %154, %156, %cst_194 {dimension_numbers = #tpu.dot_dimension_numbers<[1], [0], [0], [1], [0, 0, 1, 1], [], []>} : vector<128x4xf32>, vector<4x4xf32>, vector<128x4xf32> -> vector<128x4xf32>
    %c0_195 = arith.constant 0 : index
    %c0_196 = arith.constant 0 : index
    %158 = vector.load %arg15[%c0_195, %c0_196] : memref<128x4xf32, #tpu.memory_space<vmem>>, vector<128x4xf32>
    %159 = arith.addf %158, %157 : vector<128x4xf32>
    %c0_197 = arith.constant 0 : index
    %c0_198 = arith.constant 0 : index
    %160 = vector.load %arg15[%c0_197, %c0_198] : memref<128x4xf32, #tpu.memory_space<vmem>>, vector<128x4xf32>
    tpu.vector_store %arg15[%c0_197, %c0_198], %159 {strides = array<i32>} : memref<128x4xf32, #tpu.memory_space<vmem>>, vector<128x4xf32>,
    %c2_199 = arith.constant 2 : index
    %c16_200 = arith.constant 16 : index
    %c0_201 = arith.constant 0 : index
    %161 = vector.load %arg13[%c2_199, %c16_200, %c0_201] : memref<10x48x4xf32, #tpu.memory_space<vmem>>, vector<8x16x4xf32>
    %162 = vector.shape_cast %161 : vector<8x16x4xf32> to vector<128x4xf32>
    %c7_202 = arith.constant 7 : index
    %c0_203 = arith.constant 0 : index
    %c0_204 = arith.constant 0 : index
    %163 = vector.load %arg7[%c7_202, %c0_203, %c0_204] : memref<9x4x4xf32, #tpu.memory_space<vmem>>, vector<1x4x4xf32>
    %164 = vector.shape_cast %163 : vector<1x4x4xf32> to vector<4x4xf32>
    %cst_205 = arith.constant dense<0.000000e+00> : vector<128x4xf32>
    %165 = tpu.matmul %162, %164, %cst_205 {dimension_numbers = #tpu.dot_dimension_numbers<[1], [0], [0], [1], [0, 0, 1, 1], [], []>} : vector<128x4xf32>, vector<4x4xf32>, vector<128x4xf32> -> vector<128x4xf32>
    %c0_206 = arith.constant 0 : index
    %c0_207 = arith.constant 0 : index
    %166 = vector.load %arg15[%c0_206, %c0_207] : memref<128x4xf32, #tpu.memory_space<vmem>>, vector<128x4xf32>
    %167 = arith.addf %166, %165 : vector<128x4xf32>
    %c0_208 = arith.constant 0 : index
    %c0_209 = arith.constant 0 : index
    %168 = vector.load %arg15[%c0_208, %c0_209] : memref<128x4xf32, #tpu.memory_space<vmem>>, vector<128x4xf32>
    tpu.vector_store %arg15[%c0_208, %c0_209], %167 {strides = array<i32>} : memref<128x4xf32, #tpu.memory_space<vmem>>, vector<128x4xf32>,
    %c2_210 = arith.constant 2 : index
    %c17_211 = arith.constant 17 : index
    %c0_212 = arith.constant 0 : index
    %169 = vector.load %arg13[%c2_210, %c17_211, %c0_212] : memref<10x48x4xf32, #tpu.memory_space<vmem>>, vector<8x16x4xf32>
    %170 = vector.shape_cast %169 : vector<8x16x4xf32> to vector<128x4xf32>
    %c8_213 = arith.constant 8 : index
    %c0_214 = arith.constant 0 : index
    %c0_215 = arith.constant 0 : index
    %171 = vector.load %arg7[%c8_213, %c0_214, %c0_215] : memref<9x4x4xf32, #tpu.memory_space<vmem>>, vector<1x4x4xf32>
    %172 = vector.shape_cast %171 : vector<1x4x4xf32> to vector<4x4xf32>
    %cst_216 = arith.constant dense<0.000000e+00> : vector<128x4xf32>
    %173 = tpu.matmul %170, %172, %cst_216 {dimension_numbers = #tpu.dot_dimension_numbers<[1], [0], [0], [1], [0, 0, 1, 1], [], []>} : vector<128x4xf32>, vector<4x4xf32>, vector<128x4xf32> -> vector<128x4xf32>
    %c0_217 = arith.constant 0 : index
    %c0_218 = arith.constant 0 : index
    %174 = vector.load %arg15[%c0_217, %c0_218] : memref<128x4xf32, #tpu.memory_space<vmem>>, vector<128x4xf32>
    %175 = arith.addf %174, %173 : vector<128x4xf32>
    %c0_219 = arith.constant 0 : index
    %c0_220 = arith.constant 0 : index
    %176 = vector.load %arg15[%c0_219, %c0_220] : memref<128x4xf32, #tpu.memory_space<vmem>>, vector<128x4xf32>
    tpu.vector_store %arg15[%c0_219, %c0_220], %175 {strides = array<i32>} : memref<128x4xf32, #tpu.memory_space<vmem>>, vector<128x4xf32>,
    %c0_221 = arith.constant 0 : index
    %c0_222 = arith.constant 0 : index
    %177 = vector.load %arg15[%c0_221, %c0_222] : memref<128x4xf32, #tpu.memory_space<vmem>>, vector<128x4xf32>
    %c0_223 = arith.constant 0 : index
    %c0_224 = arith.constant 0 : index
    %178 = vector.load %arg8[%c0_223, %c0_224] : memref<1x4xf32, #tpu.memory_space<vmem>>, vector<1x4xf32>
    %179 = vector.broadcast %178 : vector<1x4xf32> to vector<128x4xf32>
    %180 = arith.addf %177, %179 : vector<128x4xf32>
    %cst_225 = arith.constant 0.000000e+00 : f32
    %181 = vector.broadcast %cst_225 : f32 to vector<128x4xf32>
    %182 = arith.maximumf %180, %181 : vector<128x4xf32>
    %c0_226 = arith.constant 0 : index
    %c0_227 = arith.constant 0 : index
    %183 = vector.load %arg9[%c0_226, %c0_227] : memref<4x16xf32, #tpu.memory_space<vmem>>, vector<4x16xf32>
    %cst_228 = arith.constant dense<0.000000e+00> : vector<128x16xf32>
    %184 = tpu.matmul %182, %183, %cst_228 {dimension_numbers = #tpu.dot_dimension_numbers<[1], [0], [0], [1], [0, 0, 1, 1], [], []>} : vector<128x4xf32>, vector<4x16xf32>, vector<128x16xf32> -> vector<128x16xf32>
    %c0_229 = arith.constant 0 : index
    %c0_230 = arith.constant 0 : index
    %185 = vector.load %arg10[%c0_229, %c0_230] : memref<1x16xf32, #tpu.memory_space<vmem>>, vector<1x16xf32>
    %186 = vector.broadcast %185 : vector<1x16xf32> to vector<128x16xf32>
    %187 = arith.addf %184, %186 : vector<128x16xf32>
    %c0_231 = arith.constant 0 : index
    %c0_232 = arith.constant 0 : index
    %c0_233 = arith.constant 0 : index
    %c0_234 = arith.constant 0 : index
    %188 = vector.load %arg2[%c0_231, %c0_232, %c0_233, %c0_234] : memref<1x8x16x16xf32, #tpu.memory_space<vmem>>, vector<1x8x16x16xf32>
    %189 = vector.shape_cast %188 : vector<1x8x16x16xf32> to vector<8x16x16xf32>
    %190 = vector.shape_cast %189 : vector<8x16x16xf32> to vector<128x16xf32>
    %191 = arith.addf %187, %190 : vector<128x16xf32>
    %cst_235 = arith.constant 0.000000e+00 : f32
    %192 = vector.broadcast %cst_235 : f32 to vector<128x16xf32>
    %193 = arith.maximumf %191, %192 : vector<128x16xf32>
    %194 = vector.shape_cast %193 : vector<128x16xf32> to vector<1x8x16x16xf32>
    %c0_236 = arith.constant 0 : index
    %c0_237 = arith.constant 0 : index
    %c0_238 = arith.constant 0 : index
    %c0_239 = arith.constant 0 : index
    %195 = vector.load %arg11[%c0_236, %c0_237, %c0_238, %c0_239] : memref<1x8x16x16xf32, #tpu.memory_space<vmem>>, vector<1x8x16x16xf32>
    tpu.vector_store %arg11[%c0_236, %c0_237, %c0_238, %c0_239], %194 {strides = array<i32>} : memref<1x8x16x16xf32, #tpu.memory_space<vmem>>, vector<1x8x16x16xf32>,
    return
  }
  func.func @transform_0(%arg0: i32, %arg1: i32) -> (i32, i32, i32, i32) {
    %c0_i32 = arith.constant 0 : i32
    %c0_i32_0 = arith.constant 0 : i32
    %c0_i32_1 = arith.constant 0 : i32
    return %arg0, %arg1, %c0_i32, %c0_i32_0 : i32, i32, i32, i32
  }
  func.func @transform_1(%arg0: i32, %arg1: i32) -> (i32, i32, i32, i32) {
    %c4_i32 = arith.constant 4 : i32
    %0 = arith.muli %arg1, %c4_i32 : i32
    %c1_i32 = arith.constant 1 : i32
    %1 = arith.subi %0, %c1_i32 : i32
    %c0_i32 = arith.constant 0 : i32
    %2 = arith.maxsi %1, %c0_i32 : i32
    %c0_i32_0 = arith.constant 0 : i32
    %c0_i32_1 = arith.constant 0 : i32
    %c0_i32_2 = arith.constant 0 : i32
    return %arg0, %2, %c0_i32_0, %c0_i32_1 : i32, i32, i32, i32
  }
  func.func @transform_2(%arg0: i32, %arg1: i32) -> (i32, i32, i32, i32) {
    %c1_i32 = arith.constant 1 : i32
    %0 = arith.addi %arg1, %c1_i32 : i32
    %c4_i32 = arith.constant 4 : i32
    %1 = arith.muli %0, %c4_i32 : i32
    %c7_i32 = arith.constant 7 : i32
    %2 = arith.minsi %1, %c7_i32 : i32
    %c0_i32 = arith.constant 0 : i32
    %c0_i32_0 = arith.constant 0 : i32
    %c0_i32_1 = arith.constant 0 : i32
    return %arg0, %2, %c0_i32, %c0_i32_0 : i32, i32, i32, i32
  }
  func.func @transform_3(%arg0: i32, %arg1: i32) -> (i32, i32, i32) {
    %c0_i32 = arith.constant 0 : i32
    %c0_i32_0 = arith.constant 0 : i32
    %c0_i32_1 = arith.constant 0 : i32
    %c0_i32_2 = arith.constant 0 : i32
    return %c0_i32, %c0_i32_0, %c0_i32_1 : i32, i32, i32
  }
  func.func @transform_4(%arg0: i32, %arg1: i32) -> (i32, i32) {
    %c0_i32 = arith.constant 0 : i32
    %c0_i32_0 = arith.constant 0 : i32
    %c0_i32_1 = arith.constant 0 : i32
    return %c0_i32, %c0_i32_0 : i32, i32
  }
  func.func @transform_5(%arg0: i32, %arg1: i32) -> (i32, i32, i32) {
    %c0_i32 = arith.constant 0 : i32
    %c0_i32_0 = arith.constant 0 : i32
    %c0_i32_1 = arith.constant 0 : i32
    %c0_i32_2 = arith.constant 0 : i32
    return %c0_i32, %c0_i32_0, %c0_i32_1 : i32, i32, i32
  }
  func.func @transform_6(%arg0: i32, %arg1: i32) -> (i32, i32) {
    %c0_i32 = arith.constant 0 : i32
    %c0_i32_0 = arith.constant 0 : i32
    %c0_i32_1 = arith.constant 0 : i32
    return %c0_i32, %c0_i32_0 : i32, i32
  }
  func.func @transform_7(%arg0: i32, %arg1: i32) -> (i32, i32) {
    %c0_i32 = arith.constant 0 : i32
    %c0_i32_0 = arith.constant 0 : i32
    %c0_i32_1 = arith.constant 0 : i32
    return %c0_i32, %c0_i32_0 : i32, i32
  }
  func.func @transform_8(%arg0: i32, %arg1: i32) -> (i32, i32) {
    %c0_i32 = arith.constant 0 : i32
    %c0_i32_0 = arith.constant 0 : i32
    %c0_i32_1 = arith.constant 0 : i32
    return %c0_i32, %c0_i32_0 : i32, i32
  }
  func.func @transform_9(%arg0: i32, %arg1: i32) -> (i32, i32, i32, i32) {
    %c0_i32 = arith.constant 0 : i32
    %c0_i32_0 = arith.constant 0 : i32
    %c0_i32_1 = arith.constant 0 : i32
    return %arg0, %arg1, %c0_i32, %c0_i32_0 : i32, i32, i32, i32
  }
}

</mosaic_0001>

<bundles_post_ra>
// kernel: bottleneck2_pallas.1
= control target key start
LH: loop header
LB: loop body
LE: loop exit
PB: predicated region body
PF: predicated region fallthrough
CT: control target
= control target key end

     0   :  { %s7811_s30 = smov 0   ;;  %s7813_s10 = smov 0   ;;  %s9798_s0 = inlined_call_operand.vmem [shape: f32[2,16,16,16], index: 0, kind: input, shape index: {}, may-alias: {0,1,2}]   ;;  %s9799_s1 = inlined_call_operand.vmem [shape: f32[2,16,16,16], index: 1, kind: input, shape index: {}, may-alias: {0,1,2}]   ;;  %s9800_s2 = inlined_call_operand.vmem [shape: f32[2,16,16,16], index: 2, kind: input, shape index: {}, may-alias: {0,1,2}]   ;;  %s9801_s3 = inlined_call_operand.vmem [shape: f32[9,16,4], index: 3, kind: input, shape index: {}]   ;;  %s9802_s4 = inlined_call_operand.vmem [shape: f32[1,4], index: 4, kind: input, shape index: {}]   ;;  %s9803_s5 = inlined_call_operand.vmem [shape: f32[9,4,4], index: 5, kind: input, shape index: {}]   ;;  %s9804_s6 = inlined_call_operand.vmem [shape: f32[1,4], index: 6, kind: input, shape index: {}]   ;;  %s9805_s7 = inlined_call_operand.vmem [shape: f32[4,16], index: 7, kind: input, shape index: {}]   ;;  %s9806_s8 = inlined_call_operand.vmem [shape: f32[1,16], index: 8, kind: input, shape index: {}]   ;;  %s9807_s9 = inlined_call_operand.vmem [shape: f32[2,16,16,16], index: 9, kind: output, shape index: {}]  }
   0x1   :  { %9808 = sst [smem:[#allocation6_spill]] %s9798_s0  ;;  %s7815_s11 = smov 0  }
   0x2   :  { %9809 = sst [smem:[#allocation7_spill]] %s9807_s9  ;;  %s7817_s12 = smov 0  }
   0x3   :  { %s7819_s13 = smov 0  }
   0x4 LB: > { %s28_s14 = sadd.s32 1, %s7746_s11  ;;  %s31_s15 = sadd.s32 1, %s7750_s12  ;;  %s7754_s13 = sphi %s7819_s13, %s19_s13   ;;  %s7750_s12 = sphi %s7817_s12, %s9816_s12   ;;  %s7746_s11 = sphi %s7815_s11, %s9815_s11   ;;  %s7742_s10 = sphi %s7813_s10, %s9814_s10   ;;  %s7738_s30 = sphi %s7811_s30, %s9813_s30  }
   0x5   : > { %p29_p0 = scmp.ge.s32.totalorder %s28_s14, 2  ;;  %p6288_p1 = scmp.ge.s32.totalorder %s7754_s13, 1 }
   0x6   : > { %p377_p2 = scmp.lt.s32.totalorder %s7754_s13, 5 }
   0x7   : > { %s9818_s14 = smov (%p29_p0, %s28_s14), 0  ;;  %s9820_s15 = smov (!%p29_p0, %s31_s15), %s7750_s12 }
   0x8   : > { %p378_p3 = pnand %p6288_p1, %p377_p2  ;;  %p33_p4 = scmp.ge.s32.totalorder %s9820_s15, 2 }
   0x9   : > { %s6289_s16 = sshll.u32 (!%p378_p3), %s7738_s30, 3  ;;  %p452_p5 = scmp.lt.s32.totalorder (!%p378_p3), %s7742_s10, 1  ;;  %vm528_vm0 = vcmask (!%p378_p3), 130048  }
   0xa   : > { %s9822_s15 = smov (%p33_p4, %s9820_s15), 0  ;;  %381 = sbr.rel (%p378_p3) target bundleno = 1133 (0x46d), region = 56 }
   0xb   : > { %p454_p6 = scmp.lt.s32.totalorder (!%p378_p3), %s6289_s16, 15  ;;  %s6293_s17 = sshll.u32 (!%p378_p3), %s7738_s30, 2 }
   0xc   : > { %s6294_s19 = sadd.s32 (!%p378_p3), 4294967295, %s6293_s17  ;;  %s6698_s22 = sadd.s32 (!%p378_p3), 4, %s6293_s17 }
   0xd   : > { %p464_p7 = scmp.gt.s32.totalorder (!%p378_p3), %s6294_s19, 0  ;;  %p483_p8 = scmp.lt.s32.totalorder (!%p378_p3), %s6698_s22, 7 }
   0xe   : > { %s9810_s0 = sld [smem:[#allocation6_spill]] (!%p378_p3)  ;;  %s9811_s9 = sld [smem:[#allocation7_spill]] (!%p378_p3) }
   0xf   : > { %p6308_p11 = scmp.le.s32.totalorder (!%p378_p3), %s7738_s30, 0 }
  0x11   : > { %s9824_s10 = smov (!%p452_p5, %s7742_s10), 1  ;;  %s9826_s16 = smov (!%p454_p6, %s6289_s16), 15 }
  0x12   : > { %s7845_s18 = sshll.u32 %s9824_s10, 5  ;;  %s6290_s20 = sshll.u32 %s9826_s16, 1 }
  0x13   : > { %s458_s21 = sadd.s32 %s7845_s18, %s6290_s20  ;;  %s9828_s19 = smov (!%p464_p7, %s6294_s19), 0 }
  0x14   : > { %s6292_s23 = sshll.u32 %s458_s21, 3  ;;  %s9830_s22 = smov (!%p483_p8, %s6698_s22), 7 }
  0x15   : > { %s7851_s26 = scalar_lea.vmem %s9810_s0, %s6292_s23  ;;  %s7856_s29 = scalar_lea.vmem %s9811_s9, %s6292_s23 }
  0x16   : > { %v511_v0 = vld [vmem:[%s7851_s26] sm:$0xff]  ;;  %v512_v1 = vld [vmem:[%s7851_s26 + $0x8] sm:$0xff]  ;;  %v513_v2 = vld [vmem:[%s7851_s26 + $0x10] sm:$0xff]  ;;  %s6295_s10 = sshll.u32 %s9828_s19, 1  ;;  %s6300_s17 = sshll.u32 %s9830_s22, 1 }
  0x17   : > { %529 = vst.msk [vmem:[#allocation2 + $0x70] sm:$0xff] %vm528_vm0, %v511_v0  ;;  %530 = vst.msk [vmem:[#allocation2 + $0x78] sm:$0xff] %vm528_vm0, %v512_v1  ;;  %v514_v3 = vld [vmem:[%s7851_s26 + $0x18] sm:$0xff]  ;;  %v515_v4 = vld [vmem:[%s7851_s26 + $0x20] sm:$0xff]  ;;  %p7878_p9 = scmp.lt.s32.totalorder %s6295_s10, 15  ;;  %p488_p10 = scmp.lt.s32.totalorder %s6300_s17, 15 }
  0x18   : > { %531 = vst.msk [vmem:[#allocation2 + $0xa0] sm:$0xff] %vm528_vm0, %v513_v2  ;;  %v516_v5 = vld [vmem:[%s7851_s26 + $0x28] sm:$0xff]  ;;  %532 = vst.msk [vmem:[#allocation2 + $0xa8] sm:$0xff] %vm528_vm0, %v514_v3  ;;  %v517_v6 = vld [vmem:[%s7851_s26 + $0x30] sm:$0xff]  ;;  %548 = sbr.rel (%p6308_p11) target bundleno = 33 (0x21), region = 60 }
  0x19   : > { %533 = vst.msk [vmem:[#allocation2 + $0xd0] sm:$0xff] %vm528_vm0, %v515_v4  ;;  %534 = vst.msk [vmem:[#allocation2 + $0xd8] sm:$0xff] %vm528_vm0, %v516_v5  ;;  %v518_v7 = vld [vmem:[%s7851_s26 + $0x38] sm:$0xff]  ;;  %v519_v8 = vld [vmem:[%s7851_s26 + $0x40] sm:$0xff]  ;;  %s9832_s10 = smov (!%p7878_p9, %s6295_s10), 15  ;;  %s9834_s17 = smov (!%p488_p10, %s6300_s17), 15 }
  0x1a   : > { %535 = vst.msk [vmem:[#allocation2 + $0x100] sm:$0xff] %vm528_vm0, %v517_v6  ;;  %536 = vst.msk [vmem:[#allocation2 + $0x108] sm:$0xff] %vm528_vm0, %v518_v7  ;;  %v520_v9 = vld [vmem:[%s7851_s26 + $0x48] sm:$0xff]  ;;  %v521_v10 = vld [vmem:[%s7851_s26 + $0x50] sm:$0xff]  ;;  %s6296_s19 = sshll.u32 %s9832_s10, 1  ;;  %s6301_s21 = sshll.u32 %s9834_s17, 1 }
  0x1b   : > { %537 = vst.msk [vmem:[#allocation2 + $0x130] sm:$0xff] %vm528_vm0, %v519_v8  ;;  %v522_v11 = vld [vmem:[%s7851_s26 + $0x58] sm:$0xff]  ;;  %538 = vst.msk [vmem:[#allocation2 + $0x138] sm:$0xff] %vm528_vm0, %v520_v9  ;;  %v523_v12 = vld [vmem:[%s7851_s26 + $0x60] sm:$0xff]  ;;  %s473_s20 = sadd.s32 %s6296_s19, %s7845_s18  ;;  %s492_s23 = sadd.s32 %s6301_s21, %s7845_s18 }
  0x1c   : > { %539 = vst.msk [vmem:[#allocation2 + $0x160] sm:$0xff] %vm528_vm0, %v521_v10  ;;  %540 = vst.msk [vmem:[#allocation2 + $0x168] sm:$0xff] %vm528_vm0, %v522_v11  ;;  %v524_v13 = vld [vmem:[%s7851_s26 + $0x68] sm:$0xff]  ;;  %v525_v14 = vld [vmem:[%s7851_s26 + $0x70] sm:$0xff]  ;;  %s6298_s22 = sshll.u32 %s473_s20, 3  ;;  %s6303_s28 = sshll.u32 %s492_s23, 3 }
  0x1d   : > { %541 = vst.msk [vmem:[#allocation2 + $0x190] sm:$0xff] %vm528_vm0, %v523_v12  ;;  %542 = vst.msk [vmem:[#allocation2 + $0x198] sm:$0xff] %vm528_vm0, %v524_v13  ;;  %v526_v15 = vld [vmem:[%s7851_s26 + $0x78] sm:$0xff]  ;;  %s475_s27 = scalar_lea.vmem %s9799_s1, %s6298_s22  ;;  %s7910_s9 = scalar_lea.vmem %s9800_s2, %s6303_s28 }
  0x1e   : > { %543 = vst.msk [vmem:[#allocation2 + $0x1c0] sm:$0xff] %vm528_vm0, %v525_v14  ;;  %544 = vst.msk [vmem:[#allocation2 + $0x1c8] sm:$0xff] %vm528_vm0, %v526_v15  ;;  %v549_v16 = vld [vmem:[%s475_s27] sm:$0xff] (!%p6308_p11)  ;;  %v550_v17 = vld [vmem:[%s475_s27 + $0x8] sm:$0xff] (!%p6308_p11) }
  0x1f   : > { %v551_v18 = vld [vmem:[%s475_s27 + $0x10] sm:$0xff]  ;;  %553 = vst.msk [vmem:[#allocation2 + $0x10] sm:$0xff] %vm528_vm0, %v549_v16  ;;  %554 = vst.msk [vmem:[#allocation2 + $0x18] sm:$0xff] %vm528_vm0, %v550_v17  ;;  %v552_v19 = vld [vmem:[%s475_s27 + $0x18] sm:$0xff] }
  0x20   : > { %555 = vst.msk [vmem:[#allocation2 + $0x40] sm:$0xff] %vm528_vm0, %v551_v18  ;;  %556 = vst.msk [vmem:[#allocation2 + $0x48] sm:$0xff] %vm528_vm0, %v552_v19 }
  0x21 PF: > { %p6309_p12 = scmp.ne.s32.totalorder %s7738_s30, 0 }
  0x22   : > { %v7756_v20 = vmov (!%p6309_p12), 0.0  }
  0x23   : > { %560 = sbr.rel (%p6309_p12) target bundleno = 42 (0x2a), region = 64  ;;  %562 = vst.msk [vmem:[#allocation2 + $0x8] sm:$0xff] (!%p6309_p12), %vm528_vm0, %v7756_v20  ;;  %563 = vst.msk [vmem:[#allocation2 + $0x10] sm:$0xff] (!%p6309_p12), %vm528_vm0, %v7756_v20 }
  0x24   : > { %564 = vst.msk [vmem:[#allocation2 + $0x18] sm:$0xff] (!%p6309_p12), %vm528_vm0, %v7756_v20  ;;  %565 = vst.msk [vmem:[#allocation2 + $0x20] sm:$0xff] (!%p6309_p12), %vm528_vm0, %v7756_v20 }
  0x25   : > { %568 = vst.msk [vmem:[#allocation2 + $0x38] sm:$0xff] (!%p6309_p12), %vm528_vm0, %v7756_v20  ;;  %569 = vst.msk [vmem:[#allocation2 + $0x40] sm:$0xff] (!%p6309_p12), %vm528_vm0, %v7756_v20 }
  0x26   : > { %570 = vst.msk [vmem:[#allocation2 + $0x48] sm:$0xff] (!%p6309_p12), %vm528_vm0, %v7756_v20  ;;  %571 = vst.msk [vmem:[#allocation2 + $0x50] sm:$0xff] (!%p6309_p12), %vm528_vm0, %v7756_v20 }
  0x2a PF: > { %p6310_p13 = scmp.ge.s32.totalorder %s7738_s30, 1 }
  0x2b   : > { %v577_v21 = vld [vmem:[%s7910_s9] sm:$0xff] (!%p6310_p13)  ;;  %v578_v22 = vld [vmem:[%s7910_s9 + $0x8] sm:$0xff] (!%p6310_p13)  ;;  %v579_v23 = vld [vmem:[%s7910_s9 + $0x10] sm:$0xff] (!%p6310_p13) }
  0x2c   : > { %576 = sbr.rel (%p6310_p13) target bundleno = 51 (0x33), region = 68  ;;  %582 = vst.msk [vmem:[#allocation2 + $0x1f0] sm:$0xff] (!%p6310_p13), %vm528_vm0, %v577_v21  ;;  %583 = vst.msk [vmem:[#allocation2 + $0x1f8] sm:$0xff] (!%p6310_p13), %vm528_vm0, %v578_v22  ;;  %v580_v24 = vld [vmem:[%s7910_s9 + $0x18] sm:$0xff] (!%p6310_p13) }
  0x2d   : > { %584 = vst.msk [vmem:[#allocation2 + $0x220] sm:$0xff] (!%p6310_p13), %vm528_vm0, %v579_v23  ;;  %585 = vst.msk [vmem:[#allocation2 + $0x228] sm:$0xff] (!%p6310_p13), %vm528_vm0, %v580_v24 }
  0x33 PF: > { %p6311_p0 = scmp.ne.s32.totalorder %s7738_s30, 1 }
  0x34   : > { %v7757_v25 = vmov (!%p6311_p0), 0.0  }
  0x35   : > { %589 = sbr.rel (%p6311_p0) target bundleno = 60 (0x3c), region = 72  ;;  %592 = vst.msk [vmem:[#allocation2 + $0x1e8] sm:$0xff] (!%p6311_p0), %vm528_vm0, %v7757_v25  ;;  %593 = vst.msk [vmem:[#allocation2 + $0x1f0] sm:$0xff] (!%p6311_p0), %vm528_vm0, %v7757_v25 }
  0x36   : > { %594 = vst.msk [vmem:[#allocation2 + $0x1f8] sm:$0xff] (!%p6311_p0), %vm528_vm0, %v7757_v25  ;;  %595 = vst.msk [vmem:[#allocation2 + $0x200] sm:$0xff] (!%p6311_p0), %vm528_vm0, %v7757_v25 }
  0x37   : > { %598 = vst.msk [vmem:[#allocation2 + $0x218] sm:$0xff] (!%p6311_p0), %vm528_vm0, %v7757_v25  ;;  %599 = vst.msk [vmem:[#allocation2 + $0x220] sm:$0xff] (!%p6311_p0), %vm528_vm0, %v7757_v25 }
  0x38   : > { %600 = vst.msk [vmem:[#allocation2 + $0x228] sm:$0xff] (!%p6311_p0), %vm528_vm0, %v7757_v25  ;;  %601 = vst.msk [vmem:[#allocation2 + $0x230] sm:$0xff] (!%p6311_p0), %vm528_vm0, %v7757_v25 }
  0x3c PF: > { %v647_v26 = vld [vmem:[%s9801_s3] sm:$0xff]  ;;  %v648_v27 = vld [vmem:[%s9801_s3 + $0x8] sm:$0xff]  ;;  %vm874_vm1 = vcmask 31744   ;;  %v6332_v28 = vld [vmem:[%s9801_s3 + $0x10] sm:$0xff]  ;;  %v7758_v30 = vmov 0.0  }
  0x3d   : > { %v7633_v29 = vpack.c.bf16 %v648_v27, %v647_v26  ;;  %603 = vst.msk [vmem:[#allocation2 + $0x8] sm:$0xff] %vm528_vm0, %v7758_v30  ;;  %604 = vst.msk [vmem:[#allocation2 + $0x38] sm:$0xff] %vm528_vm0, %v7758_v30  ;;  %v6333_v31 = vld [vmem:[%s9801_s3 + $0x18] sm:$0xff]  ;;  %v8004_v33 = vld [vmem:[#allocation2 + $0xa0] sm:$0xff] }
  0x3e   : > { %3447 = vst.msk [vmem:[#allocation3 + $0x8] sm:$0xff] %vm874_vm1, %v7758_v30  ;;  %3448 = vst.msk [vmem:[#allocation3 + $0x38] sm:$0xff] %vm874_vm1, %v7758_v30  ;;  %v7637_v32 = vpack.c.bf16 %v6333_v31, %v6332_v28  ;;  %v8006_v34 = vld [vmem:[#allocation2 + $0xa8] sm:$0xff]  ;;  %7114 = vmatprep.mubr.msk.f32.mxu1 %vm528_vm0, %v8004_v33  ;;  %v8010_v35 = vld [vmem:[#allocation2 + $0xd0] sm:$0xff] }
  0x3f   : > { %3449 = vst.msk [vmem:[#allocation3 + $0x68] sm:$0xff] %vm874_vm1, %v7758_v30  ;;  %3450 = vst.msk [vmem:[#allocation3 + $0x98] sm:$0xff] %vm874_vm1, %v7758_v30  ;;  %7634 = vmatprep.subr.bf16.mxu0 %v7633_v29  ;;  %v628_v36 = vld [vmem:[#allocation2 + $0x17] sm:$0xff]  ;;  %v8022_v40 = vld [vmem:[#allocation2 + $0x100] sm:$0xff] }
  0x40   : > { %3451 = vst.msk [vmem:[#allocation3 + $0xc8] sm:$0xff] %vm874_vm1, %v7758_v30  ;;  %3452 = vst.msk [vmem:[#allocation3 + $0xf8] sm:$0xff] %vm874_vm1, %v7758_v30  ;;  %7636 = vmatpush3.bf16.msra.mxu0 %v7633_v29  ;;  %7669 = vmatprep.subr.bf16.mxu1 %v7637_v32  ;;  %v8019_v39 = vld [vmem:[#allocation2 + $0xd8] sm:$0xff]  ;;  %v8026_v41 = vld [vmem:[#allocation2 + $0x47] sm:$0xff] }
  0x41   : > { %3453 = vst.msk [vmem:[#allocation3 + $0x128] sm:$0xff] %vm874_vm1, %v7758_v30  ;;  %3454 = vst.msk [vmem:[#allocation3 + $0x158] sm:$0xff] %vm874_vm1, %v7758_v30  ;;  %7638 = vmatprep.subr.bf16.mxu0 %v7637_v32  ;;  %7670 = vmatpush3.bf16.msra.mxu1 %v7637_v32  ;;  %v6354_v43 = vld [vmem:[%s9801_s3 + $0x20] sm:$0xff]  ;;  %v6355_v44 = vld [vmem:[%s9801_s3 + $0x28] sm:$0xff] }
  0x42   : > { %3455 = vst.msk [vmem:[#allocation3 + $0x188] sm:$0xff] %vm874_vm1, %v7758_v30  ;;  %3456 = vst.msk [vmem:[#allocation3 + $0x1b8] sm:$0xff] %vm874_vm1, %v7758_v30  ;;  %v8040_v45 = vld [vmem:[#allocation2 + $0x108] sm:$0xff]  ;;  %v8042_v46 = vpack.c.bf16 %v6355_v44, %v6354_v43  ;;  %v8046_v47 = vld [vmem:[#allocation2 + $0x130] sm:$0xff] }
  0x43   : > { %3457 = vst.msk [vmem:[#allocation3 + $0x20] sm:$0xff] %vm874_vm1, %v7758_v30  ;;  %3458 = vst.msk [vmem:[#allocation3 + $0x50] sm:$0xff] %vm874_vm1, %v7758_v30  ;;  %v8050_v48 = vld [vmem:[#allocation2 + $0x77] sm:$0xff]  ;;  %v8069_v53 = vld [vmem:[#allocation2 + $0x160] sm:$0xff] }
  0x44   : > { %3459 = vst.msk [vmem:[#allocation3 + $0x80] sm:$0xff] %vm874_vm1, %v7758_v30  ;;  %3460 = vst.msk [vmem:[#allocation3 + $0xb0] sm:$0xff] %vm874_vm1, %v7758_v30  ;;  %v627_v37 = vld [vmem:[#allocation2 + $0xf] sm:$0xff]  ;;  %v8012_v38 = vld [vmem:[#allocation2 + $0x3f] sm:$0xff]  ;;  %7115 = vmatmul.mubr.msk.f32.vlgmr.msra.gmra.mrb[0].mxu1 %vm528_vm0, %v8006_v34 }
  0x45   : > { %3461 = vst.msk [vmem:[#allocation3 + $0xe0] sm:$0xff] %vm874_vm1, %v7758_v30  ;;  %3462 = vst.msk [vmem:[#allocation3 + $0x110] sm:$0xff] %vm874_vm1, %v7758_v30  ;;  %7071 = vmatprep.mubr.msk.f32.mxu0 %vm528_vm0, %v627_v37  ;;  %7117 = vmatprep.mubr.msk.f32.mxu1 %vm528_vm0, %v8010_v35  ;;  %v6376_v50 = vld [vmem:[%s9801_s3 + $0x30] sm:$0xff]  ;;  %v8062_v51 = vld [vmem:[#allocation2 + $0x138] sm:$0xff] }
  0x46   : > { %3463 = vst.msk [vmem:[#allocation3 + $0x140] sm:$0xff] %vm874_vm1, %v7758_v30  ;;  %3464 = vst.msk [vmem:[#allocation3 + $0x170] sm:$0xff] %vm874_vm1, %v7758_v30  ;;  %7072 = vmatmul.mubr.msk.f32.vlgmr.msra.gmra.mrb[0].mxu0 %vm528_vm0, %v628_v36  ;;  %v6377_v52 = vld [vmem:[%s9801_s3 + $0x38] sm:$0xff]  ;;  %v8073_v55 = vld [vmem:[#allocation2 + $0xa7] sm:$0xff] }
  0x47   : > { %3465 = vst.msk [vmem:[#allocation3 + $0x1a0] sm:$0xff] %vm874_vm1, %v7758_v30  ;;  %3466 = vst.msk [vmem:[#allocation3 + $0x1d0] sm:$0xff] %vm874_vm1, %v7758_v30  ;;  %7640 = vmatpush3.bf16.msra.mxu0 %v7637_v32  ;;  %7074 = vmatprep.mubr.msk.f32.mxu0 %vm528_vm0, %v8012_v38  ;;  %v7645_v54 = vpack.c.bf16 %v6377_v52, %v6376_v50  ;;  %v8081_v57 = vld [vmem:[#allocation2 + $0x168] sm:$0xff]  ;;  %v8085_v58 = vld [vmem:[#allocation2 + $0x190] sm:$0xff] }
  0x48   : > { %605 = vst.msk [vmem:[#allocation2 + $0x68] sm:$0xff] %vm528_vm0, %v7758_v30  ;;  %606 = vst.msk [vmem:[#allocation2 + $0x98] sm:$0xff] %vm528_vm0, %v7758_v30  ;;  %7118 = vmatmul.mubr.msk.f32.gmra.mrb[2].mxu1 %vm528_vm0, %v8019_v39  ;;  %7642 = vmatprep.subr.bf16.mxu0 %v8042_v46  ;;  %v6420_v59 = vld [vmem:[%s9801_s3 + $0x50] sm:$0xff]  ;;  %v6421_v60 = vld [vmem:[%s9801_s3 + $0x58] sm:$0xff] }
  0x49   : > { %607 = vst.msk [vmem:[#allocation2 + $0xc8] sm:$0xff] %vm528_vm0, %v7758_v30  ;;  %608 = vst.msk [vmem:[#allocation2 + $0xf8] sm:$0xff] %vm528_vm0, %v7758_v30  ;;  %7120 = vmatprep.mubr.msk.f32.mxu1 %vm528_vm0, %v8022_v40  ;;  %7646 = vmatprep.subr.bf16.mxu1 %v7645_v54  ;;  %v8095_v61 = vld [vmem:[#allocation2 + $0xd7] sm:$0xff]  ;;  %v7653_v62 = vpack.c.bf16 %v6421_v60, %v6420_v59  ;;  %v8107_v1 = vld [vmem:[#allocation2 + $0x1c0] sm:$0xff] }
  0x4a   : > { %609 = vst.msk [vmem:[#allocation2 + $0x128] sm:$0xff] %vm528_vm0, %v7758_v30  ;;  %610 = vst.msk [vmem:[#allocation2 + $0x158] sm:$0xff] %vm528_vm0, %v7758_v30  ;;  %7075 = vmatmul.mubr.msk.f32.gmra.mrb[2].mxu0 %vm528_vm0, %v8026_v41  ;;  %7648 = vmatpush3.bf16.msra.mxu1 %v7645_v54  ;;  %v8103_v0 = vld [vmem:[#allocation2 + $0x198] sm:$0xff]  ;;  %v8111_v2 = vld [vmem:[#allocation2 + $0x107] sm:$0xff] }
  0x4b   : > { %611 = vst.msk [vmem:[#allocation2 + $0x188] sm:$0xff] %vm528_vm0, %v7758_v30  ;;  %612 = vst.msk [vmem:[#allocation2 + $0x1b8] sm:$0xff] %vm528_vm0, %v7758_v30  ;;  %7654 = vmatprep.subr.bf16.mxu1 %v7653_v62  ;;  %v8119_v4 = vld [vmem:[#allocation2 + $0x1c8] sm:$0xff]  ;;  %v8125_v5 = vld [vmem:[#allocation2 + $0x137] sm:$0xff] }
  0x4c   : > { %613 = vst.msk [vmem:[#allocation2 + $0x1e8] sm:$0xff] %vm528_vm0, %v7758_v30  ;;  %614 = vst.msk [vmem:[#allocation2 + $0x218] sm:$0xff] %vm528_vm0, %v7758_v30  ;;  %7121 = vmatmul.mubr.msk.f32.gmra.mrb[4].mxu1 %vm528_vm0, %v8040_v45  ;;  %v6464_v6 = vld [vmem:[%s9801_s3 + $0x70] sm:$0xff]  ;;  %v6465_v7 = vld [vmem:[%s9801_s3 + $0x78] sm:$0xff] }
  0x4d   : > { %615 = vst.msk [vmem:[#allocation2 + $0x20] sm:$0xff] %vm528_vm0, %v7758_v30  ;;  %616 = vst.msk [vmem:[#allocation2 + $0x50] sm:$0xff] %vm528_vm0, %v7758_v30  ;;  %7123 = vmatprep.mubr.msk.f32.mxu1 %vm528_vm0, %v8046_v47  ;;  %v8141_v9 = vpack.c.bf16 %v6465_v7, %v6464_v6  ;;  %v8145_v10 = vld [vmem:[#allocation2 + $0x167] sm:$0xff]  ;;  %v8158_v12 = vld [vmem:[#allocation2 + $0x197] sm:$0xff] }
  0x4e   : > { %617 = vst.msk [vmem:[#allocation2 + $0x80] sm:$0xff] %vm528_vm0, %v7758_v30  ;;  %618 = vst.msk [vmem:[#allocation2 + $0xb0] sm:$0xff] %vm528_vm0, %v7758_v30  ;;  %v8170_v14 = vld [vmem:[#allocation2 + $0x1c7] sm:$0xff]  ;;  %v895_v15 = vld [vmem:[#allocation2 + $0x10] sm:$0xff] }
  0x4f   : > { %619 = vst.msk [vmem:[#allocation2 + $0xe0] sm:$0xff] %vm528_vm0, %v7758_v30  ;;  %620 = vst.msk [vmem:[#allocation2 + $0x110] sm:$0xff] %vm528_vm0, %v7758_v30  ;;  %v8028_v42 = vld [vmem:[#allocation2 + $0x6f] sm:$0xff]  ;;  %v8053_v49 = vld [vmem:[#allocation2 + $0x9f] sm:$0xff] }
  0x50   : > { %621 = vst.msk [vmem:[#allocation2 + $0x140] sm:$0xff] %vm528_vm0, %v7758_v30  ;;  %622 = vst.msk [vmem:[#allocation2 + $0x170] sm:$0xff] %vm528_vm0, %v7758_v30  ;;  %7077 = vmatprep.mubr.msk.f32.mxu0 %vm528_vm0, %v8028_v42  ;;  %v8075_v56 = vld [vmem:[#allocation2 + $0xcf] sm:$0xff]  ;;  %7124 = vmatmul.mubr.msk.f32.gmra.mrb[6].mxu1 %vm528_vm0, %v8062_v51  ;;  %v8097_v63 = vld [vmem:[#allocation2 + $0xff] sm:$0xff] }
  0x51   : > { %623 = vst.msk [vmem:[#allocation2 + $0x1a0] sm:$0xff] %vm528_vm0, %v7758_v30  ;;  %624 = vst.msk [vmem:[#allocation2 + $0x1d0] sm:$0xff] %vm528_vm0, %v7758_v30  ;;  %7078 = vmatmul.mubr.msk.f32.gmra.mrb[4].mxu0 %vm528_vm0, %v8050_v48  ;;  %7126 = vmatprep.mubr.msk.f32.mxu1 %vm528_vm0, %v8069_v53  ;;  %v8113_v3 = vld [vmem:[#allocation2 + $0x12f] sm:$0xff]  ;;  %v8133_v8 = vld [vmem:[#allocation2 + $0x15f] sm:$0xff] }
  0x52   : > { %625 = vst.msk [vmem:[#allocation2 + $0x200] sm:$0xff] %vm528_vm0, %v7758_v30  ;;  %626 = vst.msk [vmem:[#allocation2 + $0x230] sm:$0xff] %vm528_vm0, %v7758_v30  ;;  %7080 = vmatprep.mubr.msk.f32.mxu0 %vm528_vm0, %v8053_v49  ;;  %v8147_v11 = vld [vmem:[#allocation2 + $0x18f] sm:$0xff]  ;;  %v8160_v13 = vld [vmem:[#allocation2 + $0x1bf] sm:$0xff] }
  0x53   : > { %v6398_v16 = vld [vmem:[%s9801_s3 + $0x40] sm:$0xff]  ;;  %v6399_v17 = vld [vmem:[%s9801_s3 + $0x48] sm:$0xff]  ;;  %v896_v18 = vld [vmem:[#allocation2 + $0x18] sm:$0xff] }
  0x54   : > { %7127 = vmatmul.mubr.msk.f32.gmra.mrb[8].mxu1 %vm528_vm0, %v8081_v57  ;;  %v8185_v19 = vld [vmem:[#allocation2 + $0x40] sm:$0xff]  ;;  %v7649_v20 = vpack.c.bf16 %v6399_v17, %v6398_v16  ;;  %v8195_v21 = vld [vmem:[#allocation2 + $0x48] sm:$0xff]  ;;  %v8197_v22 = vld [vmem:[#allocation2 + $0x70] sm:$0xff] }
  0x55   : > { %7081 = vmatmul.mubr.msk.f32.gmra.mrb[6].mxu0 %vm528_vm0, %v8073_v55  ;;  %7129 = vmatprep.mubr.msk.f32.mxu1 %vm528_vm0, %v8085_v58  ;;  %v8207_v23 = vld [vmem:[#allocation2 + $0x78] sm:$0xff]  ;;  %v6442_v25 = vld [vmem:[%s9801_s3 + $0x60] sm:$0xff]  ;;  %v6443_v26 = vld [vmem:[%s9801_s3 + $0x68] sm:$0xff] }
  0x56   : > { %7083 = vmatprep.mubr.msk.f32.mxu0 %vm528_vm0, %v8075_v56  ;;  %v1203_v24 = vld [vmem:[#allocation2 + $0x11] sm:$0xff]  ;;  %v1204_v27 = vld [vmem:[#allocation2 + $0x19] sm:$0xff]  ;;  %v1205_v28 = vld [vmem:[#allocation2 + $0x41] sm:$0xff]  ;;  %v8224_v29 = vpack.c.bf16 %v6443_v26, %v6442_v25 }
  0x57   : > { %v1206_v30 = vld [vmem:[#allocation2 + $0x49] sm:$0xff]  ;;  %v8230_v31 = vld [vmem:[#allocation2 + $0x71] sm:$0xff]  ;;  %v8242_v36 = vld [vmem:[#allocation2 + $0x79] sm:$0xff] }
  0x58   : > { %7130 = vmatmul.mubr.msk.f32.gmra.mrb[10].mxu1 %vm528_vm0, %v8103_v0  ;;  %v8238_v32 = vld [vmem:[#allocation2 + $0x1ef] sm:$0xff]  ;;  %v8244_v37 = vld [vmem:[#allocation2 + $0xa1] sm:$0xff]  ;;  %v8267_v44 = vld [vmem:[#allocation2 + $0xd9] sm:$0xff] }
  0x59   : > { %7084 = vmatmul.mubr.msk.f32.gmra.mrb[8].mxu0 %vm528_vm0, %v8095_v61  ;;  %7132 = vmatprep.mubr.msk.f32.mxu1 %vm528_vm0, %v8107_v1  ;;  %v8258_v43 = vld [vmem:[#allocation2 + $0xd1] sm:$0xff]  ;;  %v8279_v50 = vld [vmem:[#allocation2 + $0x109] sm:$0xff]  ;;  %v8291_v54 = vld [vmem:[#allocation2 + $0x139] sm:$0xff] }
  0x5a   : > { %7086 = vmatprep.mubr.msk.f32.mxu0 %vm528_vm0, %v8097_v63  ;;  %v8281_v52 = vld [vmem:[#allocation2 + $0x131] sm:$0xff]  ;;  %v8293_v59 = vld [vmem:[#allocation2 + $0x161] sm:$0xff]  ;;  %v8303_v60 = vld [vmem:[#allocation2 + $0x169] sm:$0xff] }
  0x5b   : > { %v8315_v6 = vld [vmem:[#allocation2 + $0x199] sm:$0xff]  ;;  %v8317_v7 = vld [vmem:[#allocation2 + $0x1c1] sm:$0xff] }
  0x5c   : > { %7133 = vmatmul.mubr.msk.f32.gmra.mrb[12].mxu1 %vm528_vm0, %v8119_v4  ;;  %v6487_v16 = vld [vmem:[%s9801_s3 + $0x88] sm:$0xff] }
  0x5d   : > { %7087 = vmatmul.mubr.msk.f32.gmra.mrb[10].mxu0 %vm528_vm0, %v8111_v2  ;;  %7173 = vmatprep.mubr.msk.f32.mxu1 %vm528_vm0, %v8012_v38  ;;  %v8250_v38 = vld [vmem:[#allocation2 + $0x1f7] sm:$0xff] }
  0x5e   : > { %7089 = vmatprep.mubr.msk.f32.mxu0 %vm528_vm0, %v8113_v3 }
  0x60   : > { %7174 = vmatmul.mubr.msk.f32.vlgmr.msra.gmra.mrb[14].mxu1 %vm528_vm0, %v8026_v41  ;;  %v8256_v41 = vld [vmem:[#allocation2 + $0xa9] sm:$0xff] }
  0x61   : > { %7090 = vmatmul.mubr.msk.f32.gmra.mrb[12].mxu0 %vm528_vm0, %v8125_v5  ;;  %7176 = vmatprep.mubr.msk.f32.mxu1 %vm528_vm0, %v8028_v42 }
  0x62   : > { %7092 = vmatprep.mubr.msk.f32.mxu0 %vm528_vm0, %v8133_v8  ;;  %7656 = vmatpush3.bf16.msra.mxu1 %v7653_v62  ;;  %v8305_v62 = vld [vmem:[#allocation2 + $0x191] sm:$0xff] }
  0x63   : > { %7662 = vmatprep.subr.bf16.mxu1 %v8141_v9 }
  0x64   : > { %7177 = vmatmul.mubr.msk.f32.gmra.mrb[16].mxu1 %vm528_vm0, %v8050_v48 }
  0x65   : > { %7093 = vmatmul.mubr.msk.f32.gmra.mrb[14].mxu0 %vm528_vm0, %v8145_v10  ;;  %7179 = vmatprep.mubr.msk.f32.mxu1 %vm528_vm0, %v8053_v49 }
  0x66   : > { %7095 = vmatprep.mubr.msk.f32.mxu0 %vm528_vm0, %v8147_v11 }
  0x68   : > { %7180 = vmatmul.mubr.msk.f32.gmra.mrb[18].mxu1 %vm528_vm0, %v8073_v55 }
  0x69   : > { %7096 = vmatmul.mubr.msk.f32.gmra.mrb[16].mxu0 %vm528_vm0, %v8158_v12  ;;  %7182 = vmatprep.mubr.msk.f32.mxu1 %vm528_vm0, %v8075_v56 }
  0x6a   : > { %7098 = vmatprep.mubr.msk.f32.mxu0 %vm528_vm0, %v8160_v13 }
  0x6c   : > { %7183 = vmatmul.mubr.msk.f32.gmra.mrb[20].mxu1 %vm528_vm0, %v8095_v61 }
  0x6d   : > { %7099 = vmatmul.mubr.msk.f32.gmra.mrb[18].mxu0 %vm528_vm0, %v8170_v14  ;;  %7185 = vmatprep.mubr.msk.f32.mxu1 %vm528_vm0, %v8097_v63 }
  0x6e   : > { %7105 = vmatprep.mubr.msk.f32.mxu0 %vm528_vm0, %v895_v15  ;;  %v6486_v15 = vld [vmem:[%s9801_s3 + $0x80] sm:$0xff] }
  0x6f   : > { %v7665_v17 = vpack.c.bf16 %v6487_v16, %v6486_v15 }
  0x70   : > { %7186 = vmatmul.mubr.msk.f32.gmra.mrb[22].mxu1 %vm528_vm0, %v8111_v2 }
  0x71   : > { %7106 = vmatmul.mubr.msk.f32.vlgmr.msra.gmra.mrb[20].mxu0 %vm528_vm0, %v896_v18  ;;  %7188 = vmatprep.mubr.msk.f32.mxu1 %vm528_vm0, %v8113_v3  ;;  %v8358_v18 = vld [vmem:[#allocation2 + $0x1f1] sm:$0xff] }
  0x72   : > { %7644 = vmatpush3.bf16.msra.mxu0 %v8042_v46  ;;  %7108 = vmatprep.mubr.msk.f32.mxu0 %vm528_vm0, %v8185_v19  ;;  %v8269_v46 = vld [vmem:[#allocation2 + $0x101] sm:$0xff] }
  0x73   : > { %7650 = vmatprep.subr.bf16.mxu0 %v7649_v20 }
  0x74   : > { %7189 = vmatmul.mubr.msk.f32.gmra.mrb[24].mxu1 %vm528_vm0, %v8125_v5 }
  0x75   : > { %7109 = vmatmul.mubr.msk.f32.gmra.mrb[22].mxu0 %vm528_vm0, %v8195_v21  ;;  %7191 = vmatprep.mubr.msk.f32.mxu1 %vm528_vm0, %v8133_v8 }
  0x76   : > { %7111 = vmatprep.mubr.msk.f32.mxu0 %vm528_vm0, %v8197_v22 }
  0x78   : > { %7192 = vmatmul.mubr.msk.f32.gmra.mrb[26].mxu1 %vm528_vm0, %v8145_v10 }
  0x79   : > { %7112 = vmatmul.mubr.msk.f32.gmra.mrb[24].mxu0 %vm528_vm0, %v8207_v23  ;;  %7194 = vmatprep.mubr.msk.f32.mxu1 %vm528_vm0, %v8147_v11 }
  0x7a   : > { %7139 = vmatprep.mubr.msk.f32.mxu0 %vm528_vm0, %v1203_v24 }
  0x7c   : > { %7195 = vmatmul.mubr.msk.f32.gmra.mrb[28].mxu1 %vm528_vm0, %v8158_v12 }
  0x7d   : > { %7140 = vmatmul.mubr.msk.f32.vlgmr.msra.gmra.mrb[26].mxu0 %vm528_vm0, %v1204_v27  ;;  %7197 = vmatprep.mubr.msk.f32.mxu1 %vm528_vm0, %v8160_v13 }
  0x7e   : > { %7652 = vmatpush3.bf16.msra.mxu0 %v7649_v20  ;;  %7142 = vmatprep.mubr.msk.f32.mxu0 %vm528_vm0, %v1205_v28 }
  0x7f   : > { %7658 = vmatprep.subr.bf16.mxu0 %v8224_v29 }
  0x80   : > { %7198 = vmatmul.mubr.msk.f32.gmra.mrb[30].mxu1 %vm528_vm0, %v8170_v14 }
  0x81   : > { %7143 = vmatmul.mubr.msk.f32.gmra.mrb[28].mxu0 %vm528_vm0, %v1206_v30  ;;  %7200 = vmatprep.mubr.msk.f32.mxu1 %vm528_vm0, %v8238_v32 }
  0x82   : > { %7145 = vmatprep.mubr.msk.f32.mxu0 %vm528_vm0, %v8230_v31 }
  0x84   : > { %7201 = vmatmul.mubr.msk.f32.gmra.mrb[32].mxu1 %vm528_vm0, %v8250_v38 }
  0x85   : > { %7146 = vmatmul.mubr.msk.f32.gmra.mrb[30].mxu0 %vm528_vm0, %v8242_v36  ;;  %7241 = vmatprep.mubr.msk.f32.mxu1 %vm528_vm0, %v1205_v28 }
  0x86   : > { %7148 = vmatprep.mubr.msk.f32.mxu0 %vm528_vm0, %v8244_v37 }
  0x88   : > { %7242 = vmatmul.mubr.msk.f32.vlgmr.msra.gmra.mrb[34].mxu1 %vm528_vm0, %v1206_v30 }
  0x89   : > { %7149 = vmatmul.mubr.msk.f32.gmra.mrb[32].mxu0 %vm528_vm0, %v8256_v41  ;;  %7244 = vmatprep.mubr.msk.f32.mxu1 %vm528_vm0, %v8230_v31 }
  0x8a   : > { %7151 = vmatprep.mubr.msk.f32.mxu0 %vm528_vm0, %v8258_v43  ;;  %7664 = vmatpush3.bf16.msra.mxu1 %v8141_v9  ;;  %v8327_v9 = vld [vmem:[#allocation2 + $0x1c9] sm:$0xff] }
  0x8c   : > { %7245 = vmatmul.mubr.msk.f32.gmra.mrb[36].mxu1 %vm528_vm0, %v8242_v36 }
  0x8d   : > { %7152 = vmatmul.mubr.msk.f32.gmra.mrb[34].mxu0 %vm528_vm0, %v8267_v44  ;;  %7247 = vmatprep.mubr.msk.f32.mxu1 %vm528_vm0, %v8244_v37 }
  0x8e   : > { %7154 = vmatprep.mubr.msk.f32.mxu0 %vm528_vm0, %v8269_v46 }
  0x90   : > { %7248 = vmatmul.mubr.msk.f32.gmra.mrb[38].mxu1 %vm528_vm0, %v8256_v41 }
  0x91   : > { %7155 = vmatmul.mubr.msk.f32.gmra.mrb[36].mxu0 %vm528_vm0, %v8279_v50  ;;  %7250 = vmatprep.mubr.msk.f32.mxu1 %vm528_vm0, %v8258_v43 }
  0x92   : > { %7157 = vmatprep.mubr.msk.f32.mxu0 %vm528_vm0, %v8281_v52 }
  0x94   : > { %7251 = vmatmul.mubr.msk.f32.gmra.mrb[40].mxu1 %vm528_vm0, %v8267_v44 }
  0x95   : > { %7158 = vmatmul.mubr.msk.f32.gmra.mrb[38].mxu0 %vm528_vm0, %v8291_v54  ;;  %7253 = vmatprep.mubr.msk.f32.mxu1 %vm528_vm0, %v8269_v46 }
  0x96   : > { %7160 = vmatprep.mubr.msk.f32.mxu0 %vm528_vm0, %v8293_v59 }
  0x98   : > { %7254 = vmatmul.mubr.msk.f32.gmra.mrb[42].mxu1 %vm528_vm0, %v8279_v50 }
  0x99   : > { %7161 = vmatmul.mubr.msk.f32.gmra.mrb[40].mxu0 %vm528_vm0, %v8303_v60  ;;  %7256 = vmatprep.mubr.msk.f32.mxu1 %vm528_vm0, %v8281_v52 }
  0x9a   : > { %7163 = vmatprep.mubr.msk.f32.mxu0 %vm528_vm0, %v8305_v62 }
  0x9c   : > { %7257 = vmatmul.mubr.msk.f32.gmra.mrb[44].mxu1 %vm528_vm0, %v8291_v54 }
  0x9d   : > { %7164 = vmatmul.mubr.msk.f32.gmra.mrb[42].mxu0 %vm528_vm0, %v8315_v6  ;;  %7259 = vmatprep.mubr.msk.f32.mxu1 %vm528_vm0, %v8293_v59 }
  0x9e   : > { %7166 = vmatprep.mubr.msk.f32.mxu0 %vm528_vm0, %v8317_v7 }
  0xa0   : > { %7260 = vmatmul.mubr.msk.f32.gmra.mrb[46].mxu1 %vm528_vm0, %v8303_v60 }
  0xa1   : > { %7167 = vmatmul.mubr.msk.f32.gmra.mrb[44].mxu0 %vm528_vm0, %v8327_v9  ;;  %7262 = vmatprep.mubr.msk.f32.mxu1 %vm528_vm0, %v8305_v62 }
  0xa2   : > { %7207 = vmatprep.mubr.msk.f32.mxu0 %vm528_vm0, %v8185_v19  ;;  %v8366_v19 = vld [vmem:[#allocation2 + $0x1f9] sm:$0xff] }
  0xa4   : > { %7263 = vmatmul.mubr.msk.f32.gmra.mrb[48].mxu1 %vm528_vm0, %v8315_v6 }
  0xa5   : > { %7208 = vmatmul.mubr.msk.f32.vlgmr.msra.gmra.mrb[46].mxu0 %vm528_vm0, %v8195_v21  ;;  %7265 = vmatprep.mubr.msk.f32.mxu1 %vm528_vm0, %v8317_v7 }
  0xa6   : > { %7660 = vmatpush3.bf16.msra.mxu0 %v8224_v29  ;;  %7210 = vmatprep.mubr.msk.f32.mxu0 %vm528_vm0, %v8197_v22 }
  0xa7   : > { %7666 = vmatprep.subr.bf16.mxu0 %v7665_v17 }
  0xa8   : > { %7266 = vmatmul.mubr.msk.f32.gmra.mrb[50].mxu1 %vm528_vm0, %v8327_v9 }
  0xa9   : > { %7211 = vmatmul.mubr.msk.f32.gmra.mrb[48].mxu0 %vm528_vm0, %v8207_v23  ;;  %7268 = vmatprep.mubr.msk.f32.mxu1 %vm528_vm0, %v8358_v18 }
  0xaa   : > { %7213 = vmatprep.mubr.msk.f32.mxu0 %vm528_vm0, %v8004_v33 }
  0xac   : > { %7269 = vmatmul.mubr.msk.f32.gmra.mrb[52].mxu1 %vm528_vm0, %v8366_v19 }
  0xad   : > { %7214 = vmatmul.mubr.msk.f32.gmra.mrb[50].mxu0 %vm528_vm0, %v8006_v34  ;;  %7309 = vmatprep.mubr.msk.f32.mxu1 %vm528_vm0, %v8197_v22 }
  0xae   : > { %7216 = vmatprep.mubr.msk.f32.mxu0 %vm528_vm0, %v8010_v35 }
  0xb0   : > { %7310 = vmatmul.mubr.msk.f32.vlgmr.msra.gmra.mrb[54].mxu1 %vm528_vm0, %v8207_v23 }
  0xb1   : > { %7217 = vmatmul.mubr.msk.f32.gmra.mrb[52].mxu0 %vm528_vm0, %v8019_v39  ;;  %7312 = vmatprep.mubr.msk.f32.mxu1 %vm528_vm0, %v8004_v33  ;;  %v1838_v33 = vld [vmem:[#allocation2 + $0x1f0] sm:$0xff] }
  0xb2   : > { %7219 = vmatprep.mubr.msk.f32.mxu0 %vm528_vm0, %v8022_v40 }
  0xb4   : > { %7313 = vmatmul.mubr.msk.f32.gmra.mrb[56].mxu1 %vm528_vm0, %v8006_v34  ;;  %v1839_v34 = vld [vmem:[#allocation2 + $0x1f8] sm:$0xff] }
  0xb5   : > { %7220 = vmatmul.mubr.msk.f32.gmra.mrb[54].mxu0 %vm528_vm0, %v8040_v45  ;;  %7315 = vmatprep.mubr.msk.f32.mxu1 %vm528_vm0, %v8010_v35  ;;  %v2762_v35 = vld [vmem:[#allocation2 + $0x220] sm:$0xff] }
  0xb6   : > { %7222 = vmatprep.mubr.msk.f32.mxu0 %vm528_vm0, %v8046_v47 }
  0xb8   : > { %7316 = vmatmul.mubr.msk.f32.gmra.mrb[58].mxu1 %vm528_vm0, %v8019_v39  ;;  %v2763_v39 = vld [vmem:[#allocation2 + $0x228] sm:$0xff] }
  0xb9   : > { %7223 = vmatmul.mubr.msk.f32.gmra.mrb[56].mxu0 %vm528_vm0, %v8062_v51  ;;  %7318 = vmatprep.mubr.msk.f32.mxu1 %vm528_vm0, %v8022_v40  ;;  %v2454_v40 = vld [vmem:[#allocation2 + $0x21f] sm:$0xff] }
  0xba   : > { %7225 = vmatprep.mubr.msk.f32.mxu0 %vm528_vm0, %v8069_v53 }
  0xbc   : > { %7319 = vmatmul.mubr.msk.f32.gmra.mrb[60].mxu1 %vm528_vm0, %v8040_v45  ;;  %v3070_v45 = vld [vmem:[#allocation2 + $0x221] sm:$0xff] }
  0xbd   : > { %7226 = vmatmul.mubr.msk.f32.gmra.mrb[58].mxu0 %vm528_vm0, %v8081_v57  ;;  %7321 = vmatprep.mubr.msk.f32.mxu1 %vm528_vm0, %v8046_v47  ;;  %v3071_v47 = vld [vmem:[#allocation2 + $0x229] sm:$0xff] }
  0xbe   : > { %7228 = vmatprep.mubr.msk.f32.mxu0 %vm528_vm0, %v8085_v58 }
  0xc0   : > { %7322 = vmatmul.mubr.msk.f32.gmra.mrb[62].mxu1 %vm528_vm0, %v8062_v51 }
  0xc1   : > { %7229 = vmatmul.mubr.msk.f32.gmra.mrb[60].mxu0 %vm528_vm0, %v8103_v0  ;;  %7324 = vmatprep.mubr.msk.f32.mxu1 %vm528_vm0, %v8069_v53 }
  0xc2   : > { %7231 = vmatprep.mubr.msk.f32.mxu0 %vm528_vm0, %v8107_v1 }
  0xc4   : > { %7325 = vmatmul.mubr.msk.f32.gmra.mrb[64].mxu1 %vm528_vm0, %v8081_v57 }
  0xc5   : > { %7232 = vmatmul.mubr.msk.f32.gmra.mrb[62].mxu0 %vm528_vm0, %v8119_v4  ;;  %7327 = vmatprep.mubr.msk.f32.mxu1 %vm528_vm0, %v8085_v58 }
  0xc6   : > { %7234 = vmatprep.mubr.msk.f32.mxu0 %vm528_vm0, %v1838_v33 }
  0xc8   : > { %7328 = vmatmul.mubr.msk.f32.gmra.mrb[66].mxu1 %vm528_vm0, %v8103_v0 }
  0xc9   : > { %7235 = vmatmul.mubr.msk.f32.gmra.mrb[64].mxu0 %vm528_vm0, %v1839_v34  ;;  %7330 = vmatprep.mubr.msk.f32.mxu1 %vm528_vm0, %v8107_v1 }
  0xca   : > { %7275 = vmatprep.mubr.msk.f32.mxu0 %vm528_vm0, %v8028_v42  ;;  %v2455_v42 = vld [vmem:[#allocation2 + $0x227] sm:$0xff] }
  0xcc   : > { %7331 = vmatmul.mubr.msk.f32.gmra.mrb[68].mxu1 %vm528_vm0, %v8119_v4 }
  0xcd   : > { %7276 = vmatmul.mubr.msk.f32.vlgmr.msra.gmra.mrb[66].mxu0 %vm528_vm0, %v8050_v48  ;;  %7333 = vmatprep.mubr.msk.f32.mxu1 %vm528_vm0, %v1838_v33 }
  0xce   : > { %7668 = vmatpush3.bf16.msra.mxu0 %v7665_v17  ;;  %7278 = vmatprep.mubr.msk.f32.mxu0 %vm528_vm0, %v8053_v49 }
  0xd0   : > { %7334 = vmatmul.mubr.msk.f32.gmra.mrb[70].mxu1 %vm528_vm0, %v1839_v34 }
  0xd1   : > { %7279 = vmatmul.mubr.msk.f32.gmra.mrb[68].mxu0 %vm528_vm0, %v8073_v55  ;;  %7336 = vmatprep.mubr.msk.f32.mxu1 %vm528_vm0, %v2762_v35 }
  0xd2   : > { %7281 = vmatprep.mubr.msk.f32.mxu0 %vm528_vm0, %v8075_v56 }
  0xd4   : > { %7337 = vmatmul.mubr.msk.f32.gmra.mrb[72].mxu1 %vm528_vm0, %v2763_v39 }
  0xd5   : > { %7282 = vmatmul.mubr.msk.f32.gmra.mrb[70].mxu0 %vm528_vm0, %v8095_v61 }
  0xd6   : > { %7284 = vmatprep.mubr.msk.f32.mxu0 %vm528_vm0, %v8097_v63 }
  0xd9   : > { %7285 = vmatmul.mubr.msk.f32.gmra.mrb[72].mxu0 %vm528_vm0, %v8111_v2 }
  0xda   : > { %7287 = vmatprep.mubr.msk.f32.mxu0 %vm528_vm0, %v8113_v3 }
  0xdd   : > { %7288 = vmatmul.mubr.msk.f32.gmra.mrb[74].mxu0 %vm528_vm0, %v8125_v5 }
  0xde   : > { %7290 = vmatprep.mubr.msk.f32.mxu0 %vm528_vm0, %v8133_v8 }
  0xe1   : > { %7291 = vmatmul.mubr.msk.f32.gmra.mrb[76].mxu0 %vm528_vm0, %v8145_v10 }
  0xe2   : > { %7293 = vmatprep.mubr.msk.f32.mxu0 %vm528_vm0, %v8147_v11 }
  0xe5   : > { %7294 = vmatmul.mubr.msk.f32.gmra.mrb[78].mxu0 %vm528_vm0, %v8158_v12 }
  0xe6   : > { %7296 = vmatprep.mubr.msk.f32.mxu0 %vm528_vm0, %v8160_v13 }
  0xe9   : > { %7297 = vmatmul.mubr.msk.f32.gmra.mrb[80].mxu0 %vm528_vm0, %v8170_v14 }
  0xea   : > { %7299 = vmatprep.mubr.msk.f32.mxu0 %vm528_vm0, %v8238_v32 }
  0xed   : > { %7300 = vmatmul.mubr.msk.f32.gmra.mrb[82].mxu0 %vm528_vm0, %v8250_v38 }
  0xee   : > { %7302 = vmatprep.mubr.msk.f32.mxu0 %vm528_vm0, %v2454_v40 }
  0xf1   : > { %7303 = vmatmul.mubr.msk.f32.gmra.mrb[84].mxu0 %vm528_vm0, %v2455_v42 }
  0xf2   : > { %7343 = vmatprep.mubr.msk.f32.mxu0 %vm528_vm0, %v8230_v31 }
  0xf5   : > { %7344 = vmatmul.mubr.msk.f32.vlgmr.msra.gmra.mrb[86].mxu0 %vm528_vm0, %v8242_v36 }
  0xf6   : > { %7346 = vmatprep.mubr.msk.f32.mxu0 %vm528_vm0, %v8244_v37 }
  0xf9   : > { %7347 = vmatmul.mubr.msk.f32.gmra.mrb[88].mxu0 %vm528_vm0, %v8256_v41 }
  0xfa   : > { %7349 = vmatprep.mubr.msk.f32.mxu0 %vm528_vm0, %v8258_v43 }
  0xfd   : > { %7350 = vmatmul.mubr.msk.f32.gmra.mrb[90].mxu0 %vm528_vm0, %v8267_v44 }
  0xfe   : > { %7352 = vmatprep.mubr.msk.f32.mxu0 %vm528_vm0, %v8269_v46 }
 0x101   : > { %7353 = vmatmul.mubr.msk.f32.gmra.mrb[92].mxu0 %vm528_vm0, %v8279_v50 }
 0x102   : > { %7355 = vmatprep.mubr.msk.f32.mxu0 %vm528_vm0, %v8281_v52 }
 0x105   : > { %7356 = vmatmul.mubr.msk.f32.gmra.mrb[94].mxu0 %vm528_vm0, %v8291_v54 }
 0x106   : > { %7358 = vmatprep.mubr.msk.f32.mxu0 %vm528_vm0, %v8293_v59 }
 0x109   : > { %7359 = vmatmul.mubr.msk.f32.gmra.mrb[96].mxu0 %vm528_vm0, %v8303_v60 }
 0x10a   : > { %7361 = vmatprep.mubr.msk.f32.mxu0 %vm528_vm0, %v8305_v62 }
 0x10d   : > { %7362 = vmatmul.mubr.msk.f32.gmra.mrb[98].mxu0 %vm528_vm0, %v8315_v6 }
 0x10e   : > { %7364 = vmatprep.mubr.msk.f32.mxu0 %vm528_vm0, %v8317_v7 }
 0x111   : > { %7365 = vmatmul.mubr.msk.f32.gmra.mrb[100].mxu0 %vm528_vm0, %v8327_v9 }
 0x112   : > { %7367 = vmatprep.mubr.msk.f32.mxu0 %vm528_vm0, %v8358_v18 }
 0x115   : > { %7368 = vmatmul.mubr.msk.f32.gmra.mrb[102].mxu0 %vm528_vm0, %v8366_v19 }
 0x116   : > { %7370 = vmatprep.mubr.msk.f32.mxu0 %vm528_vm0, %v3070_v45 }
 0x117   : > { %v7116_v48 = vpop.f32.mrb[0].mxu1 }
 0x118   : > { %v1074_v49 = vpop.f32.mrb[1].mxu1 }
 0x119   : > { %7371 = vmatmul.mubr.msk.f32.gmra.mrb[104].mxu0 %vm528_vm0, %v3071_v47  ;;  %v7073_v51 = vpop.f32.mrb[0].mxu0 }
 0x11a   : > { %876 = vst.msk [vmem:[#allocation4 + $0x8] sm:$0xff] %vm874_vm1, %v7073_v51  ;;  %v775_v53 = vpop.f32.mrb[1].mxu0 }
 0x11b   : > { %875 = vst.msk [vmem:[#allocation4] sm:$0xff] %vm874_vm1, %v775_v53  ;;  %v7119_v55 = vpop.f32.mrb[2].mxu1 }
 0x11c   : > { %v1084_v56 = vpop.f32.mrb[3].mxu1 }
 0x11d   : > { %v7076_v57 = vpop.f32.mrb[2].mxu0 }
 0x11e   : > { %878 = vst.msk [vmem:[#allocation4 + $0x18] sm:$0xff] %vm874_vm1, %v7076_v57  ;;  %v785_v58 = vpop.f32.mrb[3].mxu0 }
 0x11f   : > { %877 = vst.msk [vmem:[#allocation4 + $0x10] sm:$0xff] %vm874_vm1, %v785_v58  ;;  %v7122_v61 = vpop.f32.mrb[4].mxu1 }
 0x120   : > { %v1094_v63 = vpop.f32.mrb[5].mxu1 }
 0x121   : > { %v1144_v47 = vld [vmem:[#allocation4 + $0x8] sm:$0xff] }
 0x123   : > { %v7125_v2 = vpop.f32.mrb[6].mxu1 }
 0x124   : > { %v7079_v0 = vpop.f32.mrb[4].mxu0  ;;  %v1104_v3 = vpop.f32.mrb[7].mxu1 }
 0x125   : > { %880 = vst.msk [vmem:[#allocation4 + $0x28] sm:$0xff] %vm874_vm1, %v7079_v0  ;;  %v795_v1 = vpop.f32.mrb[5].mxu0 }
 0x126   : > { %879 = vst.msk [vmem:[#allocation4 + $0x20] sm:$0xff] %vm874_vm1, %v795_v1  ;;  %v1146_v1 = vld [vmem:[#allocation4 + $0x18] sm:$0xff] }
 0x127   : > { %v7128_v8 = vpop.f32.mrb[8].mxu1 }
 0x128   : > { %v7082_v4 = vpop.f32.mrb[6].mxu0  ;;  %v1114_v10 = vpop.f32.mrb[9].mxu1 }
 0x129   : > { %882 = vst.msk [vmem:[#allocation4 + $0x38] sm:$0xff] %vm874_vm1, %v7082_v4  ;;  %v805_v5 = vpop.f32.mrb[7].mxu0 }
 0x12a   : > { %881 = vst.msk [vmem:[#allocation4 + $0x30] sm:$0xff] %vm874_vm1, %v805_v5 }
 0x12b   : > { %v8520_v13 = vpop.f32.mrb[10].mxu1 }
 0x12c   : > { %v7085_v11 = vpop.f32.mrb[8].mxu0  ;;  %v8522_v14 = vpop.f32.mrb[11].mxu1 }
 0x12d   : > { %884 = vst.msk [vmem:[#allocation4 + $0x48] sm:$0xff] %vm874_vm1, %v7085_v11  ;;  %v815_v12 = vpop.f32.mrb[9].mxu0 }
 0x12e   : > { %883 = vst.msk [vmem:[#allocation4 + $0x40] sm:$0xff] %vm874_vm1, %v815_v12 }
 0x12f   : > { %v8526_v26 = vpop.f32.mrb[12].mxu1 }
 0x130   : > { %v7088_v20 = vpop.f32.mrb[10].mxu0  ;;  %v1150_v21 = vld [vmem:[#allocation4 + $0x38] sm:$0xff]  ;;  %v8529_v27 = vpop.f32.mrb[13].mxu1 }
 0x131   : > { %886 = vst.msk [vmem:[#allocation4 + $0x58] sm:$0xff] %vm874_vm1, %v7088_v20  ;;  %v1170_v22 = vadd.f32 %v7116_v48, %v1150_v21  ;;  %v825_v23 = vpop.f32.mrb[11].mxu0  ;;  %v1149_v24 = vld [vmem:[#allocation4 + $0x30] sm:$0xff]  ;;  %v1148_v21 = vld [vmem:[#allocation4 + $0x28] sm:$0xff] }
 0x132   : > { %885 = vst.msk [vmem:[#allocation4 + $0x50] sm:$0xff] %vm874_vm1, %v825_v23  ;;  %v1169_v25 = vadd.f32 %v1149_v24, %v1074_v49  ;;  %v1147_v24 = vld [vmem:[#allocation4 + $0x20] sm:$0xff] }
 0x133   : > { %1190 = vst.msk [vmem:[#allocation4 + $0x38] sm:$0xff] %vm874_vm1, %v1170_v22  ;;  %v8534_v37 = vpop.f32.mrb[14].mxu1 }
 0x134   : > { %1189 = vst.msk [vmem:[#allocation4 + $0x30] sm:$0xff] %vm874_vm1, %v1169_v25  ;;  %v7091_v28 = vpop.f32.mrb[12].mxu0  ;;  %v1152_v29 = vld [vmem:[#allocation4 + $0x48] sm:$0xff]  ;;  %v8537_v38 = vpop.f32.mrb[15].mxu1 }
 0x135   : > { %888 = vst.msk [vmem:[#allocation4 + $0x68] sm:$0xff] %vm874_vm1, %v7091_v28  ;;  %v1172_v30 = vadd.f32 %v7119_v55, %v1152_v29  ;;  %v835_v31 = vpop.f32.mrb[13].mxu0  ;;  %v1151_v32 = vld [vmem:[#allocation4 + $0x40] sm:$0xff] }
 0x136   : > { %887 = vst.msk [vmem:[#allocation4 + $0x60] sm:$0xff] %vm874_vm1, %v835_v31  ;;  %v1171_v36 = vadd.f32 %v1151_v32, %v1084_v56  ;;  %v1143_v55 = vld [vmem:[#allocation4] sm:$0xff] }
 0x137   : > { %1192 = vst.msk [vmem:[#allocation4 + $0x48] sm:$0xff] %vm874_vm1, %v1172_v30  ;;  %v8542_v54 = vpop.f32.mrb[16].mxu1 }
 0x138   : > { %1191 = vst.msk [vmem:[#allocation4 + $0x40] sm:$0xff] %vm874_vm1, %v1171_v36  ;;  %v7094_v41 = vpop.f32.mrb[14].mxu0  ;;  %v1154_v43 = vld [vmem:[#allocation4 + $0x58] sm:$0xff]  ;;  %v8545_v59 = vpop.f32.mrb[17].mxu1 }
 0x139   : > { %890 = vst.msk [vmem:[#allocation4 + $0x78] sm:$0xff] %vm874_vm1, %v7094_v41  ;;  %v1174_v44 = vadd.f32 %v7122_v61, %v1154_v43  ;;  %v845_v46 = vpop.f32.mrb[15].mxu0  ;;  %v1153_v50 = vld [vmem:[#allocation4 + $0x50] sm:$0xff] }
 0x13a   : > { %889 = vst.msk [vmem:[#allocation4 + $0x70] sm:$0xff] %vm874_vm1, %v845_v46  ;;  %v1173_v52 = vadd.f32 %v1153_v50, %v1094_v63 }
 0x13b   : > { %1194 = vst.msk [vmem:[#allocation4 + $0x58] sm:$0xff] %vm874_vm1, %v1174_v44  ;;  %v8550_v16 = vpop.f32.mrb[18].mxu1 }
 0x13c   : > { %1193 = vst.msk [vmem:[#allocation4 + $0x50] sm:$0xff] %vm874_vm1, %v1173_v52  ;;  %v7097_v60 = vpop.f32.mrb[16].mxu0  ;;  %v1156_v62 = vld [vmem:[#allocation4 + $0x68] sm:$0xff]  ;;  %v8553_v17 = vpop.f32.mrb[19].mxu1 }
 0x13d   : > { %892 = vst.msk [vmem:[#allocation4 + $0x88] sm:$0xff] %vm874_vm1, %v7097_v60  ;;  %v1176_v6 = vadd.f32 %v7125_v2, %v1156_v62  ;;  %v855_v7 = vpop.f32.mrb[17].mxu0  ;;  %v1155_v9 = vld [vmem:[#allocation4 + $0x60] sm:$0xff] }
 0x13e   : > { %891 = vst.msk [vmem:[#allocation4 + $0x80] sm:$0xff] %vm874_vm1, %v855_v7  ;;  %v1175_v15 = vadd.f32 %v1155_v9, %v1104_v3 }
 0x13f   : > { %1196 = vst.msk [vmem:[#allocation4 + $0x68] sm:$0xff] %vm874_vm1, %v1176_v6  ;;  %v8558_v40 = vpop.f32.mrb[20].mxu1 }
 0x140   : > { %1195 = vst.msk [vmem:[#allocation4 + $0x60] sm:$0xff] %vm874_vm1, %v1175_v15  ;;  %v7100_v18 = vpop.f32.mrb[18].mxu0  ;;  %v1158_v19 = vld [vmem:[#allocation4 + $0x78] sm:$0xff]  ;;  %v8561_v42 = vpop.f32.mrb[21].mxu1 }
 0x141   : > { %894 = vst.msk [vmem:[#allocation4 + $0x98] sm:$0xff] %vm874_vm1, %v7100_v18  ;;  %v1178_v33 = vadd.f32 %v7128_v8, %v1158_v19  ;;  %v865_v34 = vpop.f32.mrb[19].mxu0  ;;  %v1157_v35 = vld [vmem:[#allocation4 + $0x70] sm:$0xff] }
 0x142   : > { %893 = vst.msk [vmem:[#allocation4 + $0x90] sm:$0xff] %vm874_vm1, %v865_v34  ;;  %v1177_v39 = vadd.f32 %v1157_v35, %v1114_v10  ;;  %v1145_v8 = vld [vmem:[#allocation4 + $0x10] sm:$0xff] }
 0x143   : > { %1198 = vst.msk [vmem:[#allocation4 + $0x78] sm:$0xff] %vm874_vm1, %v1178_v33  ;;  %v8566_v61 = vpop.f32.mrb[22].mxu1 }
 0x144   : > { %1197 = vst.msk [vmem:[#allocation4 + $0x70] sm:$0xff] %vm874_vm1, %v1177_v39  ;;  %v7107_v45 = vpop.f32.mrb[20].mxu0  ;;  %v1160_v48 = vld [vmem:[#allocation4 + $0x88] sm:$0xff]  ;;  %v8570_v63 = vpop.f32.mrb[23].mxu1 }
 0x145   : > { %v1164_v49 = vadd.f32 %v7107_v45, %v1144_v47  ;;  %v1180_v51 = vadd.f32 %v8520_v13, %v1160_v48  ;;  %v1044_v53 = vpop.f32.mrb[21].mxu0  ;;  %v1159_v56 = vld [vmem:[#allocation4 + $0x80] sm:$0xff] }
 0x146   : > { %v1163_v57 = vadd.f32 %v1143_v55, %v1044_v53  ;;  %v1179_v58 = vadd.f32 %v1159_v56, %v8522_v14  ;;  %v1458_v53 = vld [vmem:[#allocation4 + $0x38] sm:$0xff] }
 0x147   : > { %1184 = vst.msk [vmem:[#allocation4 + $0x8] sm:$0xff] %vm874_vm1, %v1164_v49  ;;  %1200 = vst.msk [vmem:[#allocation4 + $0x88] sm:$0xff] %vm874_vm1, %v1180_v51  ;;  %v8576_v13 = vpop.f32.mrb[24].mxu1 }
 0x148   : > { %1183 = vst.msk [vmem:[#allocation4] sm:$0xff] %vm874_vm1, %v1163_v57  ;;  %1199 = vst.msk [vmem:[#allocation4 + $0x80] sm:$0xff] %vm874_vm1, %v1179_v58  ;;  %v7110_v0 = vpop.f32.mrb[22].mxu0  ;;  %v1162_v2 = vld [vmem:[#allocation4 + $0x98] sm:$0xff]  ;;  %v8580_v14 = vpop.f32.mrb[25].mxu1  ;;  %v1457_v57 = vld [vmem:[#allocation4 + $0x30] sm:$0xff] }
 0x149   : > { %v1166_v3 = vadd.f32 %v7110_v0, %v1146_v1  ;;  %v1182_v4 = vadd.f32 %v8526_v26, %v1162_v2  ;;  %v1054_v5 = vpop.f32.mrb[23].mxu0  ;;  %v1161_v10 = vld [vmem:[#allocation4 + $0x90] sm:$0xff] }
 0x14a   : > { %v1165_v11 = vadd.f32 %v1145_v8, %v1054_v5  ;;  %v1181_v12 = vadd.f32 %v1161_v10, %v8529_v27  ;;  %v1460_v5 = vld [vmem:[#allocation4 + $0x48] sm:$0xff] }
 0x14b   : > { %1186 = vst.msk [vmem:[#allocation4 + $0x18] sm:$0xff] %vm874_vm1, %v1166_v3  ;;  %1202 = vst.msk [vmem:[#allocation4 + $0x98] sm:$0xff] %vm874_vm1, %v1182_v4  ;;  %v8584_v26 = vpop.f32.mrb[26].mxu1 }
 0x14c   : > { %1185 = vst.msk [vmem:[#allocation4 + $0x10] sm:$0xff] %vm874_vm1, %v1165_v11  ;;  %1201 = vst.msk [vmem:[#allocation4 + $0x90] sm:$0xff] %vm874_vm1, %v1181_v12  ;;  %v7113_v20 = vpop.f32.mrb[24].mxu0  ;;  %v8587_v27 = vpop.f32.mrb[27].mxu1  ;;  %v1459_v11 = vld [vmem:[#allocation4 + $0x40] sm:$0xff] }
 0x14d   : > { %v1168_v22 = vadd.f32 %v7113_v20, %v1148_v21  ;;  %v1064_v23 = vpop.f32.mrb[25].mxu0 }
 0x14e   : > { %v1167_v25 = vadd.f32 %v1147_v24, %v1064_v23  ;;  %v1452_v29 = vld [vmem:[#allocation4 + $0x8] sm:$0xff] }
 0x14f   : > { %1188 = vst.msk [vmem:[#allocation4 + $0x28] sm:$0xff] %vm874_vm1, %v1168_v22  ;;  %v1451_v32 = vld [vmem:[#allocation4] sm:$0xff]  ;;  %v8590_v41 = vpop.f32.mrb[28].mxu1 }
 0x150   : > { %1187 = vst.msk [vmem:[#allocation4 + $0x20] sm:$0xff] %vm874_vm1, %v1167_v25  ;;  %v7141_v28 = vpop.f32.mrb[26].mxu0  ;;  %v8593_v43 = vpop.f32.mrb[29].mxu1  ;;  %v1462_v25 = vld [vmem:[#allocation4 + $0x58] sm:$0xff] }
 0x151   : > { %v1472_v30 = vadd.f32 %v7141_v28, %v1452_v29  ;;  %v1352_v31 = vpop.f32.mrb[27].mxu0 }
 0x152   : > { %v1471_v36 = vadd.f32 %v1451_v32, %v1352_v31  ;;  %v1454_v46 = vld [vmem:[#allocation4 + $0x18] sm:$0xff] }
 0x153   : > { %1492 = vst.msk [vmem:[#allocation4 + $0x8] sm:$0xff] %vm874_vm1, %v1472_v30  ;;  %v1453_v60 = vld [vmem:[#allocation4 + $0x10] sm:$0xff]  ;;  %v8596_v6 = vpop.f32.mrb[30].mxu1 }
 0x154   : > { %1491 = vst.msk [vmem:[#allocation4] sm:$0xff] %vm874_vm1, %v1471_v36  ;;  %v7144_v44 = vpop.f32.mrb[28].mxu0  ;;  %v8599_v7 = vpop.f32.mrb[31].mxu1  ;;  %v1461_v30 = vld [vmem:[#allocation4 + $0x50] sm:$0xff] }
 0x155   : > { %v1474_v50 = vadd.f32 %v7144_v44, %v1454_v46  ;;  %v1362_v52 = vpop.f32.mrb[29].mxu0 }
 0x156   : > { %v1473_v62 = vadd.f32 %v1453_v60, %v1362_v52  ;;  %v1456_v15 = vld [vmem:[#allocation4 + $0x28] sm:$0xff] }
 0x157   : > { %1494 = vst.msk [vmem:[#allocation4 + $0x18] sm:$0xff] %vm874_vm1, %v1474_v50  ;;  %v1455_v33 = vld [vmem:[#allocation4 + $0x20] sm:$0xff]  ;;  %v8602_v39 = vpop.f32.mrb[32].mxu1  ;;  %v1464_v52 = vld [vmem:[#allocation4 + $0x68] sm:$0xff] }
 0x158   : > { %1493 = vst.msk [vmem:[#allocation4 + $0x10] sm:$0xff] %vm874_vm1, %v1473_v62  ;;  %v7147_v9 = vpop.f32.mrb[30].mxu0  ;;  %v8606_v48 = vpop.f32.mrb[33].mxu1 }
 0x159   : > { %v1476_v18 = vadd.f32 %v7147_v9, %v1456_v15  ;;  %v1372_v19 = vpop.f32.mrb[31].mxu0  ;;  %v1463_v9 = vld [vmem:[#allocation4 + $0x60] sm:$0xff] }
 0x15a   : > { %v1475_v34 = vadd.f32 %v1455_v33, %v1372_v19  ;;  %v1761_v35 = vld [vmem:[#allocation4 + $0x8] sm:$0xff] }
 0x15b   : > { %1496 = vst.msk [vmem:[#allocation4 + $0x28] sm:$0xff] %vm874_vm1, %v1476_v18  ;;  %v1781_v45 = vadd.f32 %v8534_v37, %v1761_v35  ;;  %v1760_v47 = vld [vmem:[#allocation4] sm:$0xff]  ;;  %v8612_v1 = vpop.f32.mrb[34].mxu1 }
 0x15c   : > { %1495 = vst.msk [vmem:[#allocation4 + $0x20] sm:$0xff] %vm874_vm1, %v1475_v34  ;;  %v1780_v49 = vadd.f32 %v1760_v47, %v8537_v38  ;;  %v7150_v51 = vpop.f32.mrb[32].mxu0  ;;  %v8616_v3 = vpop.f32.mrb[35].mxu1 }
 0x15d   : > { %1801 = vst.msk [vmem:[#allocation4 + $0x8] sm:$0xff] %vm874_vm1, %v1781_v45  ;;  %v1478_v55 = vadd.f32 %v7150_v51, %v1458_v53  ;;  %v1382_v56 = vpop.f32.mrb[33].mxu0  ;;  %v1466_v45 = vld [vmem:[#allocation4 + $0x78] sm:$0xff]  ;;  %v1465_v51 = vld [vmem:[#allocation4 + $0x70] sm:$0xff] }
 0x15e   : > { %1800 = vst.msk [vmem:[#allocation4] sm:$0xff] %vm874_vm1, %v1780_v49  ;;  %v1477_v58 = vadd.f32 %v1457_v57, %v1382_v56  ;;  %v1763_v0 = vld [vmem:[#allocation4 + $0x18] sm:$0xff] }
 0x15f   : > { %1498 = vst.msk [vmem:[#allocation4 + $0x38] sm:$0xff] %vm874_vm1, %v1478_v55  ;;  %v1783_v37 = vadd.f32 %v8542_v54, %v1763_v0  ;;  %v1762_v2 = vld [vmem:[#allocation4 + $0x10] sm:$0xff]  ;;  %v8622_v21 = vpop.f32.mrb[36].mxu1 }
 0x160   : > { %1497 = vst.msk [vmem:[#allocation4 + $0x30] sm:$0xff] %vm874_vm1, %v1477_v58  ;;  %v1782_v38 = vadd.f32 %v1762_v2, %v8545_v59  ;;  %v7153_v4 = vpop.f32.mrb[34].mxu0  ;;  %v8626_v23 = vpop.f32.mrb[37].mxu1 }
 0x161   : > { %1803 = vst.msk [vmem:[#allocation4 + $0x18] sm:$0xff] %vm874_vm1, %v1783_v37  ;;  %v1480_v8 = vadd.f32 %v7153_v4, %v1460_v5  ;;  %v1392_v10 = vpop.f32.mrb[35].mxu0  ;;  %v1468_v37 = vld [vmem:[#allocation4 + $0x88] sm:$0xff]  ;;  %v1467_v4 = vld [vmem:[#allocation4 + $0x80] sm:$0xff] }
 0x162   : > { %1802 = vst.msk [vmem:[#allocation4 + $0x10] sm:$0xff] %vm874_vm1, %v1782_v38  ;;  %v1479_v12 = vadd.f32 %v1459_v11, %v1392_v10  ;;  %v1765_v20 = vld [vmem:[#allocation4 + $0x28] sm:$0xff] }
 0x163   : > { %1500 = vst.msk [vmem:[#allocation4 + $0x48] sm:$0xff] %vm874_vm1, %v1480_v8  ;;  %v1785_v54 = vadd.f32 %v8550_v16, %v1765_v20  ;;  %v1764_v22 = vld [vmem:[#allocation4 + $0x20] sm:$0xff]  ;;  %v8632_v36 = vpop.f32.mrb[38].mxu1 }
 0x164   : > { %1499 = vst.msk [vmem:[#allocation4 + $0x40] sm:$0xff] %vm874_vm1, %v1479_v12  ;;  %v1784_v59 = vadd.f32 %v1764_v22, %v8553_v17  ;;  %v7156_v24 = vpop.f32.mrb[36].mxu0  ;;  %v8636_v46 = vpop.f32.mrb[39].mxu1 }
 0x165   : > { %1805 = vst.msk [vmem:[#allocation4 + $0x28] sm:$0xff] %vm874_vm1, %v1785_v54  ;;  %v1482_v28 = vadd.f32 %v7156_v24, %v1462_v25  ;;  %v1402_v29 = vpop.f32.mrb[37].mxu0  ;;  %v1470_v54 = vld [vmem:[#allocation4 + $0x98] sm:$0xff]  ;;  %v1469_v24 = vld [vmem:[#allocation4 + $0x90] sm:$0xff] }
 0x166   : > { %1804 = vst.msk [vmem:[#allocation4 + $0x20] sm:$0xff] %vm874_vm1, %v1784_v59  ;;  %v1481_v31 = vadd.f32 %v1461_v30, %v1402_v29  ;;  %v1767_v32 = vld [vmem:[#allocation4 + $0x38] sm:$0xff] }
 0x167   : > { %1502 = vst.msk [vmem:[#allocation4 + $0x58] sm:$0xff] %vm874_vm1, %v1482_v28  ;;  %v1787_v16 = vadd.f32 %v8558_v40, %v1767_v32  ;;  %v1766_v44 = vld [vmem:[#allocation4 + $0x30] sm:$0xff]  ;;  %v8642_v19 = vpop.f32.mrb[40].mxu1 }
 0x168   : > { %1501 = vst.msk [vmem:[#allocation4 + $0x50] sm:$0xff] %vm874_vm1, %v1481_v31  ;;  %v1786_v17 = vadd.f32 %v1766_v44, %v8561_v42  ;;  %v7159_v50 = vpop.f32.mrb[38].mxu0  ;;  %v8646_v34 = vpop.f32.mrb[41].mxu1 }
 0x169   : > { %1807 = vst.msk [vmem:[#allocation4 + $0x38] sm:$0xff] %vm874_vm1, %v1787_v16  ;;  %v1484_v60 = vadd.f32 %v7159_v50, %v1464_v52  ;;  %v1412_v62 = vpop.f32.mrb[39].mxu0  ;;  %v2069_v16 = vld [vmem:[#allocation4 + $0x8] sm:$0xff]  ;;  %v2068_v50 = vld [vmem:[#allocation4] sm:$0xff] }
 0x16a   : > { %1806 = vst.msk [vmem:[#allocation4 + $0x30] sm:$0xff] %vm874_vm1, %v1786_v17  ;;  %v1483_v15 = vadd.f32 %v1463_v9, %v1412_v62  ;;  %v1769_v18 = vld [vmem:[#allocation4 + $0x48] sm:$0xff] }
 0x16b   : > { %1504 = vst.msk [vmem:[#allocation4 + $0x68] sm:$0xff] %vm874_vm1, %v1484_v60  ;;  %v1789_v40 = vadd.f32 %v8566_v61, %v1769_v18  ;;  %v1768_v33 = vld [vmem:[#allocation4 + $0x40] sm:$0xff]  ;;  %v8652_v56 = vpop.f32.mrb[42].mxu1 }
 0x16c   : > { %1503 = vst.msk [vmem:[#allocation4 + $0x60] sm:$0xff] %vm874_vm1, %v1483_v15  ;;  %v1788_v42 = vadd.f32 %v1768_v33, %v8570_v63  ;;  %v7162_v35 = vpop.f32.mrb[40].mxu0  ;;  %v8656_v58 = vpop.f32.mrb[43].mxu1 }
 0x16d   : > { %1809 = vst.msk [vmem:[#allocation4 + $0x48] sm:$0xff] %vm874_vm1, %v1789_v40  ;;  %v1486_v47 = vadd.f32 %v7162_v35, %v1466_v45  ;;  %v1422_v49 = vpop.f32.mrb[41].mxu0  ;;  %v2071_v40 = vld [vmem:[#allocation4 + $0x18] sm:$0xff]  ;;  %v2070_v35 = vld [vmem:[#allocation4 + $0x10] sm:$0xff] }
 0x16e   : > { %1808 = vst.msk [vmem:[#allocation4 + $0x40] sm:$0xff] %vm874_vm1, %v1788_v42  ;;  %v1485_v53 = vadd.f32 %v1465_v51, %v1422_v49  ;;  %v1771_v55 = vld [vmem:[#allocation4 + $0x58] sm:$0xff] }
 0x16f   : > { %1506 = vst.msk [vmem:[#allocation4 + $0x78] sm:$0xff] %vm874_vm1, %v1486_v47  ;;  %v1791_v61 = vadd.f32 %v8576_v13, %v1771_v55  ;;  %v1770_v57 = vld [vmem:[#allocation4 + $0x50] sm:$0xff]  ;;  %v8662_v10 = vpop.f32.mrb[44].mxu1 }
 0x170   : > { %1505 = vst.msk [vmem:[#allocation4 + $0x70] sm:$0xff] %vm874_vm1, %v1485_v53  ;;  %v1790_v63 = vadd.f32 %v1770_v57, %v8580_v14  ;;  %v7165_v0 = vpop.f32.mrb[42].mxu0  ;;  %v8666_v12 = vpop.f32.mrb[45].mxu1 }
 0x171   : > { %1811 = vst.msk [vmem:[#allocation4 + $0x58] sm:$0xff] %vm874_vm1, %v1791_v61  ;;  %v1488_v2 = vadd.f32 %v7165_v0, %v1468_v37  ;;  %v1432_v38 = vpop.f32.mrb[43].mxu0  ;;  %v2073_v61 = vld [vmem:[#allocation4 + $0x28] sm:$0xff]  ;;  %v2072_v0 = vld [vmem:[#allocation4 + $0x20] sm:$0xff] }
 0x172   : > { %1810 = vst.msk [vmem:[#allocation4 + $0x50] sm:$0xff] %vm874_vm1, %v1790_v63  ;;  %v1487_v5 = vadd.f32 %v1467_v4, %v1432_v38  ;;  %v1773_v8 = vld [vmem:[#allocation4 + $0x68] sm:$0xff] }
 0x173   : > { %1508 = vst.msk [vmem:[#allocation4 + $0x88] sm:$0xff] %vm874_vm1, %v1488_v2  ;;  %v1793_v13 = vadd.f32 %v8584_v26, %v1773_v8  ;;  %v1772_v11 = vld [vmem:[#allocation4 + $0x60] sm:$0xff]  ;;  %v8672_v29 = vpop.f32.mrb[46].mxu1 }
 0x174   : > { %1507 = vst.msk [vmem:[#allocation4 + $0x80] sm:$0xff] %vm874_vm1, %v1487_v5  ;;  %v1792_v14 = vadd.f32 %v1772_v11, %v8587_v27  ;;  %v7168_v20 = vpop.f32.mrb[44].mxu0  ;;  %v8676_v31 = vpop.f32.mrb[47].mxu1 }
 0x175   : > { %1813 = vst.msk [vmem:[#allocation4 + $0x68] sm:$0xff] %vm874_vm1, %v1793_v13  ;;  %v1490_v22 = vadd.f32 %v7168_v20, %v1470_v54  ;;  %v1442_v59 = vpop.f32.mrb[45].mxu0  ;;  %v2075_v13 = vld [vmem:[#allocation4 + $0x38] sm:$0xff]  ;;  %v2074_v20 = vld [vmem:[#allocation4 + $0x30] sm:$0xff] }
 0x176   : > { %1812 = vst.msk [vmem:[#allocation4 + $0x60] sm:$0xff] %vm874_vm1, %v1792_v14  ;;  %v1489_v25 = vadd.f32 %v1469_v24, %v1442_v59  ;;  %v1775_v28 = vld [vmem:[#allocation4 + $0x78] sm:$0xff] }
 0x177   : > { %1510 = vst.msk [vmem:[#allocation4 + $0x98] sm:$0xff] %vm874_vm1, %v1490_v22  ;;  %v1795_v26 = vadd.f32 %v8590_v41, %v1775_v28  ;;  %v1774_v30 = vld [vmem:[#allocation4 + $0x70] sm:$0xff]  ;;  %v8682_v62 = vpop.f32.mrb[48].mxu1 }
 0x178   : > { %1509 = vst.msk [vmem:[#allocation4 + $0x90] sm:$0xff] %vm874_vm1, %v1489_v25  ;;  %v1794_v27 = vadd.f32 %v1774_v30, %v8593_v43  ;;  %v7209_v32 = vpop.f32.mrb[46].mxu0  ;;  %v8686_v15 = vpop.f32.mrb[49].mxu1 }
 0x179   : > { %1815 = vst.msk [vmem:[#allocation4 + $0x78] sm:$0xff] %vm874_vm1, %v1795_v26  ;;  %v2089_v44 = vadd.f32 %v7209_v32, %v2069_v16  ;;  %v1969_v17 = vpop.f32.mrb[47].mxu0  ;;  %v2077_v26 = vld [vmem:[#allocation4 + $0x48] sm:$0xff]  ;;  %v2076_v32 = vld [vmem:[#allocation4 + $0x40] sm:$0xff] }
 0x17a   : > { %1814 = vst.msk [vmem:[#allocation4 + $0x70] sm:$0xff] %vm874_vm1, %v1794_v27  ;;  %v2088_v52 = vadd.f32 %v2068_v50, %v1969_v17  ;;  %v1777_v60 = vld [vmem:[#allocation4 + $0x88] sm:$0xff] }
 0x17b   : > { %2109 = vst.msk [vmem:[#allocation4 + $0x8] sm:$0xff] %vm874_vm1, %v2089_v44  ;;  %v1797_v41 = vadd.f32 %v8596_v6, %v1777_v60  ;;  %v1776_v9 = vld [vmem:[#allocation4 + $0x80] sm:$0xff]  ;;  %v8692_v49 = vpop.f32.mrb[50].mxu1 }
 0x17c   : > { %2108 = vst.msk [vmem:[#allocation4] sm:$0xff] %vm874_vm1, %v2088_v52  ;;  %v1796_v43 = vadd.f32 %v1776_v9, %v8599_v7  ;;  %v7212_v18 = vpop.f32.mrb[48].mxu0  ;;  %v8696_v53 = vpop.f32.mrb[51].mxu1 }
 0x17d   : > { %1817 = vst.msk [vmem:[#allocation4 + $0x88] sm:$0xff] %vm874_vm1, %v1797_v41  ;;  %v2091_v33 = vadd.f32 %v7212_v18, %v2071_v40  ;;  %v1979_v42 = vpop.f32.mrb[49].mxu0  ;;  %v2079_v41 = vld [vmem:[#allocation4 + $0x58] sm:$0xff]  ;;  %v2078_v18 = vld [vmem:[#allocation4 + $0x50] sm:$0xff] }
 0x17e   : > { %1816 = vst.msk [vmem:[#allocation4 + $0x80] sm:$0xff] %vm874_vm1, %v1796_v43  ;;  %v2090_v45 = vadd.f32 %v2070_v35, %v1979_v42  ;;  %v1779_v47 = vld [vmem:[#allocation4 + $0x98] sm:$0xff] }
 0x17f   : > { %2111 = vst.msk [vmem:[#allocation4 + $0x18] sm:$0xff] %vm874_vm1, %v2091_v33  ;;  %v1799_v6 = vadd.f32 %v8602_v39, %v1779_v47  ;;  %v1778_v51 = vld [vmem:[#allocation4 + $0x90] sm:$0xff]  ;;  %v8702_v38 = vpop.f32.mrb[52].mxu1 }
 0x180   : > { %2110 = vst.msk [vmem:[#allocation4 + $0x10] sm:$0xff] %vm874_vm1, %v2090_v45  ;;  %v1798_v7 = vadd.f32 %v1778_v51, %v8606_v48  ;;  %v7215_v55 = vpop.f32.mrb[50].mxu0  ;;  %v8706_v5 = vpop.f32.mrb[53].mxu1 }
 0x181   : > { %1819 = vst.msk [vmem:[#allocation4 + $0x98] sm:$0xff] %vm874_vm1, %v1799_v6  ;;  %v2093_v57 = vadd.f32 %v7215_v55, %v2073_v61  ;;  %v1989_v63 = vpop.f32.mrb[51].mxu0  ;;  %v2081_v6 = vld [vmem:[#allocation4 + $0x68] sm:$0xff]  ;;  %v2080_v55 = vld [vmem:[#allocation4 + $0x60] sm:$0xff] }
 0x182   : > { %1818 = vst.msk [vmem:[#allocation4 + $0x90] sm:$0xff] %vm874_vm1, %v1798_v7  ;;  %v2092_v37 = vadd.f32 %v2072_v0, %v1989_v63  ;;  %v2377_v2 = vld [vmem:[#allocation4 + $0x8] sm:$0xff] }
 0x183   : > { %2113 = vst.msk [vmem:[#allocation4 + $0x28] sm:$0xff] %vm874_vm1, %v2093_v57  ;;  %v2397_v39 = vadd.f32 %v8612_v1, %v2377_v2  ;;  %v2376_v4 = vld [vmem:[#allocation4] sm:$0xff]  ;;  %v8712_v59 = vpop.f32.mrb[54].mxu1 }
 0x184   : > { %2112 = vst.msk [vmem:[#allocation4 + $0x20] sm:$0xff] %vm874_vm1, %v2092_v37  ;;  %v2396_v48 = vadd.f32 %v2376_v4, %v8616_v3  ;;  %v7218_v8 = vpop.f32.mrb[52].mxu0  ;;  %v8716_v25 = vpop.f32.mrb[55].mxu1 }
 0x185   : > { %2417 = vst.msk [vmem:[#allocation4 + $0x8] sm:$0xff] %vm874_vm1, %v2397_v39  ;;  %v2095_v11 = vadd.f32 %v7218_v8, %v2075_v13  ;;  %v1999_v14 = vpop.f32.mrb[53].mxu0  ;;  %v2083_v39 = vld [vmem:[#allocation4 + $0x78] sm:$0xff]  ;;  %v2082_v8 = vld [vmem:[#allocation4 + $0x70] sm:$0xff] }
 0x186   : > { %2416 = vst.msk [vmem:[#allocation4] sm:$0xff] %vm874_vm1, %v2396_v48  ;;  %v2094_v54 = vadd.f32 %v2074_v20, %v1999_v14  ;;  %v2379_v22 = vld [vmem:[#allocation4 + $0x18] sm:$0xff] }
 0x187   : > { %2115 = vst.msk [vmem:[#allocation4 + $0x38] sm:$0xff] %vm874_vm1, %v2095_v11  ;;  %v2399_v1 = vadd.f32 %v8622_v21, %v2379_v22  ;;  %v2378_v24 = vld [vmem:[#allocation4 + $0x10] sm:$0xff]  ;;  %v8722_v17 = vpop.f32.mrb[56].mxu1 }
 0x188   : > { %2114 = vst.msk [vmem:[#allocation4 + $0x30] sm:$0xff] %vm874_vm1, %v2094_v54  ;;  %v2398_v3 = vadd.f32 %v2378_v24, %v8626_v23  ;;  %v7221_v28 = vpop.f32.mrb[54].mxu0  ;;  %v8726_v52 = vpop.f32.mrb[57].mxu1 }
 0x189   : > { %2419 = vst.msk [vmem:[#allocation4 + $0x18] sm:$0xff] %vm874_vm1, %v2399_v1  ;;  %v2097_v30 = vadd.f32 %v7221_v28, %v2077_v26  ;;  %v2009_v27 = vpop.f32.mrb[55].mxu0  ;;  %v2085_v1 = vld [vmem:[#allocation4 + $0x88] sm:$0xff]  ;;  %v2084_v28 = vld [vmem:[#allocation4 + $0x80] sm:$0xff] }
 0x18a   : > { %2418 = vst.msk [vmem:[#allocation4 + $0x10] sm:$0xff] %vm874_vm1, %v2398_v3  ;;  %v2096_v16 = vadd.f32 %v2076_v32, %v2009_v27  ;;  %v2381_v44 = vld [vmem:[#allocation4 + $0x28] sm:$0xff] }
 0x18b   : > { %2117 = vst.msk [vmem:[#allocation4 + $0x48] sm:$0xff] %vm874_vm1, %v2097_v30  ;;  %v2401_v21 = vadd.f32 %v8632_v36, %v2381_v44  ;;  %v2380_v50 = vld [vmem:[#allocation4 + $0x20] sm:$0xff]  ;;  %v8732_v42 = vpop.f32.mrb[58].mxu1 }
 0x18c   : > { %2116 = vst.msk [vmem:[#allocation4 + $0x40] sm:$0xff] %vm874_vm1, %v2096_v16  ;;  %v2400_v23 = vadd.f32 %v2380_v50, %v8636_v46  ;;  %v7224_v60 = vpop.f32.mrb[56].mxu0  ;;  %v8736_v45 = vpop.f32.mrb[59].mxu1 }
 0x18d   : > { %2421 = vst.msk [vmem:[#allocation4 + $0x28] sm:$0xff] %vm874_vm1, %v2401_v21  ;;  %v2099_v9 = vadd.f32 %v7224_v60, %v2079_v41  ;;  %v2019_v43 = vpop.f32.mrb[57].mxu0  ;;  %v2087_v21 = vld [vmem:[#allocation4 + $0x98] sm:$0xff]  ;;  %v2086_v60 = vld [vmem:[#allocation4 + $0x90] sm:$0xff] }
 0x18e   : > { %2420 = vst.msk [vmem:[#allocation4 + $0x20] sm:$0xff] %vm874_vm1, %v2400_v23  ;;  %v2098_v40 = vadd.f32 %v2078_v18, %v2019_v43  ;;  %v2383_v33 = vld [vmem:[#allocation4 + $0x38] sm:$0xff] }
 0x18f   : > { %2119 = vst.msk [vmem:[#allocation4 + $0x58] sm:$0xff] %vm874_vm1, %v2099_v9  ;;  %v2403_v36 = vadd.f32 %v8642_v19, %v2383_v33  ;;  %v2382_v35 = vld [vmem:[#allocation4 + $0x30] sm:$0xff]  ;;  %v8742_v63 = vpop.f32.mrb[60].mxu1 }
 0x190   : > { %2118 = vst.msk [vmem:[#allocation4 + $0x50] sm:$0xff] %vm874_vm1, %v2098_v40  ;;  %v2402_v46 = vadd.f32 %v2382_v35, %v8646_v34  ;;  %v7227_v47 = vpop.f32.mrb[58].mxu0  ;;  %v8746_v37 = vpop.f32.mrb[61].mxu1 }
 0x191   : > { %2423 = vst.msk [vmem:[#allocation4 + $0x38] sm:$0xff] %vm874_vm1, %v2403_v36  ;;  %v2101_v51 = vadd.f32 %v7227_v47, %v2081_v6  ;;  %v2029_v7 = vpop.f32.mrb[59].mxu0  ;;  %v2685_v36 = vld [vmem:[#allocation4 + $0x8] sm:$0xff]  ;;  %v2684_v47 = vld [vmem:[#allocation4] sm:$0xff] }
 0x192   : > { %2422 = vst.msk [vmem:[#allocation4 + $0x30] sm:$0xff] %vm874_vm1, %v2402_v46  ;;  %v2100_v61 = vadd.f32 %v2080_v55, %v2029_v7  ;;  %v2385_v57 = vld [vmem:[#allocation4 + $0x48] sm:$0xff] }
 0x193   : > { %2121 = vst.msk [vmem:[#allocation4 + $0x68] sm:$0xff] %vm874_vm1, %v2101_v51  ;;  %v2405_v19 = vadd.f32 %v8652_v56, %v2385_v57  ;;  %v2384_v0 = vld [vmem:[#allocation4 + $0x40] sm:$0xff]  ;;  %v8752_v14 = vpop.f32.mrb[62].mxu1 }
 0x194   : > { %2120 = vst.msk [vmem:[#allocation4 + $0x60] sm:$0xff] %vm874_vm1, %v2100_v61  ;;  %v2404_v34 = vadd.f32 %v2384_v0, %v8656_v58  ;;  %v7230_v2 = vpop.f32.mrb[60].mxu0  ;;  %v8756_v54 = vpop.f32.mrb[63].mxu1 }
 0x195   : > { %2425 = vst.msk [vmem:[#allocation4 + $0x48] sm:$0xff] %vm874_vm1, %v2405_v19  ;;  %v2103_v4 = vadd.f32 %v7230_v2, %v2083_v39  ;;  %v2039_v48 = vpop.f32.mrb[61].mxu0  ;;  %v2687_v19 = vld [vmem:[#allocation4 + $0x18] sm:$0xff]  ;;  %v2686_v2 = vld [vmem:[#allocation4 + $0x10] sm:$0xff] }
 0x196   : > { %2424 = vst.msk [vmem:[#allocation4 + $0x40] sm:$0xff] %vm874_vm1, %v2404_v34  ;;  %v2102_v13 = vadd.f32 %v2082_v8, %v2039_v48  ;;  %v2387_v11 = vld [vmem:[#allocation4 + $0x58] sm:$0xff] }
 0x197   : > { %2123 = vst.msk [vmem:[#allocation4 + $0x78] sm:$0xff] %vm874_vm1, %v2103_v4  ;;  %v2407_v56 = vadd.f32 %v8662_v10, %v2387_v11  ;;  %v2386_v20 = vld [vmem:[#allocation4 + $0x50] sm:$0xff]  ;;  %v8762_v27 = vpop.f32.mrb[64].mxu1 }
 0x198   : > { %2122 = vst.msk [vmem:[#allocation4 + $0x70] sm:$0xff] %vm874_vm1, %v2102_v13  ;;  %v2406_v58 = vadd.f32 %v2386_v20, %v8666_v12  ;;  %v7233_v22 = vpop.f32.mrb[62].mxu0  ;;  %v8766_v16 = vpop.f32.mrb[65].mxu1 }
 0x199   : > { %2427 = vst.msk [vmem:[#allocation4 + $0x58] sm:$0xff] %vm874_vm1, %v2407_v56  ;;  %v2105_v24 = vadd.f32 %v7233_v22, %v2085_v1  ;;  %v2049_v3 = vpop.f32.mrb[63].mxu0  ;;  %v2689_v56 = vld [vmem:[#allocation4 + $0x28] sm:$0xff]  ;;  %v2688_v22 = vld [vmem:[#allocation4 + $0x20] sm:$0xff] }
 0x19a   : > { %2426 = vst.msk [vmem:[#allocation4 + $0x50] sm:$0xff] %vm874_vm1, %v2406_v58  ;;  %v2104_v26 = vadd.f32 %v2084_v28, %v2049_v3  ;;  %v2389_v30 = vld [vmem:[#allocation4 + $0x68] sm:$0xff] }
 0x19b   : > { %2125 = vst.msk [vmem:[#allocation4 + $0x88] sm:$0xff] %vm874_vm1, %v2105_v24  ;;  %v2409_v10 = vadd.f32 %v8672_v29, %v2389_v30  ;;  %v2388_v32 = vld [vmem:[#allocation4 + $0x60] sm:$0xff]  ;;  %v8772_v43 = vpop.f32.mrb[66].mxu1 }
 0x19c   : > { %2124 = vst.msk [vmem:[#allocation4 + $0x80] sm:$0xff] %vm874_vm1, %v2104_v26  ;;  %v2408_v12 = vadd.f32 %v2388_v32, %v8676_v31  ;;  %v7236_v44 = vpop.f32.mrb[64].mxu0  ;;  %v8776_v40 = vpop.f32.mrb[67].mxu1 }
 0x19d   : > { %2429 = vst.msk [vmem:[#allocation4 + $0x68] sm:$0xff] %vm874_vm1, %v2409_v10  ;;  %v2107_v50 = vadd.f32 %v7236_v44, %v2087_v21  ;;  %v2059_v23 = vpop.f32.mrb[65].mxu0  ;;  %v2691_v10 = vld [vmem:[#allocation4 + $0x38] sm:$0xff]  ;;  %v2690_v44 = vld [vmem:[#allocation4 + $0x30] sm:$0xff] }
 0x19e   : > { %2428 = vst.msk [vmem:[#allocation4 + $0x60] sm:$0xff] %vm874_vm1, %v2408_v12  ;;  %v2106_v41 = vadd.f32 %v2086_v60, %v2059_v23  ;;  %v2391_v9 = vld [vmem:[#allocation4 + $0x78] sm:$0xff] }
 0x19f   : > { %2127 = vst.msk [vmem:[#allocation4 + $0x98] sm:$0xff] %vm874_vm1, %v2107_v50  ;;  %v2411_v29 = vadd.f32 %v8682_v62, %v2391_v9  ;;  %v2390_v18 = vld [vmem:[#allocation4 + $0x70] sm:$0xff]  ;;  %v8782_v7 = vpop.f32.mrb[68].mxu1 }
 0x1a0   : > { %2126 = vst.msk [vmem:[#allocation4 + $0x90] sm:$0xff] %vm874_vm1, %v2106_v41  ;;  %v2410_v31 = vadd.f32 %v2390_v18, %v8686_v15  ;;  %v7277_v33 = vpop.f32.mrb[66].mxu0  ;;  %v8786_v61 = vpop.f32.mrb[69].mxu1  ;;  %v2693_v41 = vld [vmem:[#allocation4 + $0x48] sm:$0xff]  ;;  %v2692_v18 = vld [vmem:[#allocation4 + $0x40] sm:$0xff] }
 0x1a1   : > { %2431 = vst.msk [vmem:[#allocation4 + $0x78] sm:$0xff] %vm874_vm1, %v2411_v29  ;;  %v2705_v35 = vadd.f32 %v7277_v33, %v2685_v36  ;;  %v2585_v46 = vpop.f32.mrb[67].mxu0 }
 0x1a2   : > { %2430 = vst.msk [vmem:[#allocation4 + $0x70] sm:$0xff] %vm874_vm1, %v2410_v31  ;;  %v2704_v6 = vadd.f32 %v2684_v47, %v2585_v46  ;;  %v2393_v51 = vld [vmem:[#allocation4 + $0x88] sm:$0xff]  ;;  %v2695_v46 = vld [vmem:[#allocation4 + $0x58] sm:$0xff] }
 0x1a3   : > { %2725 = vst.msk [vmem:[#allocation4 + $0x8] sm:$0xff] %vm874_vm1, %v2705_v35  ;;  %v2413_v62 = vadd.f32 %v8692_v49, %v2393_v51  ;;  %v2392_v55 = vld [vmem:[#allocation4 + $0x80] sm:$0xff]  ;;  %v8792_v48 = vpop.f32.mrb[70].mxu1  ;;  %v2694_v51 = vld [vmem:[#allocation4 + $0x50] sm:$0xff] }
 0x1a4   : > { %2724 = vst.msk [vmem:[#allocation4] sm:$0xff] %vm874_vm1, %v2704_v6  ;;  %v2412_v15 = vadd.f32 %v2392_v55, %v8696_v53  ;;  %v7280_v57 = vpop.f32.mrb[68].mxu0  ;;  %v8796_v13 = vpop.f32.mrb[71].mxu1 }
 0x1a5   : > { %2433 = vst.msk [vmem:[#allocation4 + $0x88] sm:$0xff] %vm874_vm1, %v2413_v62  ;;  %v2707_v0 = vadd.f32 %v7280_v57, %v2687_v19  ;;  %v2595_v34 = vpop.f32.mrb[69].mxu0  ;;  %v2697_v19 = vld [vmem:[#allocation4 + $0x68] sm:$0xff] }
 0x1a6   : > { %2432 = vst.msk [vmem:[#allocation4 + $0x80] sm:$0xff] %vm874_vm1, %v2412_v15  ;;  %v2706_v39 = vadd.f32 %v2686_v2, %v2595_v34  ;;  %v2395_v4 = vld [vmem:[#allocation4 + $0x98] sm:$0xff]  ;;  %v2696_v2 = vld [vmem:[#allocation4 + $0x60] sm:$0xff] }
 0x1a7   : > { %2727 = vst.msk [vmem:[#allocation4 + $0x18] sm:$0xff] %vm874_vm1, %v2707_v0  ;;  %v2415_v49 = vadd.f32 %v8702_v38, %v2395_v4  ;;  %v2394_v8 = vld [vmem:[#allocation4 + $0x90] sm:$0xff]  ;;  %v8802_v3 = vpop.f32.mrb[72].mxu1 }
 0x1a8   : > { %2726 = vst.msk [vmem:[#allocation4 + $0x10] sm:$0xff] %vm874_vm1, %v2706_v39  ;;  %v2414_v53 = vadd.f32 %v2394_v8, %v8706_v5  ;;  %v7283_v11 = vpop.f32.mrb[70].mxu0  ;;  %v8806_v26 = vpop.f32.mrb[73].mxu1 }
 0x1a9   : > { %2435 = vst.msk [vmem:[#allocation4 + $0x98] sm:$0xff] %vm874_vm1, %v2415_v49  ;;  %v2709_v20 = vadd.f32 %v7283_v11, %v2689_v56  ;;  %v2605_v58 = vpop.f32.mrb[71].mxu0 }
 0x1aa   : > { %2434 = vst.msk [vmem:[#allocation4 + $0x90] sm:$0xff] %vm874_vm1, %v2414_v53  ;;  %v2708_v1 = vadd.f32 %v2688_v22, %v2605_v58  ;;  %v2993_v24 = vld [vmem:[#allocation4 + $0x8] sm:$0xff]  ;;  %v2699_v53 = vld [vmem:[#allocation4 + $0x78] sm:$0xff] }
 0x1ab   : > { %2729 = vst.msk [vmem:[#allocation4 + $0x28] sm:$0xff] %vm874_vm1, %v2709_v20  ;;  %v3013_v38 = vadd.f32 %v8712_v59, %v2993_v24  ;;  %v2992_v28 = vld [vmem:[#allocation4] sm:$0xff]  ;;  %v2698_v20 = vld [vmem:[#allocation4 + $0x70] sm:$0xff] }
 0x1ac   : > { %2728 = vst.msk [vmem:[#allocation4 + $0x20] sm:$0xff] %vm874_vm1, %v2708_v1  ;;  %v3012_v5 = vadd.f32 %v2992_v28, %v8716_v25  ;;  %v7286_v30 = vpop.f32.mrb[72].mxu0 }
 0x1ad   : > { %3033 = vst.msk [vmem:[#allocation4 + $0x8] sm:$0xff] %vm874_vm1, %v3013_v38  ;;  %v2711_v32 = vadd.f32 %v7286_v30, %v2691_v10  ;;  %v2615_v12 = vpop.f32.mrb[73].mxu0  ;;  %v2701_v38 = vld [vmem:[#allocation4 + $0x88] sm:$0xff]  ;;  %v2700_v30 = vld [vmem:[#allocation4 + $0x80] sm:$0xff] }
 0x1ae   : > { %3032 = vst.msk [vmem:[#allocation4] sm:$0xff] %vm874_vm1, %v3012_v5  ;;  %v2710_v21 = vadd.f32 %v2690_v44, %v2615_v12  ;;  %v2995_v50 = vld [vmem:[#allocation4 + $0x18] sm:$0xff] }
 0x1af   : > { %2731 = vst.msk [vmem:[#allocation4 + $0x38] sm:$0xff] %vm874_vm1, %v2711_v32  ;;  %v3015_v59 = vadd.f32 %v8722_v17, %v2995_v50  ;;  %v2994_v23 = vld [vmem:[#allocation4 + $0x10] sm:$0xff] }
 0x1b0   : > { %2730 = vst.msk [vmem:[#allocation4 + $0x30] sm:$0xff] %vm874_vm1, %v2710_v21  ;;  %v3014_v25 = vadd.f32 %v2994_v23, %v8726_v52  ;;  %v7289_v60 = vpop.f32.mrb[74].mxu0  ;;  %v2703_v21 = vld [vmem:[#allocation4 + $0x98] sm:$0xff] }
 0x1b1   : > { %3035 = vst.msk [vmem:[#allocation4 + $0x18] sm:$0xff] %vm874_vm1, %v3015_v59  ;;  %v2713_v9 = vadd.f32 %v7289_v60, %v2693_v41  ;;  %v2625_v29 = vpop.f32.mrb[75].mxu0  ;;  %v2702_v23 = vld [vmem:[#allocation4 + $0x90] sm:$0xff] }
 0x1b2   : > { %3034 = vst.msk [vmem:[#allocation4 + $0x10] sm:$0xff] %vm874_vm1, %v3014_v25  ;;  %v2712_v31 = vadd.f32 %v2692_v18, %v2625_v29  ;;  %v2997_v33 = vld [vmem:[#allocation4 + $0x28] sm:$0xff] }
 0x1b3   : > { %2733 = vst.msk [vmem:[#allocation4 + $0x48] sm:$0xff] %vm874_vm1, %v2713_v9  ;;  %v3017_v17 = vadd.f32 %v8732_v42, %v2997_v33  ;;  %v2996_v36 = vld [vmem:[#allocation4 + $0x20] sm:$0xff] }
 0x1b4   : > { %2732 = vst.msk [vmem:[#allocation4 + $0x40] sm:$0xff] %vm874_vm1, %v2712_v31  ;;  %v3016_v52 = vadd.f32 %v2996_v36, %v8736_v45  ;;  %v7292_v35 = vpop.f32.mrb[76].mxu0  ;;  %v3301_v29 = vld [vmem:[#allocation4 + $0x8] sm:$0xff] }
 0x1b5   : > { %3037 = vst.msk [vmem:[#allocation4 + $0x28] sm:$0xff] %vm874_vm1, %v3017_v17  ;;  %v2715_v47 = vadd.f32 %v7292_v35, %v2695_v46  ;;  %v2635_v6 = vpop.f32.mrb[77].mxu0  ;;  %v3300_v33 = vld [vmem:[#allocation4] sm:$0xff] }
 0x1b6   : > { %3036 = vst.msk [vmem:[#allocation4 + $0x20] sm:$0xff] %vm874_vm1, %v3016_v52  ;;  %v2714_v62 = vadd.f32 %v2694_v51, %v2635_v6  ;;  %v2999_v55 = vld [vmem:[#allocation4 + $0x38] sm:$0xff] }
 0x1b7   : > { %2735 = vst.msk [vmem:[#allocation4 + $0x58] sm:$0xff] %vm874_vm1, %v2715_v47  ;;  %v3019_v42 = vadd.f32 %v8742_v63, %v2999_v55  ;;  %v2998_v15 = vld [vmem:[#allocation4 + $0x30] sm:$0xff] }
 0x1b8   : > { %2734 = vst.msk [vmem:[#allocation4 + $0x50] sm:$0xff] %vm874_vm1, %v2714_v62  ;;  %v3018_v45 = vadd.f32 %v2998_v15, %v8746_v37  ;;  %v7295_v57 = vpop.f32.mrb[78].mxu0  ;;  %v3303_v46 = vld [vmem:[#allocation4 + $0x18] sm:$0xff] }
 0x1b9   : > { %3039 = vst.msk [vmem:[#allocation4 + $0x38] sm:$0xff] %vm874_vm1, %v3019_v42  ;;  %v2717_v0 = vadd.f32 %v7295_v57, %v2697_v19  ;;  %v2645_v34 = vpop.f32.mrb[79].mxu0  ;;  %v3302_v51 = vld [vmem:[#allocation4 + $0x10] sm:$0xff] }
 0x1ba   : > { %3038 = vst.msk [vmem:[#allocation4 + $0x30] sm:$0xff] %vm874_vm1, %v3018_v45  ;;  %v2716_v39 = vadd.f32 %v2696_v2, %v2645_v34  ;;  %v3001_v4 = vld [vmem:[#allocation4 + $0x48] sm:$0xff] }
 0x1bb   : > { %2737 = vst.msk [vmem:[#allocation4 + $0x68] sm:$0xff] %vm874_vm1, %v2717_v0  ;;  %v3021_v63 = vadd.f32 %v8752_v14, %v3001_v4  ;;  %v3000_v49 = vld [vmem:[#allocation4 + $0x40] sm:$0xff] }
 0x1bc   : > { %2736 = vst.msk [vmem:[#allocation4 + $0x60] sm:$0xff] %vm874_vm1, %v2716_v39  ;;  %v3020_v37 = vadd.f32 %v3000_v49, %v8756_v54  ;;  %v7298_v8 = vpop.f32.mrb[80].mxu0  ;;  %v3305_v57 = vld [vmem:[#allocation4 + $0x28] sm:$0xff] }
 0x1bd   : > { %3041 = vst.msk [vmem:[#allocation4 + $0x48] sm:$0xff] %vm874_vm1, %v3021_v63  ;;  %v2719_v11 = vadd.f32 %v7298_v8, %v2699_v53  ;;  %v2655_v56 = vpop.f32.mrb[81].mxu0  ;;  %v3304_v34 = vld [vmem:[#allocation4 + $0x20] sm:$0xff] }
 0x1be   : > { %3040 = vst.msk [vmem:[#allocation4 + $0x40] sm:$0xff] %vm874_vm1, %v3020_v37  ;;  %v2718_v58 = vadd.f32 %v2698_v20, %v2655_v56  ;;  %v3003_v22 = vld [vmem:[#allocation4 + $0x58] sm:$0xff] }
 0x1bf   : > { %2739 = vst.msk [vmem:[#allocation4 + $0x78] sm:$0xff] %vm874_vm1, %v2719_v11  ;;  %v3023_v14 = vadd.f32 %v8762_v27, %v3003_v22  ;;  %v3002_v1 = vld [vmem:[#allocation4 + $0x50] sm:$0xff] }
 0x1c0   : > { %2738 = vst.msk [vmem:[#allocation4 + $0x70] sm:$0xff] %vm874_vm1, %v2718_v58  ;;  %v3022_v54 = vadd.f32 %v3002_v1, %v8766_v16  ;;  %v7301_v24 = vpop.f32.mrb[82].mxu0  ;;  %v3307_v49 = vld [vmem:[#allocation4 + $0x38] sm:$0xff] }
 0x1c1   : > { %3043 = vst.msk [vmem:[#allocation4 + $0x58] sm:$0xff] %vm874_vm1, %v3023_v14  ;;  %v2721_v28 = vadd.f32 %v7301_v24, %v2701_v38  ;;  %v2665_v5 = vpop.f32.mrb[83].mxu0  ;;  %v3306_v11 = vld [vmem:[#allocation4 + $0x30] sm:$0xff] }
 0x1c2   : > { %3042 = vst.msk [vmem:[#allocation4 + $0x50] sm:$0xff] %vm874_vm1, %v3022_v54  ;;  %v2720_v10 = vadd.f32 %v2700_v30, %v2665_v5  ;;  %v3005_v32 = vld [vmem:[#allocation4 + $0x68] sm:$0xff] }
 0x1c3   : > { %2741 = vst.msk [vmem:[#allocation4 + $0x88] sm:$0xff] %vm874_vm1, %v2721_v28  ;;  %v3025_v27 = vadd.f32 %v8772_v43, %v3005_v32  ;;  %v3004_v12 = vld [vmem:[#allocation4 + $0x60] sm:$0xff] }
 0x1c4   : > { %2740 = vst.msk [vmem:[#allocation4 + $0x80] sm:$0xff] %vm874_vm1, %v2720_v10  ;;  %v3024_v16 = vadd.f32 %v3004_v12, %v8776_v40  ;;  %v7304_v44 = vpop.f32.mrb[84].mxu0  ;;  %v3309_v24 = vld [vmem:[#allocation4 + $0x48] sm:$0xff] }
 0x1c5   : > { %3045 = vst.msk [vmem:[#allocation4 + $0x68] sm:$0xff] %vm874_vm1, %v3025_v27  ;;  %v2723_v50 = vadd.f32 %v7304_v44, %v2703_v21  ;;  %v2675_v59 = vpop.f32.mrb[85].mxu0  ;;  %v3308_v30 = vld [vmem:[#allocation4 + $0x40] sm:$0xff] }
 0x1c6   : > { %3044 = vst.msk [vmem:[#allocation4 + $0x60] sm:$0xff] %vm874_vm1, %v3024_v16  ;;  %v2722_v25 = vadd.f32 %v2702_v23, %v2675_v59  ;;  %v3007_v60 = vld [vmem:[#allocation4 + $0x78] sm:$0xff] }
 0x1c7   : > { %2743 = vst.msk [vmem:[#allocation4 + $0x98] sm:$0xff] %vm874_vm1, %v2723_v50  ;;  %v3027_v43 = vadd.f32 %v8782_v7, %v3007_v60  ;;  %v3006_v41 = vld [vmem:[#allocation4 + $0x70] sm:$0xff] }
 0x1c8   : > { %2742 = vst.msk [vmem:[#allocation4 + $0x90] sm:$0xff] %vm874_vm1, %v2722_v25  ;;  %v3026_v40 = vadd.f32 %v3006_v41, %v8786_v61  ;;  %v7345_v9 = vpop.f32.mrb[86].mxu0  ;;  %v3311_v50 = vld [vmem:[#allocation4 + $0x58] sm:$0xff] }
 0x1c9   : > { %3047 = vst.msk [vmem:[#allocation4 + $0x78] sm:$0xff] %vm874_vm1, %v3027_v43  ;;  %v3321_v18 = vadd.f32 %v7345_v9, %v3301_v29  ;;  %v3201_v31 = vpop.f32.mrb[87].mxu0  ;;  %v3310_v60 = vld [vmem:[#allocation4 + $0x50] sm:$0xff] }
 0x1ca   : > { %3046 = vst.msk [vmem:[#allocation4 + $0x70] sm:$0xff] %vm874_vm1, %v3026_v40  ;;  %v3320_v17 = vadd.f32 %v3300_v33, %v3201_v31  ;;  %v3009_v36 = vld [vmem:[#allocation4 + $0x88] sm:$0xff] }
 0x1cb   : > { %3341 = vst.msk [vmem:[#allocation4 + $0x8] sm:$0xff] %vm874_vm1, %v3321_v18  ;;  %v3029_v7 = vadd.f32 %v8792_v48, %v3009_v36  ;;  %v3008_v52 = vld [vmem:[#allocation4 + $0x80] sm:$0xff] }
 0x1cc   : > { %3340 = vst.msk [vmem:[#allocation4] sm:$0xff] %vm874_vm1, %v3320_v17  ;;  %v3028_v61 = vadd.f32 %v3008_v52, %v8796_v13  ;;  %v7348_v35 = vpop.f32.mrb[88].mxu0  ;;  %v8865_v13 = vld [vmem:[%s9802_s4] ss:$0 sm:$0xff]  ;;  %v3313_v33 = vld [vmem:[#allocation4 + $0x68] sm:$0xff] }
 0x1cd   : > { %3049 = vst.msk [vmem:[#allocation4 + $0x88] sm:$0xff] %vm874_vm1, %v3029_v7  ;;  %v3323_v47 = vadd.f32 %v7348_v35, %v3303_v46  ;;  %v3211_v6 = vpop.f32.mrb[89].mxu0  ;;  %v3312_v52 = vld [vmem:[#allocation4 + $0x60] sm:$0xff] }
 0x1ce   : > { %3048 = vst.msk [vmem:[#allocation4 + $0x80] sm:$0xff] %vm874_vm1, %v3028_v61  ;;  %v3322_v62 = vadd.f32 %v3302_v51, %v3211_v6  ;;  %v3011_v55 = vld [vmem:[#allocation4 + $0x98] sm:$0xff] }
 0x1cf   : > { %3343 = vst.msk [vmem:[#allocation4 + $0x18] sm:$0xff] %vm874_vm1, %v3323_v47  ;;  %v3031_v48 = vadd.f32 %v8802_v3, %v3011_v55  ;;  %v3010_v42 = vld [vmem:[#allocation4 + $0x90] sm:$0xff] }
 0x1d0   : > { %3342 = vst.msk [vmem:[#allocation4 + $0x10] sm:$0xff] %vm874_vm1, %v3322_v62  ;;  %v3030_v15 = vadd.f32 %v3010_v42, %v8806_v26  ;;  %v7351_v45 = vpop.f32.mrb[90].mxu0  ;;  %v3315_v55 = vld [vmem:[#allocation4 + $0x78] sm:$0xff] }
 0x1d1   : > { %3051 = vst.msk [vmem:[#allocation4 + $0x98] sm:$0xff] %vm874_vm1, %v3031_v48  ;;  %v3325_v19 = vadd.f32 %v7351_v45, %v3305_v57  ;;  %v3221_v0 = vpop.f32.mrb[91].mxu0  ;;  %v3314_v45 = vld [vmem:[#allocation4 + $0x70] sm:$0xff] }
 0x1d2   : > { %v3361_v2 = vld [vmem:[#allocation4 + $0x8] sm:$0xff]  ;;  %3050 = vst.msk [vmem:[#allocation4 + $0x90] sm:$0xff] %vm874_vm1, %v3030_v15  ;;  %v3324_v3 = vadd.f32 %v3304_v34, %v3221_v0 }
 0x1d3   : > { %v3388_v39 = vadd.f32 %v8865_v13, %v3361_v2  ;;  %v3360_v4 = vld [vmem:[#allocation4] sm:$0xff]  ;;  %3345 = vst.msk [vmem:[#allocation4 + $0x28] sm:$0xff] %vm874_vm1, %v3325_v19 }
 0x1d4   : > { %v3387_v63 = vadd.f32 %v8865_v13, %v3360_v4  ;;  %3344 = vst.msk [vmem:[#allocation4 + $0x20] sm:$0xff] %vm874_vm1, %v3324_v3  ;;  %v7354_v26 = vpop.f32.mrb[92].mxu0  ;;  %v3317_v4 = vld [vmem:[#allocation4 + $0x88] sm:$0xff] }
 0x1d5   : > { %v3408_v37 = vmax.f32 %v3388_v39, 0.0  ;;  %v3327_v8 = vadd.f32 %v7354_v26, %v3307_v49  ;;  %v3231_v53 = vpop.f32.mrb[93].mxu0 }
 0x1d6   : > { %v3407_v56 = vmax.f32 %v3387_v63, 0.0  ;;  %v3363_v20 = vld [vmem:[#allocation4 + $0x18] sm:$0xff]  ;;  %v3326_v58 = vadd.f32 %v3306_v11, %v3231_v53 }
 0x1d7   : > { %3428 = vst.msk [vmem:[#allocation3 + $0x18] sm:$0xff] %vm874_vm1, %v3408_v37  ;;  %v3390_v22 = vadd.f32 %v8865_v13, %v3363_v20  ;;  %v3362_v14 = vld [vmem:[#allocation4 + $0x10] sm:$0xff]  ;;  %3347 = vst.msk [vmem:[#allocation4 + $0x38] sm:$0xff] %vm874_vm1, %v3327_v8  ;;  %v3316_v37 = vld [vmem:[#allocation4 + $0x80] sm:$0xff] }
 0x1d8   : > { %3427 = vst.msk [vmem:[#allocation3 + $0x10] sm:$0xff] %vm874_vm1, %v3407_v56  ;;  %v3389_v1 = vadd.f32 %v8865_v13, %v3362_v14  ;;  %3346 = vst.msk [vmem:[#allocation4 + $0x30] sm:$0xff] %vm874_vm1, %v3326_v58  ;;  %v7357_v54 = vpop.f32.mrb[94].mxu0  ;;  %v3319_v14 = vld [vmem:[#allocation4 + $0x98] sm:$0xff] }
 0x1d9   : > { %v3410_v38 = vmax.f32 %v3390_v22, 0.0  ;;  %v3329_v28 = vadd.f32 %v7357_v54, %v3309_v24  ;;  %v3241_v5 = vpop.f32.mrb[95].mxu0 }
 0x1da   : > { %v3409_v10 = vmax.f32 %v3389_v1, 0.0  ;;  %v3365_v32 = vld [vmem:[#allocation4 + $0x28] sm:$0xff]  ;;  %v3328_v27 = vadd.f32 %v3308_v30, %v3241_v5 }
 0x1db   : > { %3430 = vst.msk [vmem:[#allocation3 + $0x48] sm:$0xff] %vm874_vm1, %v3410_v38  ;;  %v3392_v12 = vadd.f32 %v8865_v13, %v3365_v32  ;;  %v3364_v16 = vld [vmem:[#allocation4 + $0x20] sm:$0xff]  ;;  %3349 = vst.msk [vmem:[#allocation4 + $0x48] sm:$0xff] %vm874_vm1, %v3329_v28  ;;  %v3318_v38 = vld [vmem:[#allocation4 + $0x90] sm:$0xff] }
 0x1dc   : > { %3429 = vst.msk [vmem:[#allocation3 + $0x40] sm:$0xff] %vm874_vm1, %v3409_v10  ;;  %v3391_v44 = vadd.f32 %v8865_v13, %v3364_v16  ;;  %3348 = vst.msk [vmem:[#allocation4 + $0x40] sm:$0xff] %vm874_vm1, %v3328_v27  ;;  %v7360_v21 = vpop.f32.mrb[96].mxu0 }
 0x1dd   : > { %v3412_v59 = vmax.f32 %v3392_v12, 0.0  ;;  %v3331_v23 = vadd.f32 %v7360_v21, %v3311_v50  ;;  %v3251_v25 = vpop.f32.mrb[97].mxu0 }
 0x1de   : > { %v3411_v43 = vmax.f32 %v3391_v44, 0.0  ;;  %v3367_v41 = vld [vmem:[#allocation4 + $0x38] sm:$0xff]  ;;  %v3330_v40 = vadd.f32 %v3310_v60, %v3251_v25 }
 0x1df   : > { %3432 = vst.msk [vmem:[#allocation3 + $0x78] sm:$0xff] %vm874_vm1, %v3412_v59  ;;  %v3394_v9 = vadd.f32 %v8865_v13, %v3367_v41  ;;  %v3366_v29 = vld [vmem:[#allocation4 + $0x30] sm:$0xff]  ;;  %3351 = vst.msk [vmem:[#allocation4 + $0x58] sm:$0xff] %vm874_vm1, %v3331_v23 }
 0x1e0   : > { %3431 = vst.msk [vmem:[#allocation3 + $0x70] sm:$0xff] %vm874_vm1, %v3411_v43  ;;  %v3393_v18 = vadd.f32 %v8865_v13, %v3366_v29  ;;  %3350 = vst.msk [vmem:[#allocation4 + $0x50] sm:$0xff] %vm874_vm1, %v3330_v40  ;;  %v7363_v31 = vpop.f32.mrb[98].mxu0 }
 0x1e1   : > { %v3414_v17 = vmax.f32 %v3394_v9, 0.0  ;;  %v3333_v36 = vadd.f32 %v7363_v31, %v3313_v33  ;;  %v3261_v7 = vpop.f32.mrb[99].mxu0 }
 0x1e2   : > { %v3413_v61 = vmax.f32 %v3393_v18, 0.0  ;;  %v3369_v35 = vld [vmem:[#allocation4 + $0x48] sm:$0xff]  ;;  %v3332_v46 = vadd.f32 %v3312_v52, %v3261_v7  ;;  %v7759_v18 = vmov (!%p6309_p12), 0.0  }
 0x1e3   : > { %3434 = vst.msk [vmem:[#allocation3 + $0xa8] sm:$0xff] %vm874_vm1, %v3414_v17  ;;  %v3396_v47 = vadd.f32 %v8865_v13, %v3369_v35  ;;  %v3368_v6 = vld [vmem:[#allocation4 + $0x40] sm:$0xff]  ;;  %3353 = vst.msk [vmem:[#allocation4 + $0x68] sm:$0xff] %vm874_vm1, %v3333_v36 }
 0x1e4   : > { %3433 = vst.msk [vmem:[#allocation3 + $0xa0] sm:$0xff] %vm874_vm1, %v3413_v61  ;;  %v3395_v51 = vadd.f32 %v8865_v13, %v3368_v6  ;;  %3352 = vst.msk [vmem:[#allocation4 + $0x60] sm:$0xff] %vm874_vm1, %v3332_v46  ;;  %v7366_v62 = vpop.f32.mrb[100].mxu0 }
 0x1e5   : > { %v3416_v48 = vmax.f32 %v3396_v47, 0.0  ;;  %v3335_v42 = vadd.f32 %v7366_v62, %v3315_v55  ;;  %v3271_v15 = vpop.f32.mrb[101].mxu0  ;;  %3471 = vst.msk [vmem:[#allocation3 + $0x8] sm:$0xff] (!%p6309_p12), %vm874_vm1, %v7759_v18  ;;  %3472 = vst.msk [vmem:[#allocation3 + $0x10] sm:$0xff] (!%p6309_p12), %vm874_vm1, %v7759_v18 }
 0x1e6   : > { %v3415_v57 = vmax.f32 %v3395_v51, 0.0  ;;  %v3371_v19 = vld [vmem:[#allocation4 + $0x58] sm:$0xff]  ;;  %v3334_v0 = vadd.f32 %v3314_v45, %v3271_v15  ;;  %3473 = vst.msk [vmem:[#allocation3 + $0x18] sm:$0xff] (!%p6309_p12), %vm874_vm1, %v7759_v18  ;;  %3474 = vst.msk [vmem:[#allocation3 + $0x20] sm:$0xff] (!%p6309_p12), %vm874_vm1, %v7759_v18 }
 0x1e7   : > { %3436 = vst.msk [vmem:[#allocation3 + $0xd8] sm:$0xff] %vm874_vm1, %v3416_v48  ;;  %v3398_v34 = vadd.f32 %v8865_v13, %v3371_v19  ;;  %v3370_v2 = vld [vmem:[#allocation4 + $0x50] sm:$0xff]  ;;  %3355 = vst.msk [vmem:[#allocation4 + $0x78] sm:$0xff] %vm874_vm1, %v3335_v42 }
 0x1e8   : > { %3435 = vst.msk [vmem:[#allocation3 + $0xd0] sm:$0xff] %vm874_vm1, %v3415_v57  ;;  %v3397_v3 = vadd.f32 %v8865_v13, %v3370_v2  ;;  %3354 = vst.msk [vmem:[#allocation4 + $0x70] sm:$0xff] %vm874_vm1, %v3334_v0  ;;  %v7369_v39 = vpop.f32.mrb[102].mxu0 }
 0x1e9   : > { %v3418_v63 = vmax.f32 %v3398_v34, 0.0  ;;  %v3337_v26 = vadd.f32 %v7369_v39, %v3317_v4  ;;  %v3281_v49 = vpop.f32.mrb[103].mxu0 }
 0x1ea   : > { %v3417_v8 = vmax.f32 %v3397_v3, 0.0  ;;  %v3373_v53 = vld [vmem:[#allocation4 + $0x68] sm:$0xff]  ;;  %v3336_v11 = vadd.f32 %v3316_v37, %v3281_v49 }
 0x1eb   : > { %3438 = vst.msk [vmem:[#allocation3 + $0x108] sm:$0xff] %vm874_vm1, %v3418_v63  ;;  %v3400_v56 = vadd.f32 %v8865_v13, %v3373_v53  ;;  %v3372_v20 = vld [vmem:[#allocation4 + $0x60] sm:$0xff]  ;;  %3357 = vst.msk [vmem:[#allocation4 + $0x88] sm:$0xff] %vm874_vm1, %v3337_v26 }
 0x1ec   : > { %3437 = vst.msk [vmem:[#allocation3 + $0x100] sm:$0xff] %vm874_vm1, %v3417_v8  ;;  %v3399_v58 = vadd.f32 %v8865_v13, %v3372_v20  ;;  %3356 = vst.msk [vmem:[#allocation4 + $0x80] sm:$0xff] %vm874_vm1, %v3336_v11  ;;  %v7372_v22 = vpop.f32.mrb[104].mxu0 }
 0x1ed   : > { %v3420_v1 = vmax.f32 %v3400_v56, 0.0  ;;  %v3339_v54 = vadd.f32 %v7372_v22, %v3319_v14  ;;  %v3291_v24 = vpop.f32.mrb[105].mxu0 }
 0x1ee   : > { %v3419_v28 = vmax.f32 %v3399_v58, 0.0  ;;  %v3375_v5 = vld [vmem:[#allocation4 + $0x78] sm:$0xff]  ;;  %v3338_v30 = vadd.f32 %v3318_v38, %v3291_v24 }
 0x1ef   : > { %3440 = vst.msk [vmem:[#allocation3 + $0x138] sm:$0xff] %vm874_vm1, %v3420_v1  ;;  %v3402_v10 = vadd.f32 %v8865_v13, %v3375_v5  ;;  %v3374_v32 = vld [vmem:[#allocation4 + $0x70] sm:$0xff]  ;;  %3359 = vst.msk [vmem:[#allocation4 + $0x98] sm:$0xff] %vm874_vm1, %v3339_v54 }
 0x1f0   : > { %3439 = vst.msk [vmem:[#allocation3 + $0x130] sm:$0xff] %vm874_vm1, %v3419_v28  ;;  %v3401_v27 = vadd.f32 %v8865_v13, %v3374_v32  ;;  %3358 = vst.msk [vmem:[#allocation4 + $0x90] sm:$0xff] %vm874_vm1, %v3338_v30 }
 0x1f1   : > { %v3422_v12 = vmax.f32 %v3402_v10, 0.0 }
 0x1f2   : > { %v3421_v16 = vmax.f32 %v3401_v27, 0.0  ;;  %v3377_v44 = vld [vmem:[#allocation4 + $0x88] sm:$0xff] }
 0x1f3   : > { %3442 = vst.msk [vmem:[#allocation3 + $0x168] sm:$0xff] %vm874_vm1, %v3422_v12  ;;  %v3404_v21 = vadd.f32 %v8865_v13, %v3377_v44  ;;  %v3376_v50 = vld [vmem:[#allocation4 + $0x80] sm:$0xff] }
 0x1f4   : > { %3441 = vst.msk [vmem:[#allocation3 + $0x160] sm:$0xff] %vm874_vm1, %v3421_v16  ;;  %v3403_v59 = vadd.f32 %v8865_v13, %v3376_v50 }
 0x1f5   : > { %v3424_v23 = vmax.f32 %v3404_v21, 0.0 }
 0x1f6   : > { %v3423_v25 = vmax.f32 %v3403_v59, 0.0  ;;  %v3379_v60 = vld [vmem:[#allocation4 + $0x98] sm:$0xff]  ;;  %3469 = sbr.rel (%p6309_p12) target bundleno = 509 (0x1fd), region = 76 }
 0x1f7   : > { %3444 = vst.msk [vmem:[#allocation3 + $0x198] sm:$0xff] %vm874_vm1, %v3424_v23  ;;  %v3406_v43 = vadd.f32 %v8865_v13, %v3379_v60  ;;  %v3378_v41 = vld [vmem:[#allocation4 + $0x90] sm:$0xff] }
 0x1f8   : > { %3443 = vst.msk [vmem:[#allocation3 + $0x190] sm:$0xff] %vm874_vm1, %v3423_v25  ;;  %v3405_v40 = vadd.f32 %v8865_v13, %v3378_v41 }
 0x1f9   : > { %v3426_v9 = vmax.f32 %v3406_v43, 0.0 }
 0x1fa   : > { %v3425_v29 = vmax.f32 %v3405_v40, 0.0 }
 0x1fb   : > { %3446 = vst.msk [vmem:[#allocation3 + $0x1c8] sm:$0xff] %vm874_vm1, %v3426_v9 }
 0x1fc   : > { %3445 = vst.msk [vmem:[#allocation3 + $0x1c0] sm:$0xff] %vm874_vm1, %v3425_v29 }
 0x1fd PF: > { %3478 = sbr.rel (%p6311_p0) target bundleno = 516 (0x204), region = 80  ;;  %v7760_v13 = vmov (!%p6311_p0), 0.0  }
 0x1fe   : > { %3481 = vst.msk [vmem:[#allocation3 + $0x1b8] sm:$0xff] (!%p6311_p0), %vm874_vm1, %v7760_v13  ;;  %3482 = vst.msk [vmem:[#allocation3 + $0x1c0] sm:$0xff] (!%p6311_p0), %vm874_vm1, %v7760_v13 }
 0x1ff   : > { %3483 = vst.msk [vmem:[#allocation3 + $0x1c8] sm:$0xff] (!%p6311_p0), %vm874_vm1, %v7760_v13  ;;  %3484 = vst.msk [vmem:[#allocation3 + $0x1d0] sm:$0xff] (!%p6311_p0), %vm874_vm1, %v7760_v13 }
 0x204 PF: > { %v3502_v31 = vld [vmem:[%s9803_s5] sm:$0xf]  ;;  %vm3551_vm2 = vcmask 1043456   ;;  %v3486_v33 = vld [vmem:[#allocation3 + $0xf] sm:$0xff]  ;;  %v3487_v17 = vld [vmem:[#allocation3 + $0x17] sm:$0xff] }
 0x205   : > { %7373 = vmatprep.subr.msk.mxu1 %vm3551_vm2, %v3502_v31  ;;  %7375 = vmatprep.mubr.msk.f32.mxu1 %vm874_vm1, %v3486_v33  ;;  %v6528_v36 = vld [vmem:[%s9803_s5 + $0x4] sm:$0xf]  ;;  %v8957_v61 = vld [vmem:[#allocation3 + $0x6f] sm:$0xff]  ;;  %v8970_v46 = vld [vmem:[#allocation3 + $0x77] sm:$0xff] }
 0x206   : > { %v8947_v7 = vld [vmem:[#allocation3 + $0x3f] sm:$0xff]  ;;  %7374 = vmatpush3.msk.msra.mxu1 %vm3551_vm2, %v3502_v31  ;;  %v8955_v52 = vld [vmem:[#allocation3 + $0x47] sm:$0xff]  ;;  %v3978_v6 = vld [vmem:[#allocation3 + $0x11] sm:$0xff] }
 0x207   : > { %7376 = vmatmul.mubr.msk.f32.vlgmr.msra.gmra.mrb[74].mxu1 %vm874_vm1, %v3487_v17  ;;  %7399 = vmatprep.subr.msk.mxu1 %vm3551_vm2, %v6528_v36  ;;  %v8962_v35 = vld [vmem:[%s9803_s5 + $0xc] sm:$0xf]  ;;  %v6546_v47 = vld [vmem:[%s9803_s5 + $0x8] sm:$0xf]  ;;  %v8975_v51 = vld [vmem:[#allocation3 + $0x9f] sm:$0xff] }
 0x208   : > { %7400 = vmatpush3.msk.msra.mxu1 %vm3551_vm2, %v6528_v36  ;;  %7378 = vmatprep.mubr.msk.f32.mxu1 %vm874_vm1, %v8947_v7  ;;  %v3979_v62 = vld [vmem:[#allocation3 + $0x19] sm:$0xff]  ;;  %v6582_v55 = vld [vmem:[%s9803_s5 + $0x10] sm:$0xf]  ;;  %v8983_v48 = vld [vmem:[#allocation3 + $0x41] sm:$0xff] }
 0x209   : > { %7451 = vmatprep.subr.msk.mxu1 %vm3551_vm2, %v8962_v35  ;;  %7425 = vmatprep.subr.msk.mxu0 %vm3551_vm2, %v6546_v47  ;;  %v8990_v42 = vld [vmem:[#allocation3 + $0xa7] sm:$0xff]  ;;  %v8995_v45 = vld [vmem:[#allocation3 + $0xcf] sm:$0xff]  ;;  %v9008_v19 = vld [vmem:[#allocation3 + $0xd7] sm:$0xff] }
 0x20a   : > { %7427 = vmatprep.mubr.msk.f32.mxu0 %vm874_vm1, %v3978_v6  ;;  %7426 = vmatpush3.msk.msra.mxu0 %vm3551_vm2, %v6546_v47  ;;  %v8993_v15 = vld [vmem:[#allocation3 + $0x49] sm:$0xff]  ;;  %v9000_v57 = vld [vmem:[#allocation3 + $0x71] sm:$0xff]  ;;  %v9012_v0 = vld [vmem:[#allocation3 + $0x79] sm:$0xff] }
 0x20b   : > { %7379 = vmatmul.mubr.msk.f32.gmra.mrb[76].mxu1 %vm874_vm1, %v8955_v52  ;;  %7428 = vmatmul.mubr.msk.f32.vlgmr.msra.gmra.mrb[106].mxu0 %vm874_vm1, %v3979_v62  ;;  %v9014_v34 = vld [vmem:[#allocation3 + $0xff] sm:$0xff]  ;;  %v6618_v3 = vld [vmem:[%s9803_s5 + $0x18] sm:$0xf]  ;;  %v9027_v39 = vld [vmem:[#allocation3 + $0x107] sm:$0xff] }
 0x20c   : > { %7381 = vmatprep.mubr.msk.f32.mxu1 %vm874_vm1, %v8957_v61  ;;  %7477 = vmatprep.subr.msk.mxu0 %vm3551_vm2, %v6582_v55  ;;  %v9016_v2 = vld [vmem:[#allocation3 + $0xa1] sm:$0xff]  ;;  %v9031_v4 = vld [vmem:[#allocation3 + $0xa9] sm:$0xff]  ;;  %v9035_v26 = vld [vmem:[#allocation3 + $0xd1] sm:$0xff] }
 0x20d   : > { %7478 = vmatpush3.msk.msra.mxu0 %vm3551_vm2, %v6582_v55  ;;  %7430 = vmatprep.mubr.msk.f32.mxu0 %vm874_vm1, %v8983_v48  ;;  %v9033_v63 = vld [vmem:[#allocation3 + $0x12f] sm:$0xff]  ;;  %v9044_v49 = vld [vmem:[#allocation3 + $0x137] sm:$0xff]  ;;  %v9050_v8 = vld [vmem:[#allocation3 + $0x15f] sm:$0xff] }
 0x20e   : > { %7529 = vmatprep.subr.msk.mxu0 %vm3551_vm2, %v6618_v3  ;;  %v9048_v37 = vld [vmem:[#allocation3 + $0xd9] sm:$0xff]  ;;  %v9052_v53 = vld [vmem:[#allocation3 + $0x101] sm:$0xff]  ;;  %v9064_v56 = vld [vmem:[#allocation3 + $0x109] sm:$0xff] }
 0x20f   : > { %7382 = vmatmul.mubr.msk.f32.gmra.mrb[78].mxu1 %vm874_vm1, %v8970_v46  ;;  %7431 = vmatmul.mubr.msk.f32.gmra.mrb[108].mxu0 %vm874_vm1, %v8993_v15  ;;  %v9060_v11 = vld [vmem:[#allocation3 + $0x167] sm:$0xff]  ;;  %v3716_v20 = vld [vmem:[#allocation3 + $0x10] sm:$0xff]  ;;  %v3717_v22 = vld [vmem:[#allocation3 + $0x18] sm:$0xff] }
 0x210   : > { %7384 = vmatprep.mubr.msk.f32.mxu1 %vm874_vm1, %v8975_v51  ;;  %7433 = vmatprep.mubr.msk.f32.mxu0 %vm874_vm1, %v9000_v57  ;;  %v9066_v58 = vld [vmem:[#allocation3 + $0x131] sm:$0xff]  ;;  %v9075_v14 = vld [vmem:[#allocation3 + $0x139] sm:$0xff]  ;;  %v9080_v24 = vld [vmem:[#allocation3 + $0x161] sm:$0xff] }
 0x211   : > { %v3718_v1 = vld [vmem:[#allocation3 + $0x40] sm:$0xff]  ;;  %v6600_v54 = vld [vmem:[%s9803_s5 + $0x14] sm:$0xf]  ;;  %v3719_v38 = vld [vmem:[#allocation3 + $0x48] sm:$0xff] }
 0x212   : > { %v9088_v28 = vld [vmem:[#allocation3 + $0x169] sm:$0xff]  ;;  %v9100_v30 = vld [vmem:[#allocation3 + $0x78] sm:$0xff]  ;;  %v9103_v10 = vld [vmem:[#allocation3 + $0xa0] sm:$0xff] }
 0x213   : > { %7385 = vmatmul.mubr.msk.f32.gmra.mrb[80].mxu1 %vm874_vm1, %v8990_v42  ;;  %7434 = vmatmul.mubr.msk.f32.gmra.mrb[110].mxu0 %vm874_vm1, %v9012_v0  ;;  %v9090_v5 = vld [vmem:[#allocation3 + $0x70] sm:$0xff]  ;;  %v6654_v32 = vld [vmem:[%s9803_s5 + $0x20] sm:$0xf]  ;;  %v9113_v27 = vld [vmem:[#allocation3 + $0xa8] sm:$0xff] }
 0x214   : > { %7387 = vmatprep.mubr.msk.f32.mxu1 %vm874_vm1, %v8995_v45  ;;  %7436 = vmatprep.mubr.msk.f32.mxu0 %vm874_vm1, %v9016_v2  ;;  %v9116_v12 = vld [vmem:[#allocation3 + $0xd0] sm:$0xff]  ;;  %v9127_v16 = vld [vmem:[#allocation3 + $0xd8] sm:$0xff]  ;;  %v9131_v44 = vld [vmem:[#allocation3 + $0x100] sm:$0xff] }
 0x215   : > { %v9139_v21 = vld [vmem:[#allocation3 + $0x108] sm:$0xff]  ;;  %v9143_v50 = vld [vmem:[#allocation3 + $0x130] sm:$0xff]  ;;  %v9151_v59 = vld [vmem:[#allocation3 + $0x138] sm:$0xff] }
 0x216   : > { %v9155_v23 = vld [vmem:[#allocation3 + $0x160] sm:$0xff]  ;;  %v9163_v25 = vld [vmem:[#allocation3 + $0x168] sm:$0xff]  ;;  %v6636_v60 = vld [vmem:[%s9803_s5 + $0x1c] sm:$0xf] }
 0x217   : > { %7388 = vmatmul.mubr.msk.f32.gmra.mrb[82].mxu1 %vm874_vm1, %v9008_v19  ;;  %7437 = vmatmul.mubr.msk.f32.gmra.mrb[112].mxu0 %vm874_vm1, %v9031_v4  ;;  %v9178_v43 = vld [vmem:[#allocation3 + $0x190] sm:$0xff]  ;;  %v9187_v41 = vld [vmem:[#allocation3 + $0x198] sm:$0xff]  ;;  %v5043_v18 = vld [vmem:[#allocation3 + $0x1c7] sm:$0xff] }
 0x218   : > { %7390 = vmatprep.mubr.msk.f32.mxu1 %vm874_vm1, %v9014_v34  ;;  %7439 = vmatprep.mubr.msk.f32.mxu0 %vm874_vm1, %v9035_v26  ;;  %v4255_v40 = vld [vmem:[#allocation3 + $0x18f] sm:$0xff]  ;;  %v4256_v9 = vld [vmem:[#allocation3 + $0x197] sm:$0xff]  ;;  %v5042_v29 = vld [vmem:[#allocation3 + $0x1bf] sm:$0xff] }
 0x219   : > { %v4779_v13 = vld [vmem:[#allocation3 + $0x191] sm:$0xff]  ;;  %v4780_v31 = vld [vmem:[#allocation3 + $0x199] sm:$0xff]  ;;  %v5566_v33 = vld [vmem:[#allocation3 + $0x1c1] sm:$0xff] }
 0x21a   : > { %v5567_v17 = vld [vmem:[#allocation3 + $0x1c9] sm:$0xff]  ;;  %v5304_v36 = vld [vmem:[#allocation3 + $0x1c0] sm:$0xff] }
 0x21b   : > { %7391 = vmatmul.mubr.msk.f32.gmra.mrb[84].mxu1 %vm874_vm1, %v9027_v39  ;;  %7440 = vmatmul.mubr.msk.f32.gmra.mrb[114].mxu0 %vm874_vm1, %v9048_v37 }
 0x21c   : > { %7393 = vmatprep.mubr.msk.f32.mxu1 %vm874_vm1, %v9033_v63  ;;  %7442 = vmatprep.mubr.msk.f32.mxu0 %vm874_vm1, %v9052_v53 }
 0x21f   : > { %7394 = vmatmul.mubr.msk.f32.gmra.mrb[86].mxu1 %vm874_vm1, %v9044_v49  ;;  %7443 = vmatmul.mubr.msk.f32.gmra.mrb[116].mxu0 %vm874_vm1, %v9064_v56 }
 0x220   : > { %7396 = vmatprep.mubr.msk.f32.mxu1 %vm874_vm1, %v9050_v8  ;;  %7445 = vmatprep.mubr.msk.f32.mxu0 %vm874_vm1, %v9066_v58 }
 0x223   : > { %7397 = vmatmul.mubr.msk.f32.gmra.mrb[88].mxu1 %vm874_vm1, %v9060_v11  ;;  %7446 = vmatmul.mubr.msk.f32.gmra.mrb[118].mxu0 %vm874_vm1, %v9075_v14 }
 0x224   : > { %7401 = vmatprep.mubr.msk.f32.mxu1 %vm874_vm1, %v3716_v20  ;;  %7448 = vmatprep.mubr.msk.f32.mxu0 %vm874_vm1, %v9080_v24 }
 0x227   : > { %7402 = vmatmul.mubr.msk.f32.vlgmr.msra.gmra.mrb[90].mxu1 %vm874_vm1, %v3717_v22  ;;  %7449 = vmatmul.mubr.msk.f32.gmra.mrb[120].mxu0 %vm874_vm1, %v9088_v28 }
 0x228   : > { %7452 = vmatpush3.msk.msra.mxu1 %vm3551_vm2, %v8962_v35  ;;  %7404 = vmatprep.mubr.msk.f32.mxu1 %vm874_vm1, %v3718_v1 }
 0x229   : > { %7503 = vmatprep.subr.msk.mxu1 %vm3551_vm2, %v6600_v54  ;;  %7479 = vmatprep.mubr.msk.f32.mxu0 %vm874_vm1, %v3718_v1 }
 0x22b   : > { %7405 = vmatmul.mubr.msk.f32.gmra.mrb[92].mxu1 %vm874_vm1, %v3719_v38  ;;  %7480 = vmatmul.mubr.msk.f32.vlgmr.msra.gmra.mrb[122].mxu0 %vm874_vm1, %v3719_v38 }
 0x22c   : > { %7407 = vmatprep.mubr.msk.f32.mxu1 %vm874_vm1, %v9090_v5  ;;  %7530 = vmatpush3.msk.msra.mxu0 %vm3551_vm2, %v6618_v3 }
 0x22d   : > { %7482 = vmatprep.mubr.msk.f32.mxu0 %vm874_vm1, %v9090_v5  ;;  %7581 = vmatprep.subr.msk.mxu0 %vm3551_vm2, %v6654_v32 }
 0x22f   : > { %7408 = vmatmul.mubr.msk.f32.gmra.mrb[94].mxu1 %vm874_vm1, %v9100_v30  ;;  %7483 = vmatmul.mubr.msk.f32.gmra.mrb[124].mxu0 %vm874_vm1, %v9100_v30 }
 0x230   : > { %7410 = vmatprep.mubr.msk.f32.mxu1 %vm874_vm1, %v9103_v10  ;;  %7485 = vmatprep.mubr.msk.f32.mxu0 %vm874_vm1, %v9103_v10 }
 0x233   : > { %7411 = vmatmul.mubr.msk.f32.gmra.mrb[96].mxu1 %vm874_vm1, %v9113_v27  ;;  %7486 = vmatmul.mubr.msk.f32.gmra.mrb[126].mxu0 %vm874_vm1, %v9113_v27 }
 0x234   : > { %7413 = vmatprep.mubr.msk.f32.mxu1 %vm874_vm1, %v9116_v12  ;;  %7488 = vmatprep.mubr.msk.f32.mxu0 %vm874_vm1, %v9116_v12 }
 0x237   : > { %7414 = vmatmul.mubr.msk.f32.gmra.mrb[98].mxu1 %vm874_vm1, %v9127_v16  ;;  %7489 = vmatmul.mubr.msk.f32.gmra.mrb[128].mxu0 %vm874_vm1, %v9127_v16 }
 0x238   : > { %7416 = vmatprep.mubr.msk.f32.mxu1 %vm874_vm1, %v9131_v44  ;;  %7491 = vmatprep.mubr.msk.f32.mxu0 %vm874_vm1, %v9131_v44 }
 0x23b   : > { %7417 = vmatmul.mubr.msk.f32.gmra.mrb[100].mxu1 %vm874_vm1, %v9139_v21  ;;  %7492 = vmatmul.mubr.msk.f32.gmra.mrb[130].mxu0 %vm874_vm1, %v9139_v21 }
 0x23c   : > { %7419 = vmatprep.mubr.msk.f32.mxu1 %vm874_vm1, %v9143_v50  ;;  %7494 = vmatprep.mubr.msk.f32.mxu0 %vm874_vm1, %v9143_v50 }
 0x23f   : > { %7420 = vmatmul.mubr.msk.f32.gmra.mrb[102].mxu1 %vm874_vm1, %v9151_v59  ;;  %7495 = vmatmul.mubr.msk.f32.gmra.mrb[132].mxu0 %vm874_vm1, %v9151_v59 }
 0x240   : > { %7422 = vmatprep.mubr.msk.f32.mxu1 %vm874_vm1, %v9155_v23  ;;  %7497 = vmatprep.mubr.msk.f32.mxu0 %vm874_vm1, %v9155_v23 }
 0x243   : > { %7423 = vmatmul.mubr.msk.f32.gmra.mrb[104].mxu1 %vm874_vm1, %v9163_v25  ;;  %7498 = vmatmul.mubr.msk.f32.gmra.mrb[134].mxu0 %vm874_vm1, %v9163_v25 }
 0x244   : > { %7453 = vmatprep.mubr.msk.f32.mxu1 %vm874_vm1, %v8947_v7  ;;  %7500 = vmatprep.mubr.msk.f32.mxu0 %vm874_vm1, %v9178_v43  ;;  %v5305_v7 = vld [vmem:[#allocation3 + $0x1c8] sm:$0xff] }
 0x247   : > { %7454 = vmatmul.mubr.msk.f32.vlgmr.msra.gmra.mrb[106].mxu1 %vm874_vm1, %v8955_v52  ;;  %7501 = vmatmul.mubr.msk.f32.gmra.mrb[136].mxu0 %vm874_vm1, %v9187_v41  ;;  %v5869_v52 = vld [vmem:[%s9805_s7] sm:$0xf] }
 0x248   : > { %7504 = vmatpush3.msk.msra.mxu1 %vm3551_vm2, %v6600_v54  ;;  %7456 = vmatprep.mubr.msk.f32.mxu1 %vm874_vm1, %v8957_v61 }
 0x249   : > { %7555 = vmatprep.subr.msk.mxu1 %vm3551_vm2, %v6636_v60  ;;  %7531 = vmatprep.mubr.msk.f32.mxu0 %vm874_vm1, %v8957_v61 }
 0x24b   : > { %7457 = vmatmul.mubr.msk.f32.gmra.mrb[108].mxu1 %vm874_vm1, %v8970_v46  ;;  %7532 = vmatmul.mubr.msk.f32.vlgmr.msra.gmra.mrb[138].mxu0 %vm874_vm1, %v8970_v46 }
 0x24c   : > { %7459 = vmatprep.mubr.msk.f32.mxu1 %vm874_vm1, %v8975_v51  ;;  %7582 = vmatpush3.msk.msra.mxu0 %vm3551_vm2, %v6654_v32 }
 0x24d   : > { %7534 = vmatprep.mubr.msk.f32.mxu0 %vm874_vm1, %v8975_v51 }
 0x24f   : > { %7460 = vmatmul.mubr.msk.f32.gmra.mrb[110].mxu1 %vm874_vm1, %v8990_v42  ;;  %7535 = vmatmul.mubr.msk.f32.gmra.mrb[140].mxu0 %vm874_vm1, %v8990_v42 }
 0x250   : > { %7462 = vmatprep.mubr.msk.f32.mxu1 %vm874_vm1, %v8995_v45  ;;  %7537 = vmatprep.mubr.msk.f32.mxu0 %vm874_vm1, %v8995_v45 }
 0x253   : > { %7463 = vmatmul.mubr.msk.f32.gmra.mrb[112].mxu1 %vm874_vm1, %v9008_v19  ;;  %7538 = vmatmul.mubr.msk.f32.gmra.mrb[142].mxu0 %vm874_vm1, %v9008_v19 }
 0x254   : > { %7465 = vmatprep.mubr.msk.f32.mxu1 %vm874_vm1, %v9014_v34  ;;  %7540 = vmatprep.mubr.msk.f32.mxu0 %vm874_vm1, %v9014_v34 }
 0x257   : > { %7466 = vmatmul.mubr.msk.f32.gmra.mrb[114].mxu1 %vm874_vm1, %v9027_v39  ;;  %7541 = vmatmul.mubr.msk.f32.gmra.mrb[144].mxu0 %vm874_vm1, %v9027_v39 }
 0x258   : > { %7468 = vmatprep.mubr.msk.f32.mxu1 %vm874_vm1, %v9033_v63  ;;  %7543 = vmatprep.mubr.msk.f32.mxu0 %vm874_vm1, %v9033_v63 }
 0x25b   : > { %7469 = vmatmul.mubr.msk.f32.gmra.mrb[116].mxu1 %vm874_vm1, %v9044_v49  ;;  %7544 = vmatmul.mubr.msk.f32.gmra.mrb[146].mxu0 %vm874_vm1, %v9044_v49 }
 0x25c   : > { %7471 = vmatprep.mubr.msk.f32.mxu1 %vm874_vm1, %v9050_v8  ;;  %7546 = vmatprep.mubr.msk.f32.mxu0 %vm874_vm1, %v9050_v8 }
 0x25f   : > { %7472 = vmatmul.mubr.msk.f32.gmra.mrb[118].mxu1 %vm874_vm1, %v9060_v11  ;;  %7547 = vmatmul.mubr.msk.f32.gmra.mrb[148].mxu0 %vm874_vm1, %v9060_v11 }
 0x260   : > { %7474 = vmatprep.mubr.msk.f32.mxu1 %vm874_vm1, %v4255_v40  ;;  %7549 = vmatprep.mubr.msk.f32.mxu0 %vm874_vm1, %v4255_v40 }
 0x263   : > { %7475 = vmatmul.mubr.msk.f32.gmra.mrb[120].mxu1 %vm874_vm1, %v4256_v9  ;;  %7550 = vmatmul.mubr.msk.f32.gmra.mrb[150].mxu0 %vm874_vm1, %v4256_v9 }
 0x264   : > { %7505 = vmatprep.mubr.msk.f32.mxu1 %vm874_vm1, %v8983_v48  ;;  %7552 = vmatprep.mubr.msk.f32.mxu0 %vm874_vm1, %v5042_v29 }
 0x267   : > { %7506 = vmatmul.mubr.msk.f32.vlgmr.msra.gmra.mrb[122].mxu1 %vm874_vm1, %v8993_v15  ;;  %7553 = vmatmul.mubr.msk.f32.gmra.mrb[152].mxu0 %vm874_vm1, %v5043_v18 }
 0x268   : > { %7556 = vmatpush3.msk.msra.mxu1 %vm3551_vm2, %v6636_v60  ;;  %7508 = vmatprep.mubr.msk.f32.mxu1 %vm874_vm1, %v9000_v57 }
 0x269   : > { %7583 = vmatprep.mubr.msk.f32.mxu0 %vm874_vm1, %v9000_v57  ;;  %7607 = vmatprep.subr.msk.mxu1 %vm3551_vm2, %v5869_v52 }
 0x26b   : > { %7509 = vmatmul.mubr.msk.f32.gmra.mrb[124].mxu1 %vm874_vm1, %v9012_v0  ;;  %7584 = vmatmul.mubr.msk.f32.vlgmr.msra.gmra.mrb[154].mxu0 %vm874_vm1, %v9012_v0 }
 0x26c   : > { %7511 = vmatprep.mubr.msk.f32.mxu1 %vm874_vm1, %v9016_v2  ;;  %7586 = vmatprep.mubr.msk.f32.mxu0 %vm874_vm1, %v9016_v2 }
 0x26f   : > { %7512 = vmatmul.mubr.msk.f32.gmra.mrb[126].mxu1 %vm874_vm1, %v9031_v4  ;;  %7587 = vmatmul.mubr.msk.f32.gmra.mrb[156].mxu0 %vm874_vm1, %v9031_v4 }
 0x270   : > { %7514 = vmatprep.mubr.msk.f32.mxu1 %vm874_vm1, %v9035_v26  ;;  %7589 = vmatprep.mubr.msk.f32.mxu0 %vm874_vm1, %v9035_v26 }
 0x273   : > { %7515 = vmatmul.mubr.msk.f32.gmra.mrb[128].mxu1 %vm874_vm1, %v9048_v37  ;;  %7590 = vmatmul.mubr.msk.f32.gmra.mrb[158].mxu0 %vm874_vm1, %v9048_v37 }
 0x274   : > { %7517 = vmatprep.mubr.msk.f32.mxu1 %vm874_vm1, %v9052_v53  ;;  %7592 = vmatprep.mubr.msk.f32.mxu0 %vm874_vm1, %v9052_v53 }
 0x277   : > { %7518 = vmatmul.mubr.msk.f32.gmra.mrb[130].mxu1 %vm874_vm1, %v9064_v56  ;;  %7593 = vmatmul.mubr.msk.f32.gmra.mrb[160].mxu0 %vm874_vm1, %v9064_v56 }
 0x278   : > { %7520 = vmatprep.mubr.msk.f32.mxu1 %vm874_vm1, %v9066_v58  ;;  %7595 = vmatprep.mubr.msk.f32.mxu0 %vm874_vm1, %v9066_v58 }
 0x27b   : > { %7521 = vmatmul.mubr.msk.f32.gmra.mrb[132].mxu1 %vm874_vm1, %v9075_v14  ;;  %7596 = vmatmul.mubr.msk.f32.gmra.mrb[162].mxu0 %vm874_vm1, %v9075_v14 }
 0x27c   : > { %7523 = vmatprep.mubr.msk.f32.mxu1 %vm874_vm1, %v9080_v24  ;;  %7598 = vmatprep.mubr.msk.f32.mxu0 %vm874_vm1, %v9080_v24 }
 0x27f   : > { %7524 = vmatmul.mubr.msk.f32.gmra.mrb[134].mxu1 %vm874_vm1, %v9088_v28  ;;  %7599 = vmatmul.mubr.msk.f32.gmra.mrb[164].mxu0 %vm874_vm1, %v9088_v28 }
 0x280   : > { %7526 = vmatprep.mubr.msk.f32.mxu1 %vm874_vm1, %v4779_v13  ;;  %7601 = vmatprep.mubr.msk.f32.mxu0 %vm874_vm1, %v4779_v13 }
 0x283   : > { %7527 = vmatmul.mubr.msk.f32.gmra.mrb[136].mxu1 %vm874_vm1, %v4780_v31  ;;  %7602 = vmatmul.mubr.msk.f32.gmra.mrb[166].mxu0 %vm874_vm1, %v4780_v31 }
 0x284   : > { %7557 = vmatprep.mubr.msk.f32.mxu1 %vm874_vm1, %v9090_v5  ;;  %7604 = vmatprep.mubr.msk.f32.mxu0 %vm874_vm1, %v5566_v33 }
 0x287   : > { %7558 = vmatmul.mubr.msk.f32.vlgmr.msra.gmra.mrb[138].mxu1 %vm874_vm1, %v9100_v30  ;;  %7605 = vmatmul.mubr.msk.f32.gmra.mrb[168].mxu0 %vm874_vm1, %v5567_v17 }
 0x288   : > { %7560 = vmatprep.mubr.msk.f32.mxu1 %vm874_vm1, %v9103_v10  ;;  %7608 = vmatpush3.msk.msra.mxu1 %vm3551_vm2, %v5869_v52 }
 0x28b   : > { %7561 = vmatmul.mubr.msk.f32.gmra.mrb[140].mxu1 %vm874_vm1, %v9113_v27 }
 0x28c   : > { %7563 = vmatprep.mubr.msk.f32.mxu1 %vm874_vm1, %v9116_v12 }
 0x28f   : > { %7564 = vmatmul.mubr.msk.f32.gmra.mrb[142].mxu1 %vm874_vm1, %v9127_v16 }
 0x290   : > { %7566 = vmatprep.mubr.msk.f32.mxu1 %vm874_vm1, %v9131_v44 }
 0x293   : > { %7567 = vmatmul.mubr.msk.f32.gmra.mrb[144].mxu1 %vm874_vm1, %v9139_v21 }
 0x294   : > { %7569 = vmatprep.mubr.msk.f32.mxu1 %vm874_vm1, %v9143_v50 }
 0x297   : > { %7570 = vmatmul.mubr.msk.f32.gmra.mrb[146].mxu1 %vm874_vm1, %v9151_v59 }
 0x298   : > { %7572 = vmatprep.mubr.msk.f32.mxu1 %vm874_vm1, %v9155_v23 }
 0x29b   : > { %7573 = vmatmul.mubr.msk.f32.gmra.mrb[148].mxu1 %vm874_vm1, %v9163_v25 }
 0x29c   : > { %7575 = vmatprep.mubr.msk.f32.mxu1 %vm874_vm1, %v9178_v43 }
 0x29f   : > { %7576 = vmatmul.mubr.msk.f32.gmra.mrb[150].mxu1 %vm874_vm1, %v9187_v41 }
 0x2a0   : > { %7578 = vmatprep.mubr.msk.f32.mxu1 %vm874_vm1, %v5304_v36 }
 0x2a3   : > { %7579 = vmatmul.mubr.msk.f32.gmra.mrb[152].mxu1 %vm874_vm1, %v5305_v7 }
 0x2da   : > { %v7377_v61 = vpop.f32.mrb[74].mxu1 }
 0x2db   : > { %3701 = vst.msk [vmem:[#allocation5 + $0x8] sm:$0xff] %vm874_vm1, %v7377_v61  ;;  %v3621_v35 = vpop.f32.mrb[75].mxu1 }
 0x2dc   : > { %3700 = vst.msk [vmem:[#allocation5] sm:$0xff] %vm874_vm1, %v3621_v35 }
 0x2de   : > { %v7380_v46 = vpop.f32.mrb[76].mxu1  ;;  %v9345_v51 = vpop.f32.mrb[106].mxu0 }
 0x2df   : > { %3703 = vst.msk [vmem:[#allocation5 + $0x18] sm:$0xff] %vm874_vm1, %v7380_v46  ;;  %v3631_v47 = vpop.f32.mrb[77].mxu1  ;;  %v9348_v55 = vpop.f32.mrb[107].mxu0 }
 0x2e0   : > { %3702 = vst.msk [vmem:[#allocation5 + $0x10] sm:$0xff] %vm874_vm1, %v3631_v47 }
 0x2e2   : > { %v7383_v6 = vpop.f32.mrb[78].mxu1  ;;  %v9351_v42 = vpop.f32.mrb[108].mxu0  ;;  %v3931_v58 = vld [vmem:[#allocation5 + $0x8] sm:$0xff] }
 0x2e3   : > { %3705 = vst.msk [vmem:[#allocation5 + $0x28] sm:$0xff] %vm874_vm1, %v7383_v6  ;;  %v3641_v62 = vpop.f32.mrb[79].mxu1  ;;  %v9354_v45 = vpop.f32.mrb[109].mxu0  ;;  %v3930_v54 = vld [vmem:[#allocation5] sm:$0xff] }
 0x2e4   : > { %3704 = vst.msk [vmem:[#allocation5 + $0x20] sm:$0xff] %vm874_vm1, %v3641_v62 }
 0x2e6   : > { %v7386_v48 = vpop.f32.mrb[80].mxu1  ;;  %v9357_v19 = vpop.f32.mrb[110].mxu0  ;;  %v3933_v5 = vld [vmem:[#allocation5 + $0x18] sm:$0xff] }
 0x2e7   : > { %3707 = vst.msk [vmem:[#allocation5 + $0x38] sm:$0xff] %vm874_vm1, %v7386_v48  ;;  %v3651_v15 = vpop.f32.mrb[81].mxu1  ;;  %v9360_v34 = vpop.f32.mrb[111].mxu0  ;;  %v3932_v27 = vld [vmem:[#allocation5 + $0x10] sm:$0xff] }
 0x2e8   : > { %3706 = vst.msk [vmem:[#allocation5 + $0x30] sm:$0xff] %vm874_vm1, %v3651_v15 }
 0x2ea   : > { %v7389_v57 = vpop.f32.mrb[82].mxu1  ;;  %v9363_v3 = vpop.f32.mrb[112].mxu0  ;;  %v3935_v21 = vld [vmem:[#allocation5 + $0x28] sm:$0xff] }
 0x2eb   : > { %3709 = vst.msk [vmem:[#allocation5 + $0x48] sm:$0xff] %vm874_vm1, %v7389_v57  ;;  %v3661_v0 = vpop.f32.mrb[83].mxu1  ;;  %v9366_v4 = vpop.f32.mrb[113].mxu0  ;;  %v3934_v25 = vld [vmem:[#allocation5 + $0x20] sm:$0xff] }
 0x2ec   : > { %3708 = vst.msk [vmem:[#allocation5 + $0x40] sm:$0xff] %vm874_vm1, %v3661_v0 }
 0x2ee   : > { %v7392_v2 = vpop.f32.mrb[84].mxu1  ;;  %v9369_v26 = vpop.f32.mrb[114].mxu0  ;;  %v3937_v13 = vld [vmem:[#allocation5 + $0x38] sm:$0xff] }
 0x2ef   : > { %3711 = vst.msk [vmem:[#allocation5 + $0x58] sm:$0xff] %vm874_vm1, %v7392_v2  ;;  %v3671_v39 = vpop.f32.mrb[85].mxu1  ;;  %v9372_v37 = vpop.f32.mrb[115].mxu0  ;;  %v3936_v36 = vld [vmem:[#allocation5 + $0x30] sm:$0xff] }
 0x2f0   : > { %3710 = vst.msk [vmem:[#allocation5 + $0x50] sm:$0xff] %vm874_vm1, %v3671_v39 }
 0x2f2   : > { %v7395_v63 = vpop.f32.mrb[86].mxu1  ;;  %v9375_v53 = vpop.f32.mrb[116].mxu0 }
 0x2f3   : > { %3713 = vst.msk [vmem:[#allocation5 + $0x68] sm:$0xff] %vm874_vm1, %v7395_v63  ;;  %v3681_v49 = vpop.f32.mrb[87].mxu1  ;;  %v9378_v56 = vpop.f32.mrb[117].mxu0  ;;  %v3938_v15 = vld [vmem:[#allocation5 + $0x40] sm:$0xff] }
 0x2f4   : > { %3712 = vst.msk [vmem:[#allocation5 + $0x60] sm:$0xff] %vm874_vm1, %v3681_v49 }
 0x2f6   : > { %v7398_v8 = vpop.f32.mrb[88].mxu1  ;;  %v9381_v22 = vpop.f32.mrb[118].mxu0  ;;  %v3941_v49 = vld [vmem:[#allocation5 + $0x58] sm:$0xff] }
 0x2f7   : > { %3715 = vst.msk [vmem:[#allocation5 + $0x78] sm:$0xff] %vm874_vm1, %v7398_v8  ;;  %v3691_v11 = vpop.f32.mrb[89].mxu1  ;;  %v9383_v24 = vpop.f32.mrb[119].mxu0 }
 0x2f8   : > { %3714 = vst.msk [vmem:[#allocation5 + $0x70] sm:$0xff] %vm874_vm1, %v3691_v11 }
 0x2fa   : > { %v7403_v20 = vpop.f32.mrb[90].mxu1  ;;  %v9387_v30 = vpop.f32.mrb[120].mxu0 }
 0x2fb   : > { %v3947_v14 = vadd.f32 %v7403_v20, %v3931_v58  ;;  %v3851_v1 = vpop.f32.mrb[91].mxu1  ;;  %v9389_v12 = vpop.f32.mrb[121].mxu0  ;;  %v3940_v58 = vld [vmem:[#allocation5 + $0x50] sm:$0xff] }
 0x2fc   : > { %v3946_v38 = vadd.f32 %v3930_v54, %v3851_v1 }
 0x2fd   : > { %3963 = vst.msk [vmem:[#allocation5 + $0x8] sm:$0xff] %vm874_vm1, %v3947_v14 }
 0x2fe   : > { %3962 = vst.msk [vmem:[#allocation5] sm:$0xff] %vm874_vm1, %v3946_v38  ;;  %v7406_v28 = vpop.f32.mrb[92].mxu1  ;;  %v9393_v50 = vpop.f32.mrb[122].mxu0 }
 0x2ff   : > { %v3949_v10 = vadd.f32 %v7406_v28, %v3933_v5  ;;  %v3861_v32 = vpop.f32.mrb[93].mxu1  ;;  %v9395_v60 = vpop.f32.mrb[123].mxu0  ;;  %v3943_v5 = vld [vmem:[#allocation5 + $0x68] sm:$0xff] }
 0x300   : > { %v3948_v16 = vadd.f32 %v3932_v27, %v3861_v32 }
 0x301   : > { %3965 = vst.msk [vmem:[#allocation5 + $0x18] sm:$0xff] %vm874_vm1, %v3949_v10 }
 0x302   : > { %3964 = vst.msk [vmem:[#allocation5 + $0x10] sm:$0xff] %vm874_vm1, %v3948_v16  ;;  %v7409_v44 = vpop.f32.mrb[94].mxu1  ;;  %v9401_v31 = vpop.f32.mrb[124].mxu0  ;;  %v3942_v16 = vld [vmem:[#allocation5 + $0x60] sm:$0xff] }
 0x303   : > { %v3951_v59 = vadd.f32 %v7409_v44, %v3935_v21  ;;  %v3871_v23 = vpop.f32.mrb[95].mxu1  ;;  %v9404_v7 = vpop.f32.mrb[125].mxu0 }
 0x304   : > { %v3950_v43 = vadd.f32 %v3934_v25, %v3871_v23  ;;  %v4193_v41 = vld [vmem:[#allocation5 + $0x8] sm:$0xff] }
 0x305   : > { %3967 = vst.msk [vmem:[#allocation5 + $0x28] sm:$0xff] %vm874_vm1, %v3951_v59  ;;  %v4209_v40 = vadd.f32 %v9345_v51, %v4193_v41  ;;  %v4192_v9 = vld [vmem:[#allocation5] sm:$0xff]  ;;  %v3939_v51 = vld [vmem:[#allocation5 + $0x48] sm:$0xff] }
 0x306   : > { %3966 = vst.msk [vmem:[#allocation5 + $0x20] sm:$0xff] %vm874_vm1, %v3950_v43  ;;  %v4208_v29 = vadd.f32 %v4192_v9, %v9348_v55  ;;  %v7412_v18 = vpop.f32.mrb[96].mxu1  ;;  %v9411_v62 = vpop.f32.mrb[126].mxu0  ;;  %v3945_v43 = vld [vmem:[#allocation5 + $0x78] sm:$0xff] }
 0x307   : > { %4225 = vst.msk [vmem:[#allocation5 + $0x8] sm:$0xff] %vm874_vm1, %v4209_v40  ;;  %v3953_v33 = vadd.f32 %v7412_v18, %v3937_v13  ;;  %v3881_v17 = vpop.f32.mrb[97].mxu1  ;;  %v9414_v57 = vpop.f32.mrb[127].mxu0 }
 0x308   : > { %4224 = vst.msk [vmem:[#allocation5] sm:$0xff] %vm874_vm1, %v4208_v29  ;;  %v3952_v52 = vadd.f32 %v3936_v36, %v3881_v17  ;;  %v4195_v61 = vld [vmem:[#allocation5 + $0x18] sm:$0xff]  ;;  %v3944_v29 = vld [vmem:[#allocation5 + $0x70] sm:$0xff] }
 0x309   : > { %3969 = vst.msk [vmem:[#allocation5 + $0x38] sm:$0xff] %vm874_vm1, %v3953_v33  ;;  %v4211_v35 = vadd.f32 %v9351_v42, %v4195_v61  ;;  %v4194_v46 = vld [vmem:[#allocation5 + $0x10] sm:$0xff] }
 0x30a   : > { %3968 = vst.msk [vmem:[#allocation5 + $0x30] sm:$0xff] %vm874_vm1, %v3952_v52  ;;  %v4210_v47 = vadd.f32 %v4194_v46, %v9354_v45  ;;  %v7415_v6 = vpop.f32.mrb[98].mxu1  ;;  %v9421_v8 = vpop.f32.mrb[128].mxu0 }
 0x30b   : > { %4227 = vst.msk [vmem:[#allocation5 + $0x18] sm:$0xff] %vm874_vm1, %v4211_v35  ;;  %v3955_v55 = vadd.f32 %v7415_v6, %v3939_v51  ;;  %v3891_v48 = vpop.f32.mrb[99].mxu1  ;;  %v9424_v14 = vpop.f32.mrb[129].mxu0 }
 0x30c   : > { %4226 = vst.msk [vmem:[#allocation5 + $0x10] sm:$0xff] %vm874_vm1, %v4210_v47  ;;  %v3954_v0 = vadd.f32 %v3938_v15, %v3891_v48  ;;  %v4197_v42 = vld [vmem:[#allocation5 + $0x28] sm:$0xff] }
 0x30d   : > { %3971 = vst.msk [vmem:[#allocation5 + $0x48] sm:$0xff] %vm874_vm1, %v3955_v55  ;;  %v4213_v2 = vadd.f32 %v9357_v19, %v4197_v42  ;;  %v4196_v45 = vld [vmem:[#allocation5 + $0x20] sm:$0xff] }
 0x30e   : > { %3970 = vst.msk [vmem:[#allocation5 + $0x40] sm:$0xff] %vm874_vm1, %v3954_v0  ;;  %v4212_v39 = vadd.f32 %v4196_v45, %v9360_v34  ;;  %v7418_v63 = vpop.f32.mrb[100].mxu1  ;;  %v9431_v10 = vpop.f32.mrb[130].mxu0  ;;  %v4456_v52 = vld [vmem:[#allocation5 + $0x8] sm:$0xff] }
 0x30f   : > { %4229 = vst.msk [vmem:[#allocation5 + $0x28] sm:$0xff] %vm874_vm1, %v4213_v2  ;;  %v3957_v11 = vadd.f32 %v7418_v63, %v3941_v49  ;;  %v3901_v20 = vpop.f32.mrb[101].mxu1  ;;  %v9434_v44 = vpop.f32.mrb[131].mxu0  ;;  %v4455_v47 = vld [vmem:[#allocation5] sm:$0xff] }
 0x310   : > { %4228 = vst.msk [vmem:[#allocation5 + $0x20] sm:$0xff] %vm874_vm1, %v4212_v39  ;;  %v3956_v1 = vadd.f32 %v3940_v58, %v3901_v20  ;;  %v4199_v19 = vld [vmem:[#allocation5 + $0x38] sm:$0xff] }
 0x311   : > { %3973 = vst.msk [vmem:[#allocation5 + $0x58] sm:$0xff] %vm874_vm1, %v3957_v11  ;;  %v4215_v54 = vadd.f32 %v9363_v3, %v4199_v19  ;;  %v4198_v34 = vld [vmem:[#allocation5 + $0x30] sm:$0xff] }
 0x312   : > { %3972 = vst.msk [vmem:[#allocation5 + $0x50] sm:$0xff] %vm874_vm1, %v3956_v1  ;;  %v4214_v38 = vadd.f32 %v4198_v34, %v9366_v4  ;;  %v7421_v28 = vpop.f32.mrb[102].mxu1  ;;  %v9441_v41 = vpop.f32.mrb[132].mxu0  ;;  %v4458_v0 = vld [vmem:[#allocation5 + $0x18] sm:$0xff] }
 0x313   : > { %4231 = vst.msk [vmem:[#allocation5 + $0x38] sm:$0xff] %vm874_vm1, %v4215_v54  ;;  %v3959_v32 = vadd.f32 %v7421_v28, %v3943_v5  ;;  %v3911_v27 = vpop.f32.mrb[103].mxu1  ;;  %v9444_v18 = vpop.f32.mrb[133].mxu0  ;;  %v4457_v39 = vld [vmem:[#allocation5 + $0x10] sm:$0xff] }
 0x314   : > { %4230 = vst.msk [vmem:[#allocation5 + $0x30] sm:$0xff] %vm874_vm1, %v4214_v38  ;;  %v3958_v21 = vadd.f32 %v3942_v16, %v3911_v27  ;;  %v4201_v3 = vld [vmem:[#allocation5 + $0x48] sm:$0xff] }
 0x315   : > { %3975 = vst.msk [vmem:[#allocation5 + $0x68] sm:$0xff] %vm874_vm1, %v3959_v32  ;;  %v4217_v59 = vadd.f32 %v9369_v26, %v4201_v3  ;;  %v4200_v4 = vld [vmem:[#allocation5 + $0x40] sm:$0xff] }
 0x316   : > { %3974 = vst.msk [vmem:[#allocation5 + $0x60] sm:$0xff] %vm874_vm1, %v3958_v21  ;;  %v4216_v23 = vadd.f32 %v4200_v4, %v9372_v37  ;;  %v7424_v25 = vpop.f32.mrb[104].mxu1  ;;  %v9451_v61 = vpop.f32.mrb[134].mxu0  ;;  %v4460_v1 = vld [vmem:[#allocation5 + $0x28] sm:$0xff] }
 0x317   : > { %4233 = vst.msk [vmem:[#allocation5 + $0x48] sm:$0xff] %vm874_vm1, %v4217_v59  ;;  %v3961_v40 = vadd.f32 %v7424_v25, %v3945_v43  ;;  %v3921_v9 = vpop.f32.mrb[105].mxu1  ;;  %v9454_v6 = vpop.f32.mrb[135].mxu0  ;;  %v4459_v38 = vld [vmem:[#allocation5 + $0x20] sm:$0xff] }
 0x318   : > { %4232 = vst.msk [vmem:[#allocation5 + $0x40] sm:$0xff] %vm874_vm1, %v4216_v23  ;;  %v3960_v13 = vadd.f32 %v3944_v29, %v3921_v9  ;;  %v4203_v26 = vld [vmem:[#allocation5 + $0x58] sm:$0xff] }
 0x319   : > { %3977 = vst.msk [vmem:[#allocation5 + $0x78] sm:$0xff] %vm874_vm1, %v3961_v40  ;;  %v4219_v33 = vadd.f32 %v9375_v53, %v4203_v26  ;;  %v4202_v37 = vld [vmem:[#allocation5 + $0x50] sm:$0xff] }
 0x31a   : > { %3976 = vst.msk [vmem:[#allocation5 + $0x70] sm:$0xff] %vm874_vm1, %v3960_v13  ;;  %v4218_v17 = vadd.f32 %v4202_v37, %v9378_v56  ;;  %v7455_v36 = vpop.f32.mrb[106].mxu1  ;;  %v9461_v42 = vpop.f32.mrb[136].mxu0  ;;  %v4462_v21 = vld [vmem:[#allocation5 + $0x38] sm:$0xff] }
 0x31b   : > { %4235 = vst.msk [vmem:[#allocation5 + $0x58] sm:$0xff] %vm874_vm1, %v4219_v33  ;;  %v4472_v35 = vadd.f32 %v7455_v36, %v4456_v52  ;;  %v4376_v46 = vpop.f32.mrb[107].mxu1  ;;  %v9464_v63 = vpop.f32.mrb[137].mxu0  ;;  %v4461_v23 = vld [vmem:[#allocation5 + $0x30] sm:$0xff] }
 0x31c   : > { %4234 = vst.msk [vmem:[#allocation5 + $0x50] sm:$0xff] %vm874_vm1, %v4218_v17  ;;  %v4471_v51 = vadd.f32 %v4455_v47, %v4376_v46  ;;  %v4205_v53 = vld [vmem:[#allocation5 + $0x68] sm:$0xff] }
 0x31d   : > { %4488 = vst.msk [vmem:[#allocation5 + $0x8] sm:$0xff] %vm874_vm1, %v4472_v35  ;;  %v4221_v55 = vadd.f32 %v9381_v22, %v4205_v53  ;;  %v4204_v56 = vld [vmem:[#allocation5 + $0x60] sm:$0xff] }
 0x31e   : > { %4487 = vst.msk [vmem:[#allocation5] sm:$0xff] %vm874_vm1, %v4471_v51  ;;  %v4220_v48 = vadd.f32 %v4204_v56, %v9383_v24  ;;  %v7458_v15 = vpop.f32.mrb[108].mxu1  ;;  %v9471_v19 = vpop.f32.mrb[138].mxu0  ;;  %v4464_v13 = vld [vmem:[#allocation5 + $0x48] sm:$0xff] }
 0x31f   : > { %4237 = vst.msk [vmem:[#allocation5 + $0x68] sm:$0xff] %vm874_vm1, %v4221_v55  ;;  %v4474_v2 = vadd.f32 %v7458_v15, %v4458_v0  ;;  %v4386_v45 = vpop.f32.mrb[109].mxu1  ;;  %v9474_v28 = vpop.f32.mrb[139].mxu0  ;;  %v4463_v17 = vld [vmem:[#allocation5 + $0x40] sm:$0xff] }
 0x320   : > { %4236 = vst.msk [vmem:[#allocation5 + $0x60] sm:$0xff] %vm874_vm1, %v4220_v48  ;;  %v4473_v49 = vadd.f32 %v4457_v39, %v4386_v45  ;;  %v4207_v22 = vld [vmem:[#allocation5 + $0x78] sm:$0xff] }
 0x321   : > { %4490 = vst.msk [vmem:[#allocation5 + $0x18] sm:$0xff] %vm874_vm1, %v4474_v2  ;;  %v4223_v11 = vadd.f32 %v9387_v30, %v4207_v22  ;;  %v4206_v24 = vld [vmem:[#allocation5 + $0x70] sm:$0xff] }
 0x322   : > { %4489 = vst.msk [vmem:[#allocation5 + $0x10] sm:$0xff] %vm874_vm1, %v4473_v49  ;;  %v4222_v20 = vadd.f32 %v4206_v24, %v9389_v12  ;;  %v7461_v58 = vpop.f32.mrb[110].mxu1  ;;  %v9481_v3 = vpop.f32.mrb[140].mxu0  ;;  %v4466_v51 = vld [vmem:[#allocation5 + $0x58] sm:$0xff] }
 0x323   : > { %4239 = vst.msk [vmem:[#allocation5 + $0x78] sm:$0xff] %vm874_vm1, %v4223_v11  ;;  %v4476_v54 = vadd.f32 %v7461_v58, %v4460_v1  ;;  %v4396_v34 = vpop.f32.mrb[111].mxu1  ;;  %v9484_v25 = vpop.f32.mrb[141].mxu0  ;;  %v4465_v48 = vld [vmem:[#allocation5 + $0x50] sm:$0xff] }
 0x324   : > { %4238 = vst.msk [vmem:[#allocation5 + $0x70] sm:$0xff] %vm874_vm1, %v4222_v20  ;;  %v4475_v5 = vadd.f32 %v4459_v38, %v4396_v34  ;;  %v4718_v30 = vld [vmem:[#allocation5 + $0x8] sm:$0xff] }
 0x325   : > { %4492 = vst.msk [vmem:[#allocation5 + $0x28] sm:$0xff] %vm874_vm1, %v4476_v54  ;;  %v4734_v32 = vadd.f32 %v9393_v50, %v4718_v30  ;;  %v4717_v12 = vld [vmem:[#allocation5] sm:$0xff] }
 0x326   : > { %4491 = vst.msk [vmem:[#allocation5 + $0x20] sm:$0xff] %vm874_vm1, %v4475_v5  ;;  %v4733_v27 = vadd.f32 %v4717_v12, %v9395_v60  ;;  %v7464_v16 = vpop.f32.mrb[112].mxu1  ;;  %v9491_v26 = vpop.f32.mrb[142].mxu0  ;;  %v4468_v49 = vld [vmem:[#allocation5 + $0x68] sm:$0xff] }
 0x327   : > { %4750 = vst.msk [vmem:[#allocation5 + $0x8] sm:$0xff] %vm874_vm1, %v4734_v32  ;;  %v4478_v59 = vadd.f32 %v7464_v16, %v4462_v21  ;;  %v4406_v4 = vpop.f32.mrb[113].mxu1  ;;  %v9494_v36 = vpop.f32.mrb[143].mxu0  ;;  %v4467_v20 = vld [vmem:[#allocation5 + $0x60] sm:$0xff] }
 0x328   : > { %4749 = vst.msk [vmem:[#allocation5] sm:$0xff] %vm874_vm1, %v4733_v27  ;;  %v4477_v43 = vadd.f32 %v4461_v23, %v4406_v4  ;;  %v4720_v50 = vld [vmem:[#allocation5 + $0x18] sm:$0xff] }
 0x329   : > { %4494 = vst.msk [vmem:[#allocation5 + $0x38] sm:$0xff] %vm874_vm1, %v4478_v59  ;;  %v4736_v40 = vadd.f32 %v9401_v31, %v4720_v50  ;;  %v4719_v60 = vld [vmem:[#allocation5 + $0x10] sm:$0xff] }
 0x32a   : > { %4493 = vst.msk [vmem:[#allocation5 + $0x30] sm:$0xff] %vm874_vm1, %v4477_v43  ;;  %v4735_v9 = vadd.f32 %v4719_v60, %v9404_v7  ;;  %v7467_v29 = vpop.f32.mrb[114].mxu1  ;;  %v9501_v53 = vpop.f32.mrb[144].mxu0  ;;  %v4470_v5 = vld [vmem:[#allocation5 + $0x78] sm:$0xff] }
 0x32b   : > { %4752 = vst.msk [vmem:[#allocation5 + $0x18] sm:$0xff] %vm874_vm1, %v4736_v40  ;;  %v4480_v33 = vadd.f32 %v7467_v29, %v4464_v13  ;;  %v4416_v37 = vpop.f32.mrb[115].mxu1  ;;  %v9504_v15 = vpop.f32.mrb[145].mxu0  ;;  %v4469_v27 = vld [vmem:[#allocation5 + $0x70] sm:$0xff] }
 0x32c   : > { %4751 = vst.msk [vmem:[#allocation5 + $0x10] sm:$0xff] %vm874_vm1, %v4735_v9  ;;  %v4479_v52 = vadd.f32 %v4463_v17, %v4416_v37  ;;  %v4722_v31 = vld [vmem:[#allocation5 + $0x28] sm:$0xff] }
 0x32d   : > { %4496 = vst.msk [vmem:[#allocation5 + $0x48] sm:$0xff] %vm874_vm1, %v4480_v33  ;;  %v4738_v35 = vadd.f32 %v9411_v62, %v4722_v31  ;;  %v4721_v7 = vld [vmem:[#allocation5 + $0x20] sm:$0xff] }
 0x32e   : > { %4495 = vst.msk [vmem:[#allocation5 + $0x40] sm:$0xff] %vm874_vm1, %v4479_v52  ;;  %v4737_v46 = vadd.f32 %v4721_v7, %v9414_v57  ;;  %v7470_v47 = vpop.f32.mrb[116].mxu1  ;;  %v9511_v22 = vpop.f32.mrb[146].mxu0  ;;  %v4980_v43 = vld [vmem:[#allocation5 + $0x8] sm:$0xff] }
 0x32f   : > { %4754 = vst.msk [vmem:[#allocation5 + $0x28] sm:$0xff] %vm874_vm1, %v4738_v35  ;;  %v4482_v55 = vadd.f32 %v7470_v47, %v4466_v51  ;;  %v4426_v56 = vpop.f32.mrb[117].mxu1  ;;  %v9514_v58 = vpop.f32.mrb[147].mxu0  ;;  %v4979_v9 = vld [vmem:[#allocation5] sm:$0xff] }
 0x330   : > { %4753 = vst.msk [vmem:[#allocation5 + $0x20] sm:$0xff] %vm874_vm1, %v4737_v46  ;;  %v4481_v0 = vadd.f32 %v4465_v48, %v4426_v56  ;;  %v4724_v62 = vld [vmem:[#allocation5 + $0x38] sm:$0xff] }
 0x331   : > { %4498 = vst.msk [vmem:[#allocation5 + $0x58] sm:$0xff] %vm874_vm1, %v4482_v55  ;;  %v4740_v2 = vadd.f32 %v9421_v8, %v4724_v62  ;;  %v4723_v57 = vld [vmem:[#allocation5 + $0x30] sm:$0xff] }
 0x332   : > { %4497 = vst.msk [vmem:[#allocation5 + $0x50] sm:$0xff] %vm874_vm1, %v4481_v0  ;;  %v4739_v45 = vadd.f32 %v4723_v57, %v9424_v14  ;;  %v7473_v39 = vpop.f32.mrb[118].mxu1  ;;  %v9521_v30 = vpop.f32.mrb[148].mxu0  ;;  %v4982_v52 = vld [vmem:[#allocation5 + $0x18] sm:$0xff] }
 0x333   : > { %4756 = vst.msk [vmem:[#allocation5 + $0x38] sm:$0xff] %vm874_vm1, %v4740_v2  ;;  %v4484_v11 = vadd.f32 %v7473_v39, %v4468_v49  ;;  %v4436_v24 = vpop.f32.mrb[119].mxu1  ;;  %v9524_v16 = vpop.f32.mrb[149].mxu0  ;;  %v4981_v46 = vld [vmem:[#allocation5 + $0x10] sm:$0xff] }
 0x334   : > { %4755 = vst.msk [vmem:[#allocation5 + $0x30] sm:$0xff] %vm874_vm1, %v4739_v45  ;;  %v4483_v1 = vadd.f32 %v4467_v20, %v4436_v24  ;;  %v4726_v8 = vld [vmem:[#allocation5 + $0x48] sm:$0xff] }
 0x335   : > { %4500 = vst.msk [vmem:[#allocation5 + $0x68] sm:$0xff] %vm874_vm1, %v4484_v11  ;;  %v4742_v54 = vadd.f32 %v9431_v10, %v4726_v8  ;;  %v4725_v14 = vld [vmem:[#allocation5 + $0x40] sm:$0xff] }
 0x336   : > { %4499 = vst.msk [vmem:[#allocation5 + $0x60] sm:$0xff] %vm874_vm1, %v4483_v1  ;;  %v4741_v34 = vadd.f32 %v4725_v14, %v9434_v44  ;;  %v7476_v38 = vpop.f32.mrb[120].mxu1  ;;  %v9531_v50 = vpop.f32.mrb[150].mxu0  ;;  %v4984_v0 = vld [vmem:[#allocation5 + $0x28] sm:$0xff] }
 0x337   : > { %4758 = vst.msk [vmem:[#allocation5 + $0x48] sm:$0xff] %vm874_vm1, %v4742_v54  ;;  %v4486_v32 = vadd.f32 %v7476_v38, %v4470_v5  ;;  %v4446_v12 = vpop.f32.mrb[121].mxu1  ;;  %v9534_v29 = vpop.f32.mrb[151].mxu0  ;;  %v4983_v45 = vld [vmem:[#allocation5 + $0x20] sm:$0xff] }
 0x338   : > { %4757 = vst.msk [vmem:[#allocation5 + $0x40] sm:$0xff] %vm874_vm1, %v4741_v34  ;;  %v4485_v21 = vadd.f32 %v4469_v27, %v4446_v12  ;;  %v4728_v10 = vld [vmem:[#allocation5 + $0x58] sm:$0xff] }
 0x339   : > { %4502 = vst.msk [vmem:[#allocation5 + $0x78] sm:$0xff] %vm874_vm1, %v4486_v32  ;;  %v4744_v59 = vadd.f32 %v9441_v41, %v4728_v10  ;;  %v4727_v44 = vld [vmem:[#allocation5 + $0x50] sm:$0xff] }
 0x33a   : > { %4501 = vst.msk [vmem:[#allocation5 + $0x70] sm:$0xff] %vm874_vm1, %v4485_v21  ;;  %v4743_v4 = vadd.f32 %v4727_v44, %v9444_v18  ;;  %v7507_v23 = vpop.f32.mrb[122].mxu1  ;;  %v9541_v31 = vpop.f32.mrb[152].mxu0  ;;  %v4986_v1 = vld [vmem:[#allocation5 + $0x38] sm:$0xff] }
 0x33b   : > { %4760 = vst.msk [vmem:[#allocation5 + $0x58] sm:$0xff] %vm874_vm1, %v4744_v59  ;;  %v4996_v40 = vadd.f32 %v7507_v23, %v4980_v43  ;;  %v4900_v60 = vpop.f32.mrb[123].mxu1  ;;  %v9544_v47 = vpop.f32.mrb[153].mxu0  ;;  %v4985_v34 = vld [vmem:[#allocation5 + $0x30] sm:$0xff] }
 0x33c   : > { %4759 = vst.msk [vmem:[#allocation5 + $0x50] sm:$0xff] %vm874_vm1, %v4743_v4  ;;  %v4995_v13 = vadd.f32 %v4979_v9, %v4900_v60  ;;  %v4730_v41 = vld [vmem:[#allocation5 + $0x68] sm:$0xff] }
 0x33d   : > { %5012 = vst.msk [vmem:[#allocation5 + $0x8] sm:$0xff] %vm874_vm1, %v4996_v40  ;;  %v4746_v33 = vadd.f32 %v9451_v61, %v4730_v41  ;;  %v4729_v18 = vld [vmem:[#allocation5 + $0x60] sm:$0xff] }
 0x33e   : > { %5011 = vst.msk [vmem:[#allocation5] sm:$0xff] %vm874_vm1, %v4995_v13  ;;  %v4745_v37 = vadd.f32 %v4729_v18, %v9454_v6  ;;  %v7510_v17 = vpop.f32.mrb[124].mxu1  ;;  %v9551_v62 = vpop.f32.mrb[154].mxu0  ;;  %v4988_v21 = vld [vmem:[#allocation5 + $0x48] sm:$0xff] }
 0x33f   : > { %4762 = vst.msk [vmem:[#allocation5 + $0x68] sm:$0xff] %vm874_vm1, %v4746_v33  ;;  %v4998_v35 = vadd.f32 %v7510_v17, %v4982_v52  ;;  %v4910_v7 = vpop.f32.mrb[125].mxu1  ;;  %v9554_v39 = vpop.f32.mrb[155].mxu0  ;;  %v4987_v4 = vld [vmem:[#allocation5 + $0x40] sm:$0xff] }
 0x340   : > { %4761 = vst.msk [vmem:[#allocation5 + $0x60] sm:$0xff] %vm874_vm1, %v4745_v37  ;;  %v4997_v51 = vadd.f32 %v4981_v46, %v4910_v7  ;;  %v4732_v61 = vld [vmem:[#allocation5 + $0x78] sm:$0xff] }
 0x341   : > { %5014 = vst.msk [vmem:[#allocation5 + $0x18] sm:$0xff] %vm874_vm1, %v4998_v35  ;;  %v4748_v55 = vadd.f32 %v9461_v42, %v4732_v61  ;;  %v4731_v6 = vld [vmem:[#allocation5 + $0x70] sm:$0xff] }
 0x342   : > { %5013 = vst.msk [vmem:[#allocation5 + $0x10] sm:$0xff] %vm874_vm1, %v4997_v51  ;;  %v4747_v56 = vadd.f32 %v4731_v6, %v9464_v63  ;;  %v7513_v48 = vpop.f32.mrb[126].mxu1  ;;  %v9561_v8 = vpop.f32.mrb[156].mxu0  ;;  %v4990_v13 = vld [vmem:[#allocation5 + $0x58] sm:$0xff] }
 0x343   : > { %4764 = vst.msk [vmem:[#allocation5 + $0x78] sm:$0xff] %vm874_vm1, %v4748_v55  ;;  %v5000_v2 = vadd.f32 %v7513_v48, %v4984_v0  ;;  %v4920_v57 = vpop.f32.mrb[127].mxu1  ;;  %v9564_v38 = vpop.f32.mrb[157].mxu0  ;;  %v4989_v37 = vld [vmem:[#allocation5 + $0x50] sm:$0xff] }
 0x344   : > { %4763 = vst.msk [vmem:[#allocation5 + $0x70] sm:$0xff] %vm874_vm1, %v4747_v56  ;;  %v4999_v49 = vadd.f32 %v4983_v45, %v4920_v57  ;;  %v5243_v42 = vld [vmem:[#allocation5 + $0x8] sm:$0xff] }
 0x345   : > { %5016 = vst.msk [vmem:[#allocation5 + $0x28] sm:$0xff] %vm874_vm1, %v5000_v2  ;;  %v5259_v11 = vadd.f32 %v9471_v19, %v5243_v42  ;;  %v5242_v63 = vld [vmem:[#allocation5] sm:$0xff] }
 0x346   : > { %5015 = vst.msk [vmem:[#allocation5 + $0x20] sm:$0xff] %vm874_vm1, %v4999_v49  ;;  %v5258_v24 = vadd.f32 %v5242_v63, %v9474_v28  ;;  %v7516_v20 = vpop.f32.mrb[128].mxu1  ;;  %v9571_v10 = vpop.f32.mrb[158].mxu0  ;;  %v4992_v51 = vld [vmem:[#allocation5 + $0x68] sm:$0xff] }
 0x347   : > { %5275 = vst.msk [vmem:[#allocation5 + $0x8] sm:$0xff] %vm874_vm1, %v5259_v11  ;;  %v5002_v54 = vadd.f32 %v7516_v20, %v4986_v1  ;;  %v4930_v14 = vpop.f32.mrb[129].mxu1  ;;  %v9574_v23 = vpop.f32.mrb[159].mxu0  ;;  %v4991_v56 = vld [vmem:[#allocation5 + $0x60] sm:$0xff] }
 0x348   : > { %5274 = vst.msk [vmem:[#allocation5] sm:$0xff] %vm874_vm1, %v5258_v24  ;;  %v5001_v5 = vadd.f32 %v4985_v34, %v4930_v14  ;;  %v5245_v19 = vld [vmem:[#allocation5 + $0x18] sm:$0xff] }
 0x349   : > { %5018 = vst.msk [vmem:[#allocation5 + $0x38] sm:$0xff] %vm874_vm1, %v5002_v54  ;;  %v5261_v32 = vadd.f32 %v9481_v3, %v5245_v19  ;;  %v5244_v28 = vld [vmem:[#allocation5 + $0x10] sm:$0xff] }
 0x34a   : > { %5017 = vst.msk [vmem:[#allocation5 + $0x30] sm:$0xff] %vm874_vm1, %v5001_v5  ;;  %v5260_v12 = vadd.f32 %v5244_v28, %v9484_v25  ;;  %v7519_v27 = vpop.f32.mrb[130].mxu1  ;;  %v9581_v41 = vpop.f32.mrb[160].mxu0  ;;  %v4994_v49 = vld [vmem:[#allocation5 + $0x78] sm:$0xff] }
 0x34b   : > { %5277 = vst.msk [vmem:[#allocation5 + $0x18] sm:$0xff] %vm874_vm1, %v5261_v32  ;;  %v5004_v59 = vadd.f32 %v7519_v27, %v4988_v21  ;;  %v4940_v44 = vpop.f32.mrb[131].mxu1  ;;  %v9584_v17 = vpop.f32.mrb[161].mxu0  ;;  %v4993_v24 = vld [vmem:[#allocation5 + $0x70] sm:$0xff] }
 0x34c   : > { %5276 = vst.msk [vmem:[#allocation5 + $0x10] sm:$0xff] %vm874_vm1, %v5260_v12  ;;  %v5003_v43 = vadd.f32 %v4987_v4, %v4940_v44  ;;  %v5247_v3 = vld [vmem:[#allocation5 + $0x28] sm:$0xff] }
 0x34d   : > { %5020 = vst.msk [vmem:[#allocation5 + $0x48] sm:$0xff] %vm874_vm1, %v5004_v59  ;;  %v5263_v40 = vadd.f32 %v9491_v26, %v5247_v3  ;;  %v5246_v25 = vld [vmem:[#allocation5 + $0x20] sm:$0xff] }
 0x34e   : > { %5019 = vst.msk [vmem:[#allocation5 + $0x40] sm:$0xff] %vm874_vm1, %v5003_v43  ;;  %v5262_v60 = vadd.f32 %v5246_v25, %v9494_v36  ;;  %v7522_v9 = vpop.f32.mrb[132].mxu1  ;;  %v9591_v61 = vpop.f32.mrb[162].mxu0  ;;  %v5505_v5 = vld [vmem:[#allocation5 + $0x8] sm:$0xff] }
 0x34f   : > { %5279 = vst.msk [vmem:[#allocation5 + $0x28] sm:$0xff] %vm874_vm1, %v5263_v40  ;;  %v5006_v33 = vadd.f32 %v7522_v9, %v4990_v13  ;;  %v4950_v18 = vpop.f32.mrb[133].mxu1  ;;  %v9594_v48 = vpop.f32.mrb[163].mxu0  ;;  %v5504_v12 = vld [vmem:[#allocation5] sm:$0xff] }
 0x350   : > { %5278 = vst.msk [vmem:[#allocation5 + $0x20] sm:$0xff] %vm874_vm1, %v5262_v60  ;;  %v5005_v52 = vadd.f32 %v4989_v37, %v4950_v18  ;;  %v5249_v26 = vld [vmem:[#allocation5 + $0x38] sm:$0xff] }
 0x351   : > { %5022 = vst.msk [vmem:[#allocation5 + $0x58] sm:$0xff] %vm874_vm1, %v5006_v33  ;;  %v5265_v35 = vadd.f32 %v9501_v53, %v5249_v26  ;;  %v5248_v36 = vld [vmem:[#allocation5 + $0x30] sm:$0xff] }
 0x352   : > { %5021 = vst.msk [vmem:[#allocation5 + $0x50] sm:$0xff] %vm874_vm1, %v5005_v52  ;;  %v5264_v7 = vadd.f32 %v5248_v36, %v9504_v15  ;;  %v7525_v46 = vpop.f32.mrb[134].mxu1  ;;  %v9601_v42 = vpop.f32.mrb[164].mxu0  ;;  %v5507_v43 = vld [vmem:[#allocation5 + $0x18] sm:$0xff] }
 0x353   : > { %5281 = vst.msk [vmem:[#allocation5 + $0x38] sm:$0xff] %vm874_vm1, %v5265_v35  ;;  %v5008_v55 = vadd.f32 %v7525_v46, %v4992_v51  ;;  %v4960_v6 = vpop.f32.mrb[135].mxu1  ;;  %v9604_v20 = vpop.f32.mrb[165].mxu0  ;;  %v5506_v60 = vld [vmem:[#allocation5 + $0x10] sm:$0xff] }
 0x354   : > { %5280 = vst.msk [vmem:[#allocation5 + $0x30] sm:$0xff] %vm874_vm1, %v5264_v7  ;;  %v5007_v0 = vadd.f32 %v4991_v56, %v4960_v6  ;;  %v5251_v53 = vld [vmem:[#allocation5 + $0x48] sm:$0xff] }
 0x355   : > { %5024 = vst.msk [vmem:[#allocation5 + $0x68] sm:$0xff] %vm874_vm1, %v5008_v55  ;;  %v5267_v2 = vadd.f32 %v9511_v22, %v5251_v53  ;;  %v5250_v15 = vld [vmem:[#allocation5 + $0x40] sm:$0xff] }
 0x356   : > { %5023 = vst.msk [vmem:[#allocation5 + $0x60] sm:$0xff] %vm874_vm1, %v5007_v0  ;;  %v5266_v57 = vadd.f32 %v5250_v15, %v9514_v58  ;;  %v7528_v45 = vpop.f32.mrb[136].mxu1  ;;  %v9611_v19 = vpop.f32.mrb[166].mxu0  ;;  %v5509_v52 = vld [vmem:[#allocation5 + $0x28] sm:$0xff] }
 0x357   : > { %5283 = vst.msk [vmem:[#allocation5 + $0x48] sm:$0xff] %vm874_vm1, %v5267_v2  ;;  %v5010_v11 = vadd.f32 %v7528_v45, %v4994_v49  ;;  %v4970_v63 = vpop.f32.mrb[137].mxu1  ;;  %v9614_v27 = vpop.f32.mrb[167].mxu0  ;;  %v5508_v36 = vld [vmem:[#allocation5 + $0x20] sm:$0xff] }
 0x358   : > { %5282 = vst.msk [vmem:[#allocation5 + $0x40] sm:$0xff] %vm874_vm1, %v5266_v57  ;;  %v5009_v1 = vadd.f32 %v4993_v24, %v4970_v63  ;;  %v5253_v22 = vld [vmem:[#allocation5 + $0x58] sm:$0xff] }
 0x359   : > { %5026 = vst.msk [vmem:[#allocation5 + $0x78] sm:$0xff] %vm874_vm1, %v5010_v11  ;;  %v5269_v54 = vadd.f32 %v9521_v30, %v5253_v22  ;;  %v5252_v58 = vld [vmem:[#allocation5 + $0x50] sm:$0xff] }
 0x35a   : > { %5025 = vst.msk [vmem:[#allocation5 + $0x70] sm:$0xff] %vm874_vm1, %v5009_v1  ;;  %v5268_v14 = vadd.f32 %v5252_v58, %v9524_v16  ;;  %v7559_v34 = vpop.f32.mrb[138].mxu1  ;;  %v9621_v3 = vpop.f32.mrb[168].mxu0  ;;  %v5511_v6 = vld [vmem:[#allocation5 + $0x38] sm:$0xff] }
 0x35b   : > { %5285 = vst.msk [vmem:[#allocation5 + $0x58] sm:$0xff] %vm874_vm1, %v5269_v54  ;;  %v5521_v32 = vadd.f32 %v7559_v34, %v5505_v5  ;;  %v5425_v28 = vpop.f32.mrb[139].mxu1  ;;  %v9624_v9 = vpop.f32.mrb[169].mxu0  ;;  %v5510_v53 = vld [vmem:[#allocation5 + $0x30] sm:$0xff] }
 0x35c   : > { %5284 = vst.msk [vmem:[#allocation5 + $0x50] sm:$0xff] %vm874_vm1, %v5268_v14  ;;  %v5520_v21 = vadd.f32 %v5504_v12, %v5425_v28  ;;  %v5255_v30 = vld [vmem:[#allocation5 + $0x68] sm:$0xff] }
 0x35d   : > { %5537 = vst.msk [vmem:[#allocation5 + $0x8] sm:$0xff] %vm874_vm1, %v5521_v32  ;;  %v5271_v59 = vadd.f32 %v9531_v50, %v5255_v30  ;;  %v5254_v16 = vld [vmem:[#allocation5 + $0x60] sm:$0xff] }
 0x35e   : > { %5536 = vst.msk [vmem:[#allocation5] sm:$0xff] %vm874_vm1, %v5520_v21  ;;  %v5270_v44 = vadd.f32 %v5254_v16, %v9534_v29  ;;  %v7562_v4 = vpop.f32.mrb[140].mxu1  ;;  %v5513_v49 = vld [vmem:[#allocation5 + $0x48] sm:$0xff] }
 0x35f   : > { %5287 = vst.msk [vmem:[#allocation5 + $0x68] sm:$0xff] %vm874_vm1, %v5271_v59  ;;  %v5523_v40 = vadd.f32 %v7562_v4, %v5507_v43  ;;  %v5435_v25 = vpop.f32.mrb[141].mxu1  ;;  %v5512_v24 = vld [vmem:[#allocation5 + $0x40] sm:$0xff] }
 0x360   : > { %5286 = vst.msk [vmem:[#allocation5 + $0x60] sm:$0xff] %vm874_vm1, %v5270_v44  ;;  %v5522_v13 = vadd.f32 %v5506_v60, %v5435_v25  ;;  %v5257_v50 = vld [vmem:[#allocation5 + $0x78] sm:$0xff] }
 0x361   : > { %5539 = vst.msk [vmem:[#allocation5 + $0x18] sm:$0xff] %vm874_vm1, %v5523_v40  ;;  %v5273_v33 = vadd.f32 %v9541_v31, %v5257_v50  ;;  %v5256_v29 = vld [vmem:[#allocation5 + $0x70] sm:$0xff] }
 0x362   : > { %5538 = vst.msk [vmem:[#allocation5 + $0x10] sm:$0xff] %vm874_vm1, %v5522_v13  ;;  %v5272_v18 = vadd.f32 %v5256_v29, %v9544_v47  ;;  %v7565_v37 = vpop.f32.mrb[142].mxu1  ;;  %v5515_v34 = vld [vmem:[#allocation5 + $0x58] sm:$0xff] }
 0x363   : > { %5289 = vst.msk [vmem:[#allocation5 + $0x78] sm:$0xff] %vm874_vm1, %v5273_v33  ;;  %v5525_v26 = vadd.f32 %v7565_v37, %v5509_v52  ;;  %v5445_v35 = vpop.f32.mrb[143].mxu1  ;;  %v5514_v12 = vld [vmem:[#allocation5 + $0x50] sm:$0xff] }
 0x364   : > { %5288 = vst.msk [vmem:[#allocation5 + $0x70] sm:$0xff] %vm874_vm1, %v5272_v18  ;;  %v5524_v7 = vadd.f32 %v5508_v36, %v5445_v35  ;;  %v5767_v46 = vld [vmem:[#allocation5 + $0x8] sm:$0xff] }
 0x365   : > { %5541 = vst.msk [vmem:[#allocation5 + $0x28] sm:$0xff] %vm874_vm1, %v5525_v26  ;;  %v5783_v31 = vadd.f32 %v9551_v62, %v5767_v46  ;;  %v5766_v51 = vld [vmem:[#allocation5] sm:$0xff] }
 0x366   : > { %5540 = vst.msk [vmem:[#allocation5 + $0x20] sm:$0xff] %vm874_vm1, %v5524_v7  ;;  %v5782_v47 = vadd.f32 %v5766_v51, %v9554_v39  ;;  %v7568_v55 = vpop.f32.mrb[144].mxu1  ;;  %v5517_v40 = vld [vmem:[#allocation5 + $0x68] sm:$0xff] }
 0x367   : > { %5799 = vst.msk [vmem:[#allocation5 + $0x8] sm:$0xff] %vm874_vm1, %v5783_v31  ;;  %v5527_v56 = vadd.f32 %v7568_v55, %v5511_v6  ;;  %v5455_v0 = vpop.f32.mrb[145].mxu1  ;;  %v5516_v33 = vld [vmem:[#allocation5 + $0x60] sm:$0xff] }
 0x368   : > { %5798 = vst.msk [vmem:[#allocation5] sm:$0xff] %vm874_vm1, %v5782_v47  ;;  %v5526_v2 = vadd.f32 %v5510_v53, %v5455_v0  ;;  %v5769_v15 = vld [vmem:[#allocation5 + $0x18] sm:$0xff] }
 0x369   : > { %5543 = vst.msk [vmem:[#allocation5 + $0x38] sm:$0xff] %vm874_vm1, %v5527_v56  ;;  %v5785_v62 = vadd.f32 %v9561_v8, %v5769_v15  ;;  %v5768_v57 = vld [vmem:[#allocation5 + $0x10] sm:$0xff]  ;;  %v9648_v8 = vld [vmem:[%s9804_s6] ss:$0 sm:$0xff] }
 0x36a   : > { %5542 = vst.msk [vmem:[#allocation5 + $0x30] sm:$0xff] %vm874_vm1, %v5526_v2  ;;  %v5784_v39 = vadd.f32 %v5768_v57, %v9564_v38  ;;  %v7571_v45 = vpop.f32.mrb[146].mxu1  ;;  %v5519_v46 = vld [vmem:[#allocation5 + $0x78] sm:$0xff] }
 0x36b   : > { %5801 = vst.msk [vmem:[#allocation5 + $0x18] sm:$0xff] %vm874_vm1, %v5785_v62  ;;  %v5529_v11 = vadd.f32 %v7571_v45, %v5513_v49  ;;  %v5465_v63 = vpop.f32.mrb[147].mxu1  ;;  %v5518_v6 = vld [vmem:[#allocation5 + $0x70] sm:$0xff] }
 0x36c   : > { %5800 = vst.msk [vmem:[#allocation5 + $0x10] sm:$0xff] %vm874_vm1, %v5784_v39  ;;  %v5528_v1 = vadd.f32 %v5512_v24, %v5465_v63  ;;  %v5771_v22 = vld [vmem:[#allocation5 + $0x28] sm:$0xff] }
 0x36d   : > { %5545 = vst.msk [vmem:[#allocation5 + $0x48] sm:$0xff] %vm874_vm1, %v5529_v11  ;;  %v5787_v38 = vadd.f32 %v9571_v10, %v5771_v22  ;;  %v5770_v54 = vld [vmem:[#allocation5 + $0x20] sm:$0xff] }
 0x36e   : > { %5544 = vst.msk [vmem:[#allocation5 + $0x40] sm:$0xff] %vm874_vm1, %v5528_v1  ;;  %v5786_v58 = vadd.f32 %v5770_v54, %v9574_v23  ;;  %v7574_v14 = vpop.f32.mrb[148].mxu1  ;;  %v5815_v5 = vld [vmem:[#allocation5 + $0x8] sm:$0xff] }
 0x36f   : > { %5803 = vst.msk [vmem:[#allocation5 + $0x28] sm:$0xff] %vm874_vm1, %v5787_v38  ;;  %v5531_v32 = vadd.f32 %v7574_v14, %v5515_v34  ;;  %v5475_v28 = vpop.f32.mrb[149].mxu1  ;;  %v5814_v21 = vld [vmem:[#allocation5] sm:$0xff]  ;;  %v5838_v30 = vadd.f32 %v9648_v8, %v5815_v5 }
 0x370   : > { %5802 = vst.msk [vmem:[#allocation5 + $0x20] sm:$0xff] %vm874_vm1, %v5786_v58  ;;  %v5530_v59 = vadd.f32 %v5514_v12, %v5475_v28  ;;  %v5773_v10 = vld [vmem:[#allocation5 + $0x38] sm:$0xff]  ;;  %v5837_v16 = vadd.f32 %v9648_v8, %v5814_v21 }
 0x371   : > { %5547 = vst.msk [vmem:[#allocation5 + $0x58] sm:$0xff] %vm874_vm1, %v5531_v32  ;;  %v5789_v23 = vadd.f32 %v9581_v41, %v5773_v10  ;;  %v5772_v44 = vld [vmem:[#allocation5 + $0x30] sm:$0xff]  ;;  %v5854_v29 = vmax.f32 %v5838_v30, 0.0 }
 0x372   : > { %5546 = vst.msk [vmem:[#allocation5 + $0x50] sm:$0xff] %vm874_vm1, %v5530_v59  ;;  %v5788_v4 = vadd.f32 %v5772_v44, %v9584_v17  ;;  %v7577_v43 = vpop.f32.mrb[150].mxu1  ;;  %v5853_v25 = vmax.f32 %v5837_v16, 0.0  ;;  %v5817_v60 = vld [vmem:[#allocation5 + $0x18] sm:$0xff] }
 0x373   : > { %5805 = vst.msk [vmem:[#allocation5 + $0x38] sm:$0xff] %vm874_vm1, %v5789_v23  ;;  %v5533_v13 = vadd.f32 %v7577_v43, %v5517_v40  ;;  %v5485_v50 = vpop.f32.mrb[151].mxu1  ;;  %v5816_v18 = vld [vmem:[#allocation5 + $0x10] sm:$0xff]  ;;  %v5840_v37 = vadd.f32 %v9648_v8, %v5817_v60 }
 0x374   : > { %5804 = vst.msk [vmem:[#allocation5 + $0x30] sm:$0xff] %vm874_vm1, %v5788_v4  ;;  %v5532_v41 = vadd.f32 %v5516_v33, %v5485_v50  ;;  %v5775_v52 = vld [vmem:[#allocation5 + $0x48] sm:$0xff]  ;;  %7609 = vmatprep.mubr.msk.f32.mxu1 %vm874_vm1, %v5853_v25  ;;  %v5839_v17 = vadd.f32 %v9648_v8, %v5816_v18 }
 0x375   : > { %5549 = vst.msk [vmem:[#allocation5 + $0x68] sm:$0xff] %vm874_vm1, %v5533_v13  ;;  %v5791_v26 = vadd.f32 %v9591_v61, %v5775_v52  ;;  %v5774_v35 = vld [vmem:[#allocation5 + $0x40] sm:$0xff]  ;;  %7610 = vmatmul.mubr.msk.f32.vlgmr.msra.gmra.mrb[154].mxu1 %vm874_vm1, %v5854_v29  ;;  %v5856_v56 = vmax.f32 %v5840_v37, 0.0  ;;  %v6074_v52 = vld [vmem:[%s7851_s26 + $0x8] sm:$0xff] }
 0x376   : > { %5548 = vst.msk [vmem:[#allocation5 + $0x60] sm:$0xff] %vm874_vm1, %v5532_v41  ;;  %v5790_v36 = vadd.f32 %v5774_v35, %v9594_v48  ;;  %v7580_v7 = vpop.f32.mrb[152].mxu1  ;;  %v5855_v31 = vmax.f32 %v5839_v17, 0.0  ;;  %v5819_v51 = vld [vmem:[#allocation5 + $0x28] sm:$0xff]  ;;  %v9717_v37 = vld [vmem:[%s9806_s8] ss:$0 sm:$0xff] }
 0x377   : > { %5807 = vst.msk [vmem:[#allocation5 + $0x48] sm:$0xff] %vm874_vm1, %v5791_v26  ;;  %v5535_v47 = vadd.f32 %v7580_v7, %v5519_v46  ;;  %v5495_v55 = vpop.f32.mrb[153].mxu1  ;;  %v5818_v0 = vld [vmem:[#allocation5 + $0x20] sm:$0xff]  ;;  %v5842_v61 = vadd.f32 %v9648_v8, %v5819_v51 }
 0x378   : > { %5806 = vst.msk [vmem:[#allocation5 + $0x40] sm:$0xff] %vm874_vm1, %v5790_v36  ;;  %v5534_v53 = vadd.f32 %v5518_v6, %v5495_v55  ;;  %v5777_v2 = vld [vmem:[#allocation5 + $0x58] sm:$0xff]  ;;  %7612 = vmatprep.mubr.msk.f32.mxu1 %vm874_vm1, %v5855_v31  ;;  %v5841_v48 = vadd.f32 %v9648_v8, %v5818_v0  ;;  %v6073_v26 = vld [vmem:[%s7851_s26] sm:$0xff]  ;;  %v6075_v6 = vld [vmem:[%s7851_s26 + $0x10] sm:$0xff] }
 0x379   : > { %5551 = vst.msk [vmem:[#allocation5 + $0x78] sm:$0xff] %vm874_vm1, %v5535_v47  ;;  %v5793_v15 = vadd.f32 %v9601_v42, %v5777_v2  ;;  %v5776_v62 = vld [vmem:[#allocation5 + $0x50] sm:$0xff]  ;;  %7613 = vmatmul.mubr.msk.f32.gmra.mrb[156].mxu1 %vm874_vm1, %v5856_v56  ;;  %v5858_v49 = vmax.f32 %v5842_v61, 0.0  ;;  %v6076_v31 = vld [vmem:[%s7851_s26 + $0x18] sm:$0xff] }
 0x37a   : > { %5550 = vst.msk [vmem:[#allocation5 + $0x70] sm:$0xff] %vm874_vm1, %v5534_v53  ;;  %v5792_v57 = vadd.f32 %v5776_v62, %v9604_v20  ;;  %v5857_v39 = vmax.f32 %v5841_v48, 0.0  ;;  %v5821_v45 = vld [vmem:[#allocation5 + $0x38] sm:$0xff]  ;;  %v6078_v48 = vld [vmem:[%s7851_s26 + $0x28] sm:$0xff] }
 0x37b   : > { %5809 = vst.msk [vmem:[#allocation5 + $0x58] sm:$0xff] %vm874_vm1, %v5793_v15  ;;  %v5820_v11 = vld [vmem:[#allocation5 + $0x30] sm:$0xff]  ;;  %v5844_v63 = vadd.f32 %v9648_v8, %v5821_v45 }
 0x37c   : > { %5808 = vst.msk [vmem:[#allocation5 + $0x50] sm:$0xff] %vm874_vm1, %v5792_v57  ;;  %v5779_v24 = vld [vmem:[#allocation5 + $0x68] sm:$0xff]  ;;  %7615 = vmatprep.mubr.msk.f32.mxu1 %vm874_vm1, %v5857_v39  ;;  %v5843_v42 = vadd.f32 %v9648_v8, %v5820_v11  ;;  %v6077_v39 = vld [vmem:[%s7851_s26 + $0x20] sm:$0xff] }
 0x37d   : > { %v5795_v1 = vadd.f32 %v9611_v19, %v5779_v24  ;;  %v5778_v22 = vld [vmem:[#allocation5 + $0x60] sm:$0xff]  ;;  %7616 = vmatmul.mubr.msk.f32.gmra.mrb[158].mxu1 %vm874_vm1, %v5858_v49  ;;  %v5860_v58 = vmax.f32 %v5844_v63, 0.0 }
 0x37e   : > { %v5794_v20 = vadd.f32 %v5778_v22, %v9614_v27  ;;  %v5859_v38 = vmax.f32 %v5843_v42, 0.0  ;;  %v5823_v54 = vld [vmem:[#allocation5 + $0x48] sm:$0xff]  ;;  %v6080_v42 = vld [vmem:[%s7851_s26 + $0x38] sm:$0xff] }
 0x37f   : > { %5811 = vst.msk [vmem:[#allocation5 + $0x68] sm:$0xff] %vm874_vm1, %v5795_v1  ;;  %v5822_v14 = vld [vmem:[#allocation5 + $0x40] sm:$0xff]  ;;  %v5846_v34 = vadd.f32 %v9648_v8, %v5823_v54 }
 0x380   : > { %5810 = vst.msk [vmem:[#allocation5 + $0x60] sm:$0xff] %vm874_vm1, %v5794_v20  ;;  %v5781_v5 = vld [vmem:[#allocation5 + $0x78] sm:$0xff]  ;;  %7618 = vmatprep.mubr.msk.f32.mxu1 %vm874_vm1, %v5859_v38  ;;  %v5845_v19 = vadd.f32 %v9648_v8, %v5822_v14  ;;  %v6079_v38 = vld [vmem:[%s7851_s26 + $0x30] sm:$0xff] }
 0x381   : > { %v5797_v32 = vadd.f32 %v9621_v3, %v5781_v5  ;;  %v5780_v28 = vld [vmem:[#allocation5 + $0x70] sm:$0xff]  ;;  %7619 = vmatmul.mubr.msk.f32.gmra.mrb[160].mxu1 %vm874_vm1, %v5860_v58  ;;  %v5862_v30 = vmax.f32 %v5846_v34, 0.0 }
 0x382   : > { %v5796_v27 = vadd.f32 %v5780_v28, %v9624_v9  ;;  %v5861_v12 = vmax.f32 %v5845_v19, 0.0  ;;  %v5825_v21 = vld [vmem:[#allocation5 + $0x58] sm:$0xff]  ;;  %v6082_v19 = vld [vmem:[%s7851_s26 + $0x48] sm:$0xff] }
 0x383   : > { %5813 = vst.msk [vmem:[#allocation5 + $0x78] sm:$0xff] %vm874_vm1, %v5797_v32  ;;  %v5824_v59 = vld [vmem:[#allocation5 + $0x50] sm:$0xff]  ;;  %v5848_v10 = vadd.f32 %v9648_v8, %v5825_v21 }
 0x384   : > { %5812 = vst.msk [vmem:[#allocation5 + $0x70] sm:$0xff] %vm874_vm1, %v5796_v27  ;;  %7621 = vmatprep.mubr.msk.f32.mxu1 %vm874_vm1, %v5861_v12  ;;  %v5847_v16 = vadd.f32 %v9648_v8, %v5824_v59  ;;  %v6081_v12 = vld [vmem:[%s7851_s26 + $0x40] sm:$0xff] }
 0x385   : > { %7622 = vmatmul.mubr.msk.f32.gmra.mrb[162].mxu1 %vm874_vm1, %v5862_v30  ;;  %v5864_v44 = vmax.f32 %v5848_v10, 0.0 }
 0x386   : > { %v5863_v3 = vmax.f32 %v5847_v16, 0.0  ;;  %v5827_v23 = vld [vmem:[#allocation5 + $0x68] sm:$0xff] }
 0x387   : > { %v5826_v9 = vld [vmem:[#allocation5 + $0x60] sm:$0xff]  ;;  %v5850_v4 = vadd.f32 %v9648_v8, %v5827_v23 }
 0x388   : > { %7624 = vmatprep.mubr.msk.f32.mxu1 %vm874_vm1, %v5863_v3  ;;  %v5849_v43 = vadd.f32 %v9648_v8, %v5826_v9  ;;  %v6084_v3 = vld [vmem:[%s7851_s26 + $0x58] sm:$0xff] }
 0x389   : > { %7625 = vmatmul.mubr.msk.f32.gmra.mrb[164].mxu1 %vm874_vm1, %v5864_v44  ;;  %v5866_v60 = vmax.f32 %v5850_v4, 0.0  ;;  %v6083_v4 = vld [vmem:[%s7851_s26 + $0x50] sm:$0xff] }
 0x38a   : > { %v5865_v40 = vmax.f32 %v5849_v43, 0.0  ;;  %v5829_v25 = vld [vmem:[#allocation5 + $0x78] sm:$0xff] }
 0x38b   : > { %v5828_v13 = vld [vmem:[#allocation5 + $0x70] sm:$0xff]  ;;  %v5852_v50 = vadd.f32 %v9648_v8, %v5829_v25 }
 0x38c   : > { %7627 = vmatprep.mubr.msk.f32.mxu1 %vm874_vm1, %v5865_v40  ;;  %v5851_v33 = vadd.f32 %v9648_v8, %v5828_v13 }
 0x38d   : > { %7628 = vmatmul.mubr.msk.f32.gmra.mrb[166].mxu1 %vm874_vm1, %v5866_v60  ;;  %v5868_v18 = vmax.f32 %v5852_v50, 0.0  ;;  %v6086_v50 = vld [vmem:[%s7851_s26 + $0x68] sm:$0xff] }
 0x38e   : > { %v5867_v29 = vmax.f32 %v5851_v33, 0.0 }
 0x390   : > { %7630 = vmatprep.mubr.msk.f32.mxu1 %vm874_vm1, %v5867_v29 }
 0x391   : > { %7631 = vmatmul.mubr.msk.f32.gmra.mrb[168].mxu1 %vm874_vm1, %v5868_v18 }
 0x448   : > { %v7611_v41 = vpop.f32.mrb[154].mxu1 }
 0x449   : > { %v6000_v8 = vadd.f32 %v7611_v41, %v9717_v37  ;;  %v5994_v17 = vpop.f32.mrb[155].mxu1  ;;  %v6085_v41 = vld [vmem:[%s7851_s26 + $0x60] sm:$0xff] }
 0x44a   : > { %v5995_v35 = vadd.f32 %v9717_v37, %v5994_v17 }
 0x44b   : > { %v6090_v36 = vadd.f32 %v6074_v52, %v6000_v8 }
 0x44c   : > { %v6089_v7 = vadd.f32 %v6073_v26, %v5995_v35  ;;  %v7614_v46 = vpop.f32.mrb[156].mxu1 }
 0x44d   : > { %v6106_v51 = vmax.f32 %v6090_v36, 0.0  ;;  %v6010_v47 = vadd.f32 %v7614_v46, %v9717_v37  ;;  %v6004_v55 = vpop.f32.mrb[157].mxu1  ;;  %v6088_v36 = vld [vmem:[%s7851_s26 + $0x78] sm:$0xff] }
 0x44e   : > { %v6105_v56 = vmax.f32 %v6089_v7, 0.0  ;;  %v6005_v0 = vadd.f32 %v9717_v37, %v6004_v55 }
 0x44f   : > { %6122 = vst.msk [vmem:[%s7856_s29 + $0x8] sm:$0xff] %vm528_vm0, %v6106_v51  ;;  %v6092_v61 = vadd.f32 %v6076_v31, %v6010_v47  ;;  %v6087_v51 = vld [vmem:[%s7851_s26 + $0x70] sm:$0xff] }
 0x450   : > { %6121 = vst.msk [vmem:[%s7856_s29] sm:$0xff] %vm528_vm0, %v6105_v56  ;;  %v6091_v53 = vadd.f32 %v6075_v6, %v6005_v0  ;;  %v7617_v2 = vpop.f32.mrb[158].mxu1 }
 0x451   : > { %v6108_v15 = vmax.f32 %v6092_v61, 0.0  ;;  %v6020_v62 = vadd.f32 %v7617_v2, %v9717_v37  ;;  %v6014_v57 = vpop.f32.mrb[159].mxu1 }
 0x452   : > { %v6107_v45 = vmax.f32 %v6091_v53, 0.0  ;;  %v6015_v49 = vadd.f32 %v9717_v37, %v6014_v57 }
 0x453   : > { %6124 = vst.msk [vmem:[%s7856_s29 + $0x18] sm:$0xff] %vm528_vm0, %v6108_v15  ;;  %v6094_v11 = vadd.f32 %v6078_v48, %v6020_v62 }
 0x454   : > { %6123 = vst.msk [vmem:[%s7856_s29 + $0x10] sm:$0xff] %vm528_vm0, %v6107_v45  ;;  %v6093_v63 = vadd.f32 %v6077_v39, %v6015_v49  ;;  %v7620_v24 = vpop.f32.mrb[160].mxu1 }
 0x455   : > { %v6110_v1 = vmax.f32 %v6094_v11, 0.0  ;;  %v6030_v22 = vadd.f32 %v7620_v24, %v9717_v37  ;;  %v6024_v20 = vpop.f32.mrb[161].mxu1 }
 0x456   : > { %v6109_v54 = vmax.f32 %v6093_v63, 0.0  ;;  %v6025_v58 = vadd.f32 %v9717_v37, %v6024_v20 }
 0x457   : > { %6126 = vst.msk [vmem:[%s7856_s29 + $0x28] sm:$0xff] %vm528_vm0, %v6110_v1  ;;  %v6096_v14 = vadd.f32 %v6080_v42, %v6030_v22 }
 0x458   : > { %6125 = vst.msk [vmem:[%s7856_s29 + $0x20] sm:$0xff] %vm528_vm0, %v6109_v54  ;;  %v6095_v34 = vadd.f32 %v6079_v38, %v6025_v58  ;;  %v7623_v5 = vpop.f32.mrb[162].mxu1 }
 0x459   : > { %v6112_v32 = vmax.f32 %v6096_v14, 0.0  ;;  %v6040_v28 = vadd.f32 %v7623_v5, %v9717_v37  ;;  %v6034_v27 = vpop.f32.mrb[163].mxu1 }
 0x45a   : > { %v6111_v21 = vmax.f32 %v6095_v34, 0.0  ;;  %v6035_v30 = vadd.f32 %v9717_v37, %v6034_v27 }
 0x45b   : > { %6128 = vst.msk [vmem:[%s7856_s29 + $0x38] sm:$0xff] %vm528_vm0, %v6112_v32  ;;  %v6098_v59 = vadd.f32 %v6082_v19, %v6040_v28 }
 0x45c   : > { %6127 = vst.msk [vmem:[%s7856_s29 + $0x30] sm:$0xff] %vm528_vm0, %v6111_v21  ;;  %v6097_v10 = vadd.f32 %v6081_v12, %v6035_v30  ;;  %v7626_v16 = vpop.f32.mrb[164].mxu1 }
 0x45d   : > { %v6114_v23 = vmax.f32 %v6098_v59, 0.0  ;;  %v6050_v44 = vadd.f32 %v7626_v16, %v9717_v37  ;;  %v6044_v9 = vpop.f32.mrb[165].mxu1 }
 0x45e   : > { %v6113_v43 = vmax.f32 %v6097_v10, 0.0  ;;  %v6045_v40 = vadd.f32 %v9717_v37, %v6044_v9 }
 0x45f   : > { %6130 = vst.msk [vmem:[%s7856_s29 + $0x48] sm:$0xff] %vm528_vm0, %v6114_v23  ;;  %v6100_v25 = vadd.f32 %v6084_v3, %v6050_v44 }
 0x460   : > { %6129 = vst.msk [vmem:[%s7856_s29 + $0x40] sm:$0xff] %vm528_vm0, %v6113_v43  ;;  %v6099_v60 = vadd.f32 %v6083_v4, %v6045_v40  ;;  %v7629_v13 = vpop.f32.mrb[166].mxu1 }
 0x461   : > { %v6116_v33 = vmax.f32 %v6100_v25, 0.0  ;;  %v6060_v29 = vadd.f32 %v7629_v13, %v9717_v37  ;;  %v6054_v18 = vpop.f32.mrb[167].mxu1 }
 0x462   : > { %v6115_v52 = vmax.f32 %v6099_v60, 0.0  ;;  %v6055_v8 = vadd.f32 %v9717_v37, %v6054_v18 }
 0x463   : > { %6132 = vst.msk [vmem:[%s7856_s29 + $0x58] sm:$0xff] %vm528_vm0, %v6116_v33  ;;  %v6102_v17 = vadd.f32 %v6086_v50, %v6060_v29 }
 0x464   : > { %6131 = vst.msk [vmem:[%s7856_s29 + $0x50] sm:$0xff] %vm528_vm0, %v6115_v52  ;;  %v6101_v26 = vadd.f32 %v6085_v41, %v6055_v8  ;;  %v7632_v35 = vpop.f32.mrb[168].mxu1 }
 0x465   : > { %v6118_v7 = vmax.f32 %v6102_v17, 0.0  ;;  %v6070_v46 = vadd.f32 %v7632_v35, %v9717_v37  ;;  %v6064_v31 = vpop.f32.mrb[169].mxu1 }
 0x466   : > { %v6117_v47 = vmax.f32 %v6101_v26, 0.0  ;;  %v6065_v55 = vadd.f32 %v9717_v37, %v6064_v31 }
 0x467   : > { %6134 = vst.msk [vmem:[%s7856_s29 + $0x68] sm:$0xff] %vm528_vm0, %v6118_v7  ;;  %v6104_v6 = vadd.f32 %v6088_v36, %v6070_v46 }
 0x468   : > { %6133 = vst.msk [vmem:[%s7856_s29 + $0x60] sm:$0xff] %vm528_vm0, %v6117_v47  ;;  %v6103_v56 = vadd.f32 %v6087_v51, %v6065_v55 }
 0x469   : > { %v6120_v0 = vmax.f32 %v6104_v6, 0.0 }
 0x46a   : > { %v6119_v61 = vmax.f32 %v6103_v56, 0.0 }
 0x46b   : > { %6136 = vst.msk [vmem:[%s7856_s29 + $0x78] sm:$0xff] %vm528_vm0, %v6120_v0 }
 0x46c   : > { %6135 = vst.msk [vmem:[%s7856_s29 + $0x70] sm:$0xff] %vm528_vm0, %v6119_v61 }
 0x46d PF: > { %s19_s13 = sadd.s32 1, %s7754_s13   ;;  %s9813_s30 = smov %s7746_s11 }
 0x46e   : > { %p16_p1 = scmp.ge.s32.totalorder %s19_s13, 6   ;;  %s9814_s10 = smov %s7750_s12 }
 0x46f   : > { %s9815_s11 = smov %s9818_s14  ;;  %s9816_s12 = smov %s9822_s15 }
 0x470   :  { %18 = sbr.rel (!%p16_p1) target bundleno = 4 (0x4), region = 139 }

</bundles_post_ra>
